<compile_context>
chip_gen: v5e
topology: v5e:2x2
jax: 0.10.0
libtpu: 0.0.40
codegen_flags: <defaults>
</compile_context>

<pallas_src>
import math

import jax
import jax.numpy as jnp
from jax.experimental import pallas as pl
from jax.experimental.pallas import tpu as pltpu

# ----------------------------- small config ---------------------------------
B = 2            # batch
L = 8            # sequence length
VOCAB = 50       # vocab size (synthetic)
MAX_POS = 16
D = 32           # hidden dim (stands in for 768)
H = 4            # attention heads
DH = D // H
FFN = 64         # intermediate dim
N_LAYERS = 2
N_CLASSES = 3

# Mamba(d_model=D, d_state=16, d_conv=4, expand=2)
D_STATE = 16
D_CONV = 4
EXPAND = 2
D_INNER = EXPAND * D
DT_RANK = math.ceil(D / 16)


# ----------------------------- fused kernel ----------------------------------
def _forward_kernel(
    emb_ref, bias_ref, emb_ln_g_ref, emb_ln_b_ref,
    wqkv_ref, bqkv_ref, wo_ref, bo_ref, ln1_g_ref, ln1_b_ref,
    wi_ref, bi_ref, wf_ref, bf_ref, ln2_g_ref, ln2_b_ref,
    in_proj_w_ref, conv_w_ref, conv_b_ref,
    xp_dt_w_ref, xp_bcT_w_ref,
    dt_proj_w_ref, dt_proj_b_ref, a_t_ref, d_vec_ref, out_proj_w_ref,
    fc_w_ref, fc_b_ref,
    o_ref):
  """One grid step == one batch element: encoder + Mamba + classifier."""
  f32 = jnp.float32
  bf16 = jnp.bfloat16
  seq = emb_ref.shape[1]
  d_model = emb_ref.shape[2]

  def ln(y, g, b):
    mu = jnp.mean(y, axis=-1, keepdims=True)
    c = y - mu
    var = jnp.mean(c * c, axis=-1, keepdims=True)
    return c * jax.lax.rsqrt(var + 1e-12) * g + b

  def mm(x, w):      # bf16 MXU matmul, f32 accumulation (w already bf16)
    return jnp.dot(x.astype(bf16), w, preferred_element_type=f32)

  # ---- embeddings LayerNorm ----
  x = ln(emb_ref[0], emb_ln_g_ref[...], emb_ln_b_ref[...])        # (L, D)
  bias = bias_ref[0]                                              # (1, L)

  # ---- BERT encoder layers (static unroll) ----
  for layer in range(N_LAYERS):
    # 1/sqrt(DH) is already folded into the Q slice of wqkv/bqkv.
    qkv = mm(x, wqkv_ref[layer]) + bqkv_ref[layer]                # (L, 3D)
    q = qkv[:, :d_model]
    k = qkv[:, d_model:2 * d_model]
    v = qkv[:, 2 * d_model:]
    wo_l = wo_ref[layer]                                          # (D, D) bf16

    attn = jnp.zeros((seq, d_model), f32)
    for hh in range(H):
      c0 = hh * DH
      qh = q[:, c0:c0 + DH]
      kh = k[:, c0:c0 + DH]
      vh = v[:, c0:c0 + DH]
      s = jnp.einsum("qd,kd->qk", qh, kh,
                     preferred_element_type=f32) + bias           # (L, L)
      s = s - jnp.max(s, axis=-1, keepdims=True)
      p = jnp.exp(s)
      p = p * pl.reciprocal(jnp.sum(p, axis=-1, keepdims=True), approx=True)
      ctx_h = jnp.dot(p, vh, preferred_element_type=f32)          # (L, DH)
      # fold the head concat directly into the output projection
      attn = attn + mm(ctx_h, wo_l[c0:c0 + DH, :])
    attn = attn + bo_ref[layer]

    h1 = ln(attn + x, ln1_g_ref[layer], ln1_b_ref[layer])
    # TODO(synk): HF BERT uses exact erf GELU; tanh-approx GELU used in-kernel.
    inter = jax.nn.gelu(mm(h1, wi_ref[layer]) + bi_ref[layer], approximate=True)
    ffn = mm(inter, wf_ref[layer]) + bf_ref[layer]
    x = ln(ffn + h1, ln2_g_ref[layer], ln2_b_ref[layer])

  # ---- Mamba block ----
  xz = mm(x, in_proj_w_ref[...])                                  # (L, 2I) lane-dense
  x_in = xz[:, :D_INNER]
  z = xz[:, D_INNER:]

  # causal depthwise conv1d + SiLU (zero history, taps shifted along sublanes)
  cw = conv_w_ref[...]                                            # (K, I)
  acc = x_in * cw[D_CONV - 1:D_CONV, :]
  for kk in range(D_CONV - 1):
    shift = D_CONV - 1 - kk
    shifted = jnp.concatenate(
        [jnp.zeros((shift, D_INNER), f32), x_in[:seq - shift, :]], axis=0)
    acc = acc + shifted * cw[kk:kk + 1, :]
  acc = acc + conv_b_ref[...]
  u = acc * jax.nn.sigmoid(acc)                                   # (L, I)

  # SSM parameters (small path kept in f32 for the exp/softplus chain)
  dt_low = jnp.dot(u, xp_dt_w_ref[...], preferred_element_type=f32)      # (L, R)
  dt = jax.nn.softplus(
      jnp.dot(dt_low, dt_proj_w_ref[...], preferred_element_type=f32)
      + dt_proj_b_ref[...])                                       # (L, I)
  # B and C produced by ONE fused matmul, pre-transposed (2S, L): the scan
  # then needs no MXU work and no transposes.
  bc = jnp.einsum("si,li->sl", xp_bcT_w_ref[...], u,
                  preferred_element_type=f32)                     # (2S, L)
  bT = bc[:D_STATE, :]                                            # (S, L)
  cT = bc[D_STATE:, :]                                            # (S, L)

  a_t = a_t_ref[...]                                              # (S, I) = (-exp(A_log)).T
  du = dt * u                                                     # (L, I)
  silu_z = z * jax.nn.sigmoid(z)                                  # (L, I)

  # Gated D*u skip path pooled in bulk, off the serial scan path:
  #   sum_t (D*u_t) * silu(z_t)
  y_sum = jnp.sum(d_vec_ref[...] * u * silu_z, axis=0, keepdims=True)  # (1, I)

  # selective scan, statically unrolled; gated mean-over-seq accumulated on the
  # fly.  (mean commutes with the linear, bias-free out_proj, so out_proj runs
  # once on the pooled row -> identical logits to per-position out_proj + mean.)
  h_state = jnp.zeros((D_STATE, D_INNER), f32)
  for t in range(seq):
    dA = jnp.exp(dt[t:t + 1, :] * a_t)                            # (S, I)
    h_state = dA * h_state + bT[:, t:t + 1] * du[t:t + 1, :]      # (S, I)
    y_t = jnp.sum(cT[:, t:t + 1] * h_state, axis=0, keepdims=True)  # (1, I)
    y_sum = y_sum + y_t * silu_z[t:t + 1, :]                      # gate w/ SiLU(z)

  pooled_y = y_sum * (1.0 / seq)                                  # (1, I) unmasked mean
  pooled = mm(pooled_y, out_proj_w_ref[...])                      # (1, D)
  o_ref[0] = (jnp.dot(pooled, fc_w_ref[...], preferred_element_type=f32)
              + fc_b_ref[...])                                    # (1, N_CLASSES)


# ----------------------------- parameters ------------------------------------
def init_params(key):
  keys = iter(jax.random.split(key, 64))

  def nrm(shape, scale=0.02):
    return scale * jax.random.normal(next(keys), shape, dtype=jnp.float32)

  p = {
      "word_emb": nrm((VOCAB, D)),
      "pos_emb": nrm((MAX_POS, D)),
      "type_emb": nrm((2, D)),
      "emb_ln_g": jnp.ones((1, D), jnp.float32),
      "emb_ln_b": jnp.zeros((1, D), jnp.float32),
  }
  layers = []
  for _ in range(N_LAYERS):
    layers.append({
        "wq": nrm((D, D)), "bq": jnp.zeros((1, D), jnp.float32),
        "wk": nrm((D, D)), "bk": jnp.zeros((1, D), jnp.float32),
        "wv": nrm((D, D)), "bv": jnp.zeros((1, D), jnp.float32),
        "wo": nrm((D, D)), "bo": jnp.zeros((1, D), jnp.float32),
        "ln1_g": jnp.ones((1, D), jnp.float32),
        "ln1_b": jnp.zeros((1, D), jnp.float32),
        "wi": nrm((D, FFN)), "bi": jnp.zeros((1, FFN), jnp.float32),
        "wf": nrm((FFN, D)), "bf": jnp.zeros((1, D), jnp.float32),
        "ln2_g": jnp.ones((1, D), jnp.float32),
        "ln2_b": jnp.zeros((1, D), jnp.float32),
    })
  p["layers"] = layers

  # Mamba(d_model=D, d_state=16, d_conv=4, expand=2)
  dt = jnp.exp(
      jax.random.uniform(next(keys), (D_INNER,), jnp.float32)
      * (math.log(0.1) - math.log(1e-3)) + math.log(1e-3))
  m = {
      "in_proj_w": nrm((D, 2 * D_INNER)),                # bias=False
      "conv_w": nrm((D_CONV, D_INNER), 0.1),             # depthwise, (K, C)
      "conv_b": jnp.zeros((1, D_INNER), jnp.float32),
      "x_proj_w": nrm((D_INNER, DT_RANK + 2 * D_STATE)),  # bias=False
      "dt_proj_w": nrm((DT_RANK, D_INNER), DT_RANK ** -0.5),
      "dt_proj_b": (dt + jnp.log(-jnp.expm1(-dt))).reshape(1, D_INNER),
      "A_log": jnp.log(jnp.broadcast_to(
          jnp.arange(1, D_STATE + 1, dtype=jnp.float32), (D_INNER, D_STATE))),
      "D": jnp.ones((1, D_INNER), jnp.float32),
      "out_proj_w": nrm((D_INNER, D)),                   # bias=False
  }
  p["mamba"] = m
  p["fc_w"] = nrm((D, N_CLASSES))
  p["fc_b"] = jnp.zeros((1, N_CLASSES), jnp.float32)
  return p


# ----------------------------- forward pass -----------------------------------
def bert_mamba_forward(params, input_ids, attention_mask):
  bb, ll = input_ids.shape
  bf16 = jnp.bfloat16

  # glue: embedding gathers + additive attention-mask bias (HF style).
  emb = (jnp.take(params["word_emb"], input_ids, axis=0)
         + params["pos_emb"][:ll][None, :, :]
         + params["type_emb"][0][None, None, :])                    # (B, L, D)
  bias = ((1.0 - attention_mask.astype(jnp.float32)) * -1e9)[:, None, :]  # (B,1,L)

  # pack per-layer weights; big matmul weights to bf16 (halves VMEM/DMA bytes);
  # fold the 1/sqrt(head_dim) attention scale into the Q projection (trace-time).
  scale = 1.0 / math.sqrt(DH)
  layers = params["layers"]
  wqkv = jnp.stack([jnp.concatenate([l["wq"] * scale, l["wk"], l["wv"]], axis=1)
                    for l in layers]).astype(bf16)                  # (NL, D, 3D)
  bqkv = jnp.stack([jnp.concatenate([l["bq"] * scale, l["bk"], l["bv"]], axis=1)
                    for l in layers])                               # (NL, 1, 3D)
  wo = jnp.stack([l["wo"] for l in layers]).astype(bf16)
  bo = jnp.stack([l["bo"] for l in layers])
  ln1_g = jnp.stack([l["ln1_g"] for l in layers])
  ln1_b = jnp.stack([l["ln1_b"] for l in layers])
  wi = jnp.stack([l["wi"] for l in layers]).astype(bf16)
  bi = jnp.stack([l["bi"] for l in layers])
  wf = jnp.stack([l["wf"] for l in layers]).astype(bf16)
  bf = jnp.stack([l["bf"] for l in layers])
  ln2_g = jnp.stack([l["ln2_g"] for l in layers])
  ln2_b = jnp.stack([l["ln2_b"] for l in layers])

  mp = params["mamba"]
  xp = mp["x_proj_w"]                                  # (I, R + 2S)
  xp_dt = xp[:, :DT_RANK]                              # (I, R)
  xp_bcT = xp[:, DT_RANK:].T                           # (2S, I)  B;C pre-transposed
  a_t = (-jnp.exp(mp["A_log"])).T                      # (S, I)

  weights = [
      params["emb_ln_g"], params["emb_ln_b"],
      wqkv, bqkv, wo, bo, ln1_g, ln1_b, wi, bi, wf, bf, ln2_g, ln2_b,
      mp["in_proj_w"].astype(bf16), mp["conv_w"], mp["conv_b"],
      xp_dt, xp_bcT,
      mp["dt_proj_w"], mp["dt_proj_b"], a_t, mp["D"],
      mp["out_proj_w"].astype(bf16),
      params["fc_w"], params["fc_b"],
  ]

  def full_spec(a):
    nd = a.ndim
    return pl.BlockSpec(a.shape, lambda b, _n=nd: (0,) * _n)

  in_specs = ([pl.BlockSpec((1, ll, D), lambda b: (b, 0, 0)),     # emb
               pl.BlockSpec((1, 1, ll), lambda b: (b, 0, 0))]     # mask bias
              + [full_spec(a) for a in weights])                  # resident weights

  out = pl.pallas_call(
      _forward_kernel,
      grid=(bb,),
      in_specs=in_specs,
      out_specs=pl.BlockSpec((1, 1, N_CLASSES), lambda b: (b, 0, 0)),
      out_shape=jax.ShapeDtypeStruct((bb, 1, N_CLASSES), jnp.float32),
      compiler_params=pltpu.CompilerParams(
          dimension_semantics=("parallel",)),      # batch splits across TCs (v7x)
  )(emb, bias, *weights)
  return out[:, 0, :]


# ----------------------------- main -------------------------------------------
if __name__ == "__main__":
  key = jax.random.PRNGKey(0)
  pkey, ikey = jax.random.split(key)
  params = init_params(pkey)

  input_ids = jax.random.randint(ikey, (B, L), 0, VOCAB, dtype=jnp.int32)
  attention_mask = jnp.array(
      [[1] * L, [1] * (L - 2) + [0, 0]], dtype=jnp.int32)

  logits = jax.jit(bert_mamba_forward)(params, input_ids, attention_mask)
  jax.block_until_ready(logits)
  assert logits.shape == (B, N_CLASSES) and logits.dtype == jnp.float32
  print("KERNEL_OK")
</pallas_src>

<mosaic_0001>
module attributes {stable_mosaic.version = 11 : i64} {
  func.func @_forward_kernel(%arg0: i32, %arg1: memref<1x8x32xf32, #tpu.memory_space<vmem>>, %arg2: memref<1x1x8xf32, #tpu.memory_space<vmem>>, %arg3: memref<1x32xf32, #tpu.memory_space<vmem>>, %arg4: memref<1x32xf32, #tpu.memory_space<vmem>>, %arg5: memref<2x32x96xbf16, #tpu.memory_space<vmem>>, %arg6: memref<2x1x96xf32, #tpu.memory_space<vmem>>, %arg7: memref<2x32x32xbf16, #tpu.memory_space<vmem>>, %arg8: memref<2x1x32xf32, #tpu.memory_space<vmem>>, %arg9: memref<2x1x32xf32, #tpu.memory_space<vmem>>, %arg10: memref<2x1x32xf32, #tpu.memory_space<vmem>>, %arg11: memref<2x32x64xbf16, #tpu.memory_space<vmem>>, %arg12: memref<2x1x64xf32, #tpu.memory_space<vmem>>, %arg13: memref<2x64x32xbf16, #tpu.memory_space<vmem>>, %arg14: memref<2x1x32xf32, #tpu.memory_space<vmem>>, %arg15: memref<2x1x32xf32, #tpu.memory_space<vmem>>, %arg16: memref<2x1x32xf32, #tpu.memory_space<vmem>>, %arg17: memref<32x128xbf16, #tpu.memory_space<vmem>>, %arg18: memref<4x64xf32, #tpu.memory_space<vmem>>, %arg19: memref<1x64xf32, #tpu.memory_space<vmem>>, %arg20: memref<64x2xf32, #tpu.memory_space<vmem>>, %arg21: memref<32x64xf32, #tpu.memory_space<vmem>>, %arg22: memref<2x64xf32, #tpu.memory_space<vmem>>, %arg23: memref<1x64xf32, #tpu.memory_space<vmem>>, %arg24: memref<16x64xf32, #tpu.memory_space<vmem>>, %arg25: memref<1x64xf32, #tpu.memory_space<vmem>>, %arg26: memref<64x32xbf16, #tpu.memory_space<vmem>>, %arg27: memref<32x3xf32, #tpu.memory_space<vmem>>, %arg28: memref<1x3xf32, #tpu.memory_space<vmem>>, %arg29: memref<1x1x3xf32, #tpu.memory_space<vmem>>) attributes {dimension_semantics = [#tpu.dimension_semantics<parallel>], iteration_bounds = array<i64: 2>, scalar_prefetch = 0 : i64, scratch_operands = 0 : i64, tpu.core_type = #tpu.core_type<tc>, window_params = [{transform_indices = @transform_0, window_bounds = array<i64: 1, 8, 32>}, {transform_indices = @transform_1, window_bounds = array<i64: 1, 1, 8>}, {pipeline_mode = #tpu.pipeline_mode<synchronous>, transform_indices = @transform_2, window_bounds = array<i64: 1, 32>}, {pipeline_mode = #tpu.pipeline_mode<synchronous>, transform_indices = @transform_3, window_bounds = array<i64: 1, 32>}, {pipeline_mode = #tpu.pipeline_mode<synchronous>, transform_indices = @transform_4, window_bounds = array<i64: 2, 32, 96>}, {pipeline_mode = #tpu.pipeline_mode<synchronous>, transform_indices = @transform_5, window_bounds = array<i64: 2, 1, 96>}, {pipeline_mode = #tpu.pipeline_mode<synchronous>, transform_indices = @transform_6, window_bounds = array<i64: 2, 32, 32>}, {pipeline_mode = #tpu.pipeline_mode<synchronous>, transform_indices = @transform_7, window_bounds = array<i64: 2, 1, 32>}, {pipeline_mode = #tpu.pipeline_mode<synchronous>, transform_indices = @transform_8, window_bounds = array<i64: 2, 1, 32>}, {pipeline_mode = #tpu.pipeline_mode<synchronous>, transform_indices = @transform_9, window_bounds = array<i64: 2, 1, 32>}, {pipeline_mode = #tpu.pipeline_mode<synchronous>, transform_indices = @transform_10, window_bounds = array<i64: 2, 32, 64>}, {pipeline_mode = #tpu.pipeline_mode<synchronous>, transform_indices = @transform_11, window_bounds = array<i64: 2, 1, 64>}, {pipeline_mode = #tpu.pipeline_mode<synchronous>, transform_indices = @transform_12, window_bounds = array<i64: 2, 64, 32>}, {pipeline_mode = #tpu.pipeline_mode<synchronous>, transform_indices = @transform_13, window_bounds = array<i64: 2, 1, 32>}, {pipeline_mode = #tpu.pipeline_mode<synchronous>, transform_indices = @transform_14, window_bounds = array<i64: 2, 1, 32>}, {pipeline_mode = #tpu.pipeline_mode<synchronous>, transform_indices = @transform_15, window_bounds = array<i64: 2, 1, 32>}, {pipeline_mode = #tpu.pipeline_mode<synchronous>, transform_indices = @transform_16, window_bounds = array<i64: 32, 128>}, {pipeline_mode = #tpu.pipeline_mode<synchronous>, transform_indices = @transform_17, window_bounds = array<i64: 4, 64>}, {pipeline_mode = #tpu.pipeline_mode<synchronous>, transform_indices = @transform_18, window_bounds = array<i64: 1, 64>}, {pipeline_mode = #tpu.pipeline_mode<synchronous>, transform_indices = @transform_19, window_bounds = array<i64: 64, 2>}, {pipeline_mode = #tpu.pipeline_mode<synchronous>, transform_indices = @transform_20, window_bounds = array<i64: 32, 64>}, {pipeline_mode = #tpu.pipeline_mode<synchronous>, transform_indices = @transform_21, window_bounds = array<i64: 2, 64>}, {pipeline_mode = #tpu.pipeline_mode<synchronous>, transform_indices = @transform_22, window_bounds = array<i64: 1, 64>}, {pipeline_mode = #tpu.pipeline_mode<synchronous>, transform_indices = @transform_23, window_bounds = array<i64: 16, 64>}, {pipeline_mode = #tpu.pipeline_mode<synchronous>, transform_indices = @transform_24, window_bounds = array<i64: 1, 64>}, {pipeline_mode = #tpu.pipeline_mode<synchronous>, transform_indices = @transform_25, window_bounds = array<i64: 64, 32>}, {pipeline_mode = #tpu.pipeline_mode<synchronous>, transform_indices = @transform_26, window_bounds = array<i64: 32, 3>}, {pipeline_mode = #tpu.pipeline_mode<synchronous>, transform_indices = @transform_27, window_bounds = array<i64: 1, 3>}, {transform_indices = @transform_28, window_bounds = array<i64: 1, 1, 3>}]} {
    %c0 = arith.constant 0 : index
    %c0_0 = arith.constant 0 : index
    %c0_1 = arith.constant 0 : index
    %0 = vector.load %arg1[%c0, %c0_0, %c0_1] : memref<1x8x32xf32, #tpu.memory_space<vmem>>, vector<1x8x32xf32>
    %1 = vector.shape_cast %0 : vector<1x8x32xf32> to vector<8x32xf32>
    %c0_2 = arith.constant 0 : index
    %c0_3 = arith.constant 0 : index
    %2 = vector.load %arg3[%c0_2, %c0_3] : memref<1x32xf32, #tpu.memory_space<vmem>>, vector<1x32xf32>
    %c0_4 = arith.constant 0 : index
    %c0_5 = arith.constant 0 : index
    %3 = vector.load %arg4[%c0_4, %c0_5] : memref<1x32xf32, #tpu.memory_space<vmem>>, vector<1x32xf32>
    %cst = arith.constant dense<0.000000e+00> : vector<8xf32>
    %4 = vector.multi_reduction <add>, %1, %cst [1] : vector<8x32xf32> to vector<8xf32>
    %5 = vector.shape_cast %4 : vector<8xf32> to vector<8x1xf32>
    %cst_6 = arith.constant 3.200000e+01 : f32
    %6 = vector.broadcast %cst_6 : f32 to vector<8x1xf32>
    %7 = arith.divf %5, %6 : vector<8x1xf32>
    %8 = vector.broadcast %7 : vector<8x1xf32> to vector<8x32xf32>
    %9 = arith.subf %1, %8 : vector<8x32xf32>
    %10 = arith.mulf %9, %9 : vector<8x32xf32>
    %cst_7 = arith.constant dense<0.000000e+00> : vector<8xf32>
    %11 = vector.multi_reduction <add>, %10, %cst_7 [1] : vector<8x32xf32> to vector<8xf32>
    %12 = vector.shape_cast %11 : vector<8xf32> to vector<8x1xf32>
    %cst_8 = arith.constant 3.200000e+01 : f32
    %13 = vector.broadcast %cst_8 : f32 to vector<8x1xf32>
    %14 = arith.divf %12, %13 : vector<8x1xf32>
    %cst_9 = arith.constant 9.99999996E-13 : f32
    %15 = vector.broadcast %cst_9 : f32 to vector<8x1xf32>
    %16 = arith.addf %14, %15 : vector<8x1xf32>
    %17 = math.rsqrt %16 : vector<8x1xf32>
    %18 = vector.broadcast %17 : vector<8x1xf32> to vector<8x32xf32>
    %19 = arith.mulf %9, %18 : vector<8x32xf32>
    %20 = vector.broadcast %2 : vector<1x32xf32> to vector<8x32xf32>
    %21 = arith.mulf %19, %20 : vector<8x32xf32>
    %22 = vector.broadcast %3 : vector<1x32xf32> to vector<8x32xf32>
    %23 = arith.addf %21, %22 : vector<8x32xf32>
    %c0_10 = arith.constant 0 : index
    %c0_11 = arith.constant 0 : index
    %c0_12 = arith.constant 0 : index
    %24 = vector.load %arg2[%c0_10, %c0_11, %c0_12] : memref<1x1x8xf32, #tpu.memory_space<vmem>>, vector<1x1x8xf32>
    %25 = vector.shape_cast %24 : vector<1x1x8xf32> to vector<1x8xf32>
    %c0_13 = arith.constant 0 : index
    %c0_14 = arith.constant 0 : index
    %c0_15 = arith.constant 0 : index
    %26 = vector.load %arg5[%c0_13, %c0_14, %c0_15] : memref<2x32x96xbf16, #tpu.memory_space<vmem>>, vector<1x32x96xbf16>
    %27 = vector.shape_cast %26 : vector<1x32x96xbf16> to vector<32x96xbf16>
    %28 = arith.truncf %23 : vector<8x32xf32> to vector<8x32xbf16>
    %cst_16 = arith.constant dense<0.000000e+00> : vector<8x96xf32>
    %29 = tpu.matmul %28, %27, %cst_16 {dimension_numbers = #tpu.dot_dimension_numbers<[1], [0], [0], [1], [0, 0, 1, 1], [], []>} : vector<8x32xbf16>, vector<32x96xbf16>, vector<8x96xf32> -> vector<8x96xf32>
    %c0_17 = arith.constant 0 : index
    %c0_18 = arith.constant 0 : index
    %c0_19 = arith.constant 0 : index
    %30 = vector.load %arg6[%c0_17, %c0_18, %c0_19] : memref<2x1x96xf32, #tpu.memory_space<vmem>>, vector<1x1x96xf32>
    %31 = vector.shape_cast %30 : vector<1x1x96xf32> to vector<1x96xf32>
    %32 = vector.broadcast %31 : vector<1x96xf32> to vector<8x96xf32>
    %33 = arith.addf %29, %32 : vector<8x96xf32>
    %34 = vector.extract_strided_slice %33 {offsets = [0, 0], sizes = [8, 32], strides = [1, 1]} : vector<8x96xf32> to vector<8x32xf32>
    %35 = vector.extract_strided_slice %33 {offsets = [0, 32], sizes = [8, 32], strides = [1, 1]} : vector<8x96xf32> to vector<8x32xf32>
    %36 = vector.extract_strided_slice %33 {offsets = [0, 64], sizes = [8, 32], strides = [1, 1]} : vector<8x96xf32> to vector<8x32xf32>
    %c0_20 = arith.constant 0 : index
    %c0_21 = arith.constant 0 : index
    %c0_22 = arith.constant 0 : index
    %37 = vector.load %arg7[%c0_20, %c0_21, %c0_22] : memref<2x32x32xbf16, #tpu.memory_space<vmem>>, vector<1x32x32xbf16>
    %38 = vector.shape_cast %37 : vector<1x32x32xbf16> to vector<32x32xbf16>
    %cst_23 = arith.constant 0.000000e+00 : f32
    %39 = vector.broadcast %cst_23 : f32 to vector<8x32xf32>
    %40 = vector.extract_strided_slice %34 {offsets = [0, 0], sizes = [8, 8], strides = [1, 1]} : vector<8x32xf32> to vector<8x8xf32>
    %41 = vector.extract_strided_slice %35 {offsets = [0, 0], sizes = [8, 8], strides = [1, 1]} : vector<8x32xf32> to vector<8x8xf32>
    %42 = vector.extract_strided_slice %36 {offsets = [0, 0], sizes = [8, 8], strides = [1, 1]} : vector<8x32xf32> to vector<8x8xf32>
    "tpu.trace_start"() <{level = 10 : i32, message = "qd,kd->qk"}> : () -> ()
    %cst_24 = arith.constant dense<0.000000e+00> : vector<8x8xf32>
    %43 = tpu.matmul %40, %41, %cst_24 {dimension_numbers = #tpu.dot_dimension_numbers<[1], [1], [0], [0], [0, 0, 1, 0], [], []>} : vector<8x8xf32>, vector<8x8xf32>, vector<8x8xf32> -> vector<8x8xf32>
    "tpu.trace_stop"() : () -> ()
    %44 = vector.broadcast %25 : vector<1x8xf32> to vector<8x8xf32>
    %45 = arith.addf %43, %44 : vector<8x8xf32>
    %cst_25 = arith.constant dense<0xFF800000> : vector<8xf32>
    %46 = vector.multi_reduction <maximumf>, %45, %cst_25 [1] : vector<8x8xf32> to vector<8xf32>
    %47 = vector.shape_cast %46 : vector<8xf32> to vector<8x1xf32>
    %48 = vector.broadcast %47 : vector<8x1xf32> to vector<8x8xf32>
    %49 = arith.subf %45, %48 : vector<8x8xf32>
    %50 = math.exp %49 : vector<8x8xf32>
    %cst_26 = arith.constant dense<0.000000e+00> : vector<8xf32>
    %51 = vector.multi_reduction <add>, %50, %cst_26 [1] : vector<8x8xf32> to vector<8xf32>
    %52 = vector.shape_cast %51 : vector<8xf32> to vector<8x1xf32>
    %53 = tpu.reciprocal %52 {approx = true} : vector<8x1xf32> -> vector<8x1xf32>
    %54 = vector.broadcast %53 : vector<8x1xf32> to vector<8x8xf32>
    %55 = arith.mulf %50, %54 : vector<8x8xf32>
    %cst_27 = arith.constant dense<0.000000e+00> : vector<8x8xf32>
    %56 = tpu.matmul %55, %42, %cst_27 {dimension_numbers = #tpu.dot_dimension_numbers<[1], [0], [0], [1], [0, 0, 1, 1], [], []>} : vector<8x8xf32>, vector<8x8xf32>, vector<8x8xf32> -> vector<8x8xf32>
    %57 = vector.extract_strided_slice %38 {offsets = [0, 0], sizes = [8, 32], strides = [1, 1]} : vector<32x32xbf16> to vector<8x32xbf16>
    %58 = arith.truncf %56 : vector<8x8xf32> to vector<8x8xbf16>
    %cst_28 = arith.constant dense<0.000000e+00> : vector<8x32xf32>
    %59 = tpu.matmul %58, %57, %cst_28 {dimension_numbers = #tpu.dot_dimension_numbers<[1], [0], [0], [1], [0, 0, 1, 1], [], []>} : vector<8x8xbf16>, vector<8x32xbf16>, vector<8x32xf32> -> vector<8x32xf32>
    %60 = arith.addf %39, %59 : vector<8x32xf32>
    %61 = vector.extract_strided_slice %34 {offsets = [0, 8], sizes = [8, 8], strides = [1, 1]} : vector<8x32xf32> to vector<8x8xf32>
    %62 = vector.extract_strided_slice %35 {offsets = [0, 8], sizes = [8, 8], strides = [1, 1]} : vector<8x32xf32> to vector<8x8xf32>
    %63 = vector.extract_strided_slice %36 {offsets = [0, 8], sizes = [8, 8], strides = [1, 1]} : vector<8x32xf32> to vector<8x8xf32>
    "tpu.trace_start"() <{level = 10 : i32, message = "qd,kd->qk"}> : () -> ()
    %cst_29 = arith.constant dense<0.000000e+00> : vector<8x8xf32>
    %64 = tpu.matmul %61, %62, %cst_29 {dimension_numbers = #tpu.dot_dimension_numbers<[1], [1], [0], [0], [0, 0, 1, 0], [], []>} : vector<8x8xf32>, vector<8x8xf32>, vector<8x8xf32> -> vector<8x8xf32>
    "tpu.trace_stop"() : () -> ()
    %65 = vector.broadcast %25 : vector<1x8xf32> to vector<8x8xf32>
    %66 = arith.addf %64, %65 : vector<8x8xf32>
    %cst_30 = arith.constant dense<0xFF800000> : vector<8xf32>
    %67 = vector.multi_reduction <maximumf>, %66, %cst_30 [1] : vector<8x8xf32> to vector<8xf32>
    %68 = vector.shape_cast %67 : vector<8xf32> to vector<8x1xf32>
    %69 = vector.broadcast %68 : vector<8x1xf32> to vector<8x8xf32>
    %70 = arith.subf %66, %69 : vector<8x8xf32>
    %71 = math.exp %70 : vector<8x8xf32>
    %cst_31 = arith.constant dense<0.000000e+00> : vector<8xf32>
    %72 = vector.multi_reduction <add>, %71, %cst_31 [1] : vector<8x8xf32> to vector<8xf32>
    %73 = vector.shape_cast %72 : vector<8xf32> to vector<8x1xf32>
    %74 = tpu.reciprocal %73 {approx = true} : vector<8x1xf32> -> vector<8x1xf32>
    %75 = vector.broadcast %74 : vector<8x1xf32> to vector<8x8xf32>
    %76 = arith.mulf %71, %75 : vector<8x8xf32>
    %cst_32 = arith.constant dense<0.000000e+00> : vector<8x8xf32>
    %77 = tpu.matmul %76, %63, %cst_32 {dimension_numbers = #tpu.dot_dimension_numbers<[1], [0], [0], [1], [0, 0, 1, 1], [], []>} : vector<8x8xf32>, vector<8x8xf32>, vector<8x8xf32> -> vector<8x8xf32>
    %78 = vector.extract_strided_slice %38 {offsets = [8, 0], sizes = [8, 32], strides = [1, 1]} : vector<32x32xbf16> to vector<8x32xbf16>
    %79 = arith.truncf %77 : vector<8x8xf32> to vector<8x8xbf16>
    %cst_33 = arith.constant dense<0.000000e+00> : vector<8x32xf32>
    %80 = tpu.matmul %79, %78, %cst_33 {dimension_numbers = #tpu.dot_dimension_numbers<[1], [0], [0], [1], [0, 0, 1, 1], [], []>} : vector<8x8xbf16>, vector<8x32xbf16>, vector<8x32xf32> -> vector<8x32xf32>
    %81 = arith.addf %60, %80 : vector<8x32xf32>
    %82 = vector.extract_strided_slice %34 {offsets = [0, 16], sizes = [8, 8], strides = [1, 1]} : vector<8x32xf32> to vector<8x8xf32>
    %83 = vector.extract_strided_slice %35 {offsets = [0, 16], sizes = [8, 8], strides = [1, 1]} : vector<8x32xf32> to vector<8x8xf32>
    %84 = vector.extract_strided_slice %36 {offsets = [0, 16], sizes = [8, 8], strides = [1, 1]} : vector<8x32xf32> to vector<8x8xf32>
    "tpu.trace_start"() <{level = 10 : i32, message = "qd,kd->qk"}> : () -> ()
    %cst_34 = arith.constant dense<0.000000e+00> : vector<8x8xf32>
    %85 = tpu.matmul %82, %83, %cst_34 {dimension_numbers = #tpu.dot_dimension_numbers<[1], [1], [0], [0], [0, 0, 1, 0], [], []>} : vector<8x8xf32>, vector<8x8xf32>, vector<8x8xf32> -> vector<8x8xf32>
    "tpu.trace_stop"() : () -> ()
    %86 = vector.broadcast %25 : vector<1x8xf32> to vector<8x8xf32>
    %87 = arith.addf %85, %86 : vector<8x8xf32>
    %cst_35 = arith.constant dense<0xFF800000> : vector<8xf32>
    %88 = vector.multi_reduction <maximumf>, %87, %cst_35 [1] : vector<8x8xf32> to vector<8xf32>
    %89 = vector.shape_cast %88 : vector<8xf32> to vector<8x1xf32>
    %90 = vector.broadcast %89 : vector<8x1xf32> to vector<8x8xf32>
    %91 = arith.subf %87, %90 : vector<8x8xf32>
    %92 = math.exp %91 : vector<8x8xf32>
    %cst_36 = arith.constant dense<0.000000e+00> : vector<8xf32>
    %93 = vector.multi_reduction <add>, %92, %cst_36 [1] : vector<8x8xf32> to vector<8xf32>
    %94 = vector.shape_cast %93 : vector<8xf32> to vector<8x1xf32>
    %95 = tpu.reciprocal %94 {approx = true} : vector<8x1xf32> -> vector<8x1xf32>
    %96 = vector.broadcast %95 : vector<8x1xf32> to vector<8x8xf32>
    %97 = arith.mulf %92, %96 : vector<8x8xf32>
    %cst_37 = arith.constant dense<0.000000e+00> : vector<8x8xf32>
    %98 = tpu.matmul %97, %84, %cst_37 {dimension_numbers = #tpu.dot_dimension_numbers<[1], [0], [0], [1], [0, 0, 1, 1], [], []>} : vector<8x8xf32>, vector<8x8xf32>, vector<8x8xf32> -> vector<8x8xf32>
    %99 = vector.extract_strided_slice %38 {offsets = [16, 0], sizes = [8, 32], strides = [1, 1]} : vector<32x32xbf16> to vector<8x32xbf16>
    %100 = arith.truncf %98 : vector<8x8xf32> to vector<8x8xbf16>
    %cst_38 = arith.constant dense<0.000000e+00> : vector<8x32xf32>
    %101 = tpu.matmul %100, %99, %cst_38 {dimension_numbers = #tpu.dot_dimension_numbers<[1], [0], [0], [1], [0, 0, 1, 1], [], []>} : vector<8x8xbf16>, vector<8x32xbf16>, vector<8x32xf32> -> vector<8x32xf32>
    %102 = arith.addf %81, %101 : vector<8x32xf32>
    %103 = vector.extract_strided_slice %34 {offsets = [0, 24], sizes = [8, 8], strides = [1, 1]} : vector<8x32xf32> to vector<8x8xf32>
    %104 = vector.extract_strided_slice %35 {offsets = [0, 24], sizes = [8, 8], strides = [1, 1]} : vector<8x32xf32> to vector<8x8xf32>
    %105 = vector.extract_strided_slice %36 {offsets = [0, 24], sizes = [8, 8], strides = [1, 1]} : vector<8x32xf32> to vector<8x8xf32>
    "tpu.trace_start"() <{level = 10 : i32, message = "qd,kd->qk"}> : () -> ()
    %cst_39 = arith.constant dense<0.000000e+00> : vector<8x8xf32>
    %106 = tpu.matmul %103, %104, %cst_39 {dimension_numbers = #tpu.dot_dimension_numbers<[1], [1], [0], [0], [0, 0, 1, 0], [], []>} : vector<8x8xf32>, vector<8x8xf32>, vector<8x8xf32> -> vector<8x8xf32>
    "tpu.trace_stop"() : () -> ()
    %107 = vector.broadcast %25 : vector<1x8xf32> to vector<8x8xf32>
    %108 = arith.addf %106, %107 : vector<8x8xf32>
    %cst_40 = arith.constant dense<0xFF800000> : vector<8xf32>
    %109 = vector.multi_reduction <maximumf>, %108, %cst_40 [1] : vector<8x8xf32> to vector<8xf32>
    %110 = vector.shape_cast %109 : vector<8xf32> to vector<8x1xf32>
    %111 = vector.broadcast %110 : vector<8x1xf32> to vector<8x8xf32>
    %112 = arith.subf %108, %111 : vector<8x8xf32>
    %113 = math.exp %112 : vector<8x8xf32>
    %cst_41 = arith.constant dense<0.000000e+00> : vector<8xf32>
    %114 = vector.multi_reduction <add>, %113, %cst_41 [1] : vector<8x8xf32> to vector<8xf32>
    %115 = vector.shape_cast %114 : vector<8xf32> to vector<8x1xf32>
    %116 = tpu.reciprocal %115 {approx = true} : vector<8x1xf32> -> vector<8x1xf32>
    %117 = vector.broadcast %116 : vector<8x1xf32> to vector<8x8xf32>
    %118 = arith.mulf %113, %117 : vector<8x8xf32>
    %cst_42 = arith.constant dense<0.000000e+00> : vector<8x8xf32>
    %119 = tpu.matmul %118, %105, %cst_42 {dimension_numbers = #tpu.dot_dimension_numbers<[1], [0], [0], [1], [0, 0, 1, 1], [], []>} : vector<8x8xf32>, vector<8x8xf32>, vector<8x8xf32> -> vector<8x8xf32>
    %120 = vector.extract_strided_slice %38 {offsets = [24, 0], sizes = [8, 32], strides = [1, 1]} : vector<32x32xbf16> to vector<8x32xbf16>
    %121 = arith.truncf %119 : vector<8x8xf32> to vector<8x8xbf16>
    %cst_43 = arith.constant dense<0.000000e+00> : vector<8x32xf32>
    %122 = tpu.matmul %121, %120, %cst_43 {dimension_numbers = #tpu.dot_dimension_numbers<[1], [0], [0], [1], [0, 0, 1, 1], [], []>} : vector<8x8xbf16>, vector<8x32xbf16>, vector<8x32xf32> -> vector<8x32xf32>
    %123 = arith.addf %102, %122 : vector<8x32xf32>
    %c0_44 = arith.constant 0 : index
    %c0_45 = arith.constant 0 : index
    %c0_46 = arith.constant 0 : index
    %124 = vector.load %arg8[%c0_44, %c0_45, %c0_46] : memref<2x1x32xf32, #tpu.memory_space<vmem>>, vector<1x1x32xf32>
    %125 = vector.shape_cast %124 : vector<1x1x32xf32> to vector<1x32xf32>
    %126 = vector.broadcast %125 : vector<1x32xf32> to vector<8x32xf32>
    %127 = arith.addf %123, %126 : vector<8x32xf32>
    %128 = arith.addf %127, %23 : vector<8x32xf32>
    %c0_47 = arith.constant 0 : index
    %c0_48 = arith.constant 0 : index
    %c0_49 = arith.constant 0 : index
    %129 = vector.load %arg9[%c0_47, %c0_48, %c0_49] : memref<2x1x32xf32, #tpu.memory_space<vmem>>, vector<1x1x32xf32>
    %130 = vector.shape_cast %129 : vector<1x1x32xf32> to vector<1x32xf32>
    %c0_50 = arith.constant 0 : index
    %c0_51 = arith.constant 0 : index
    %c0_52 = arith.constant 0 : index
    %131 = vector.load %arg10[%c0_50, %c0_51, %c0_52] : memref<2x1x32xf32, #tpu.memory_space<vmem>>, vector<1x1x32xf32>
    %132 = vector.shape_cast %131 : vector<1x1x32xf32> to vector<1x32xf32>
    %cst_53 = arith.constant dense<0.000000e+00> : vector<8xf32>
    %133 = vector.multi_reduction <add>, %128, %cst_53 [1] : vector<8x32xf32> to vector<8xf32>
    %134 = vector.shape_cast %133 : vector<8xf32> to vector<8x1xf32>
    %cst_54 = arith.constant 3.200000e+01 : f32
    %135 = vector.broadcast %cst_54 : f32 to vector<8x1xf32>
    %136 = arith.divf %134, %135 : vector<8x1xf32>
    %137 = vector.broadcast %136 : vector<8x1xf32> to vector<8x32xf32>
    %138 = arith.subf %128, %137 : vector<8x32xf32>
    %139 = arith.mulf %138, %138 : vector<8x32xf32>
    %cst_55 = arith.constant dense<0.000000e+00> : vector<8xf32>
    %140 = vector.multi_reduction <add>, %139, %cst_55 [1] : vector<8x32xf32> to vector<8xf32>
    %141 = vector.shape_cast %140 : vector<8xf32> to vector<8x1xf32>
    %cst_56 = arith.constant 3.200000e+01 : f32
    %142 = vector.broadcast %cst_56 : f32 to vector<8x1xf32>
    %143 = arith.divf %141, %142 : vector<8x1xf32>
    %cst_57 = arith.constant 9.99999996E-13 : f32
    %144 = vector.broadcast %cst_57 : f32 to vector<8x1xf32>
    %145 = arith.addf %143, %144 : vector<8x1xf32>
    %146 = math.rsqrt %145 : vector<8x1xf32>
    %147 = vector.broadcast %146 : vector<8x1xf32> to vector<8x32xf32>
    %148 = arith.mulf %138, %147 : vector<8x32xf32>
    %149 = vector.broadcast %130 : vector<1x32xf32> to vector<8x32xf32>
    %150 = arith.mulf %148, %149 : vector<8x32xf32>
    %151 = vector.broadcast %132 : vector<1x32xf32> to vector<8x32xf32>
    %152 = arith.addf %150, %151 : vector<8x32xf32>
    %c0_58 = arith.constant 0 : index
    %c0_59 = arith.constant 0 : index
    %c0_60 = arith.constant 0 : index
    %153 = vector.load %arg11[%c0_58, %c0_59, %c0_60] : memref<2x32x64xbf16, #tpu.memory_space<vmem>>, vector<1x32x64xbf16>
    %154 = vector.shape_cast %153 : vector<1x32x64xbf16> to vector<32x64xbf16>
    %155 = arith.truncf %152 : vector<8x32xf32> to vector<8x32xbf16>
    %cst_61 = arith.constant dense<0.000000e+00> : vector<8x64xf32>
    %156 = tpu.matmul %155, %154, %cst_61 {dimension_numbers = #tpu.dot_dimension_numbers<[1], [0], [0], [1], [0, 0, 1, 1], [], []>} : vector<8x32xbf16>, vector<32x64xbf16>, vector<8x64xf32> -> vector<8x64xf32>
    %c0_62 = arith.constant 0 : index
    %c0_63 = arith.constant 0 : index
    %c0_64 = arith.constant 0 : index
    %157 = vector.load %arg12[%c0_62, %c0_63, %c0_64] : memref<2x1x64xf32, #tpu.memory_space<vmem>>, vector<1x1x64xf32>
    %158 = vector.shape_cast %157 : vector<1x1x64xf32> to vector<1x64xf32>
    %159 = vector.broadcast %158 : vector<1x64xf32> to vector<8x64xf32>
    %160 = arith.addf %156, %159 : vector<8x64xf32>
    %161 = arith.mulf %160, %160 : vector<8x64xf32>
    %162 = arith.mulf %160, %161 : vector<8x64xf32>
    %cst_65 = arith.constant 4.471500e-02 : f32
    %163 = vector.broadcast %cst_65 : f32 to vector<8x64xf32>
    %164 = arith.mulf %163, %162 : vector<8x64xf32>
    %165 = arith.addf %160, %164 : vector<8x64xf32>
    %cst_66 = arith.constant 0.797884583 : f32
    %166 = vector.broadcast %cst_66 : f32 to vector<8x64xf32>
    %167 = arith.mulf %166, %165 : vector<8x64xf32>
    %168 = math.tanh %167 : vector<8x64xf32>
    %cst_67 = arith.constant 1.000000e+00 : f32
    %169 = vector.broadcast %cst_67 : f32 to vector<8x64xf32>
    %170 = arith.addf %169, %168 : vector<8x64xf32>
    %cst_68 = arith.constant 5.000000e-01 : f32
    %171 = vector.broadcast %cst_68 : f32 to vector<8x64xf32>
    %172 = arith.mulf %171, %170 : vector<8x64xf32>
    %173 = arith.mulf %160, %172 : vector<8x64xf32>
    %c0_69 = arith.constant 0 : index
    %c0_70 = arith.constant 0 : index
    %c0_71 = arith.constant 0 : index
    %174 = vector.load %arg13[%c0_69, %c0_70, %c0_71] : memref<2x64x32xbf16, #tpu.memory_space<vmem>>, vector<1x64x32xbf16>
    %175 = vector.shape_cast %174 : vector<1x64x32xbf16> to vector<64x32xbf16>
    %176 = arith.truncf %173 : vector<8x64xf32> to vector<8x64xbf16>
    %cst_72 = arith.constant dense<0.000000e+00> : vector<8x32xf32>
    %177 = tpu.matmul %176, %175, %cst_72 {dimension_numbers = #tpu.dot_dimension_numbers<[1], [0], [0], [1], [0, 0, 1, 1], [], []>} : vector<8x64xbf16>, vector<64x32xbf16>, vector<8x32xf32> -> vector<8x32xf32>
    %c0_73 = arith.constant 0 : index
    %c0_74 = arith.constant 0 : index
    %c0_75 = arith.constant 0 : index
    %178 = vector.load %arg14[%c0_73, %c0_74, %c0_75] : memref<2x1x32xf32, #tpu.memory_space<vmem>>, vector<1x1x32xf32>
    %179 = vector.shape_cast %178 : vector<1x1x32xf32> to vector<1x32xf32>
    %180 = vector.broadcast %179 : vector<1x32xf32> to vector<8x32xf32>
    %181 = arith.addf %177, %180 : vector<8x32xf32>
    %182 = arith.addf %181, %152 : vector<8x32xf32>
    %c0_76 = arith.constant 0 : index
    %c0_77 = arith.constant 0 : index
    %c0_78 = arith.constant 0 : index
    %183 = vector.load %arg15[%c0_76, %c0_77, %c0_78] : memref<2x1x32xf32, #tpu.memory_space<vmem>>, vector<1x1x32xf32>
    %184 = vector.shape_cast %183 : vector<1x1x32xf32> to vector<1x32xf32>
    %c0_79 = arith.constant 0 : index
    %c0_80 = arith.constant 0 : index
    %c0_81 = arith.constant 0 : index
    %185 = vector.load %arg16[%c0_79, %c0_80, %c0_81] : memref<2x1x32xf32, #tpu.memory_space<vmem>>, vector<1x1x32xf32>
    %186 = vector.shape_cast %185 : vector<1x1x32xf32> to vector<1x32xf32>
    %cst_82 = arith.constant dense<0.000000e+00> : vector<8xf32>
    %187 = vector.multi_reduction <add>, %182, %cst_82 [1] : vector<8x32xf32> to vector<8xf32>
    %188 = vector.shape_cast %187 : vector<8xf32> to vector<8x1xf32>
    %cst_83 = arith.constant 3.200000e+01 : f32
    %189 = vector.broadcast %cst_83 : f32 to vector<8x1xf32>
    %190 = arith.divf %188, %189 : vector<8x1xf32>
    %191 = vector.broadcast %190 : vector<8x1xf32> to vector<8x32xf32>
    %192 = arith.subf %182, %191 : vector<8x32xf32>
    %193 = arith.mulf %192, %192 : vector<8x32xf32>
    %cst_84 = arith.constant dense<0.000000e+00> : vector<8xf32>
    %194 = vector.multi_reduction <add>, %193, %cst_84 [1] : vector<8x32xf32> to vector<8xf32>
    %195 = vector.shape_cast %194 : vector<8xf32> to vector<8x1xf32>
    %cst_85 = arith.constant 3.200000e+01 : f32
    %196 = vector.broadcast %cst_85 : f32 to vector<8x1xf32>
    %197 = arith.divf %195, %196 : vector<8x1xf32>
    %cst_86 = arith.constant 9.99999996E-13 : f32
    %198 = vector.broadcast %cst_86 : f32 to vector<8x1xf32>
    %199 = arith.addf %197, %198 : vector<8x1xf32>
    %200 = math.rsqrt %199 : vector<8x1xf32>
    %201 = vector.broadcast %200 : vector<8x1xf32> to vector<8x32xf32>
    %202 = arith.mulf %192, %201 : vector<8x32xf32>
    %203 = vector.broadcast %184 : vector<1x32xf32> to vector<8x32xf32>
    %204 = arith.mulf %202, %203 : vector<8x32xf32>
    %205 = vector.broadcast %186 : vector<1x32xf32> to vector<8x32xf32>
    %206 = arith.addf %204, %205 : vector<8x32xf32>
    %c1 = arith.constant 1 : index
    %c0_87 = arith.constant 0 : index
    %c0_88 = arith.constant 0 : index
    %207 = vector.load %arg5[%c1, %c0_87, %c0_88] : memref<2x32x96xbf16, #tpu.memory_space<vmem>>, vector<1x32x96xbf16>
    %208 = vector.shape_cast %207 : vector<1x32x96xbf16> to vector<32x96xbf16>
    %209 = arith.truncf %206 : vector<8x32xf32> to vector<8x32xbf16>
    %cst_89 = arith.constant dense<0.000000e+00> : vector<8x96xf32>
    %210 = tpu.matmul %209, %208, %cst_89 {dimension_numbers = #tpu.dot_dimension_numbers<[1], [0], [0], [1], [0, 0, 1, 1], [], []>} : vector<8x32xbf16>, vector<32x96xbf16>, vector<8x96xf32> -> vector<8x96xf32>
    %c1_90 = arith.constant 1 : index
    %c0_91 = arith.constant 0 : index
    %c0_92 = arith.constant 0 : index
    %211 = vector.load %arg6[%c1_90, %c0_91, %c0_92] : memref<2x1x96xf32, #tpu.memory_space<vmem>>, vector<1x1x96xf32>
    %212 = vector.shape_cast %211 : vector<1x1x96xf32> to vector<1x96xf32>
    %213 = vector.broadcast %212 : vector<1x96xf32> to vector<8x96xf32>
    %214 = arith.addf %210, %213 : vector<8x96xf32>
    %215 = vector.extract_strided_slice %214 {offsets = [0, 0], sizes = [8, 32], strides = [1, 1]} : vector<8x96xf32> to vector<8x32xf32>
    %216 = vector.extract_strided_slice %214 {offsets = [0, 32], sizes = [8, 32], strides = [1, 1]} : vector<8x96xf32> to vector<8x32xf32>
    %217 = vector.extract_strided_slice %214 {offsets = [0, 64], sizes = [8, 32], strides = [1, 1]} : vector<8x96xf32> to vector<8x32xf32>
    %c1_93 = arith.constant 1 : index
    %c0_94 = arith.constant 0 : index
    %c0_95 = arith.constant 0 : index
    %218 = vector.load %arg7[%c1_93, %c0_94, %c0_95] : memref<2x32x32xbf16, #tpu.memory_space<vmem>>, vector<1x32x32xbf16>
    %219 = vector.shape_cast %218 : vector<1x32x32xbf16> to vector<32x32xbf16>
    %cst_96 = arith.constant 0.000000e+00 : f32
    %220 = vector.broadcast %cst_96 : f32 to vector<8x32xf32>
    %221 = vector.extract_strided_slice %215 {offsets = [0, 0], sizes = [8, 8], strides = [1, 1]} : vector<8x32xf32> to vector<8x8xf32>
    %222 = vector.extract_strided_slice %216 {offsets = [0, 0], sizes = [8, 8], strides = [1, 1]} : vector<8x32xf32> to vector<8x8xf32>
    %223 = vector.extract_strided_slice %217 {offsets = [0, 0], sizes = [8, 8], strides = [1, 1]} : vector<8x32xf32> to vector<8x8xf32>
    "tpu.trace_start"() <{level = 10 : i32, message = "qd,kd->qk"}> : () -> ()
    %cst_97 = arith.constant dense<0.000000e+00> : vector<8x8xf32>
    %224 = tpu.matmul %221, %222, %cst_97 {dimension_numbers = #tpu.dot_dimension_numbers<[1], [1], [0], [0], [0, 0, 1, 0], [], []>} : vector<8x8xf32>, vector<8x8xf32>, vector<8x8xf32> -> vector<8x8xf32>
    "tpu.trace_stop"() : () -> ()
    %225 = vector.broadcast %25 : vector<1x8xf32> to vector<8x8xf32>
    %226 = arith.addf %224, %225 : vector<8x8xf32>
    %cst_98 = arith.constant dense<0xFF800000> : vector<8xf32>
    %227 = vector.multi_reduction <maximumf>, %226, %cst_98 [1] : vector<8x8xf32> to vector<8xf32>
    %228 = vector.shape_cast %227 : vector<8xf32> to vector<8x1xf32>
    %229 = vector.broadcast %228 : vector<8x1xf32> to vector<8x8xf32>
    %230 = arith.subf %226, %229 : vector<8x8xf32>
    %231 = math.exp %230 : vector<8x8xf32>
    %cst_99 = arith.constant dense<0.000000e+00> : vector<8xf32>
    %232 = vector.multi_reduction <add>, %231, %cst_99 [1] : vector<8x8xf32> to vector<8xf32>
    %233 = vector.shape_cast %232 : vector<8xf32> to vector<8x1xf32>
    %234 = tpu.reciprocal %233 {approx = true} : vector<8x1xf32> -> vector<8x1xf32>
    %235 = vector.broadcast %234 : vector<8x1xf32> to vector<8x8xf32>
    %236 = arith.mulf %231, %235 : vector<8x8xf32>
    %cst_100 = arith.constant dense<0.000000e+00> : vector<8x8xf32>
    %237 = tpu.matmul %236, %223, %cst_100 {dimension_numbers = #tpu.dot_dimension_numbers<[1], [0], [0], [1], [0, 0, 1, 1], [], []>} : vector<8x8xf32>, vector<8x8xf32>, vector<8x8xf32> -> vector<8x8xf32>
    %238 = vector.extract_strided_slice %219 {offsets = [0, 0], sizes = [8, 32], strides = [1, 1]} : vector<32x32xbf16> to vector<8x32xbf16>
    %239 = arith.truncf %237 : vector<8x8xf32> to vector<8x8xbf16>
    %cst_101 = arith.constant dense<0.000000e+00> : vector<8x32xf32>
    %240 = tpu.matmul %239, %238, %cst_101 {dimension_numbers = #tpu.dot_dimension_numbers<[1], [0], [0], [1], [0, 0, 1, 1], [], []>} : vector<8x8xbf16>, vector<8x32xbf16>, vector<8x32xf32> -> vector<8x32xf32>
    %241 = arith.addf %220, %240 : vector<8x32xf32>
    %242 = vector.extract_strided_slice %215 {offsets = [0, 8], sizes = [8, 8], strides = [1, 1]} : vector<8x32xf32> to vector<8x8xf32>
    %243 = vector.extract_strided_slice %216 {offsets = [0, 8], sizes = [8, 8], strides = [1, 1]} : vector<8x32xf32> to vector<8x8xf32>
    %244 = vector.extract_strided_slice %217 {offsets = [0, 8], sizes = [8, 8], strides = [1, 1]} : vector<8x32xf32> to vector<8x8xf32>
    "tpu.trace_start"() <{level = 10 : i32, message = "qd,kd->qk"}> : () -> ()
    %cst_102 = arith.constant dense<0.000000e+00> : vector<8x8xf32>
    %245 = tpu.matmul %242, %243, %cst_102 {dimension_numbers = #tpu.dot_dimension_numbers<[1], [1], [0], [0], [0, 0, 1, 0], [], []>} : vector<8x8xf32>, vector<8x8xf32>, vector<8x8xf32> -> vector<8x8xf32>
    "tpu.trace_stop"() : () -> ()
    %246 = vector.broadcast %25 : vector<1x8xf32> to vector<8x8xf32>
    %247 = arith.addf %245, %246 : vector<8x8xf32>
    %cst_103 = arith.constant dense<0xFF800000> : vector<8xf32>
    %248 = vector.multi_reduction <maximumf>, %247, %cst_103 [1] : vector<8x8xf32> to vector<8xf32>
    %249 = vector.shape_cast %248 : vector<8xf32> to vector<8x1xf32>
    %250 = vector.broadcast %249 : vector<8x1xf32> to vector<8x8xf32>
    %251 = arith.subf %247, %250 : vector<8x8xf32>
    %252 = math.exp %251 : vector<8x8xf32>
    %cst_104 = arith.constant dense<0.000000e+00> : vector<8xf32>
    %253 = vector.multi_reduction <add>, %252, %cst_104 [1] : vector<8x8xf32> to vector<8xf32>
    %254 = vector.shape_cast %253 : vector<8xf32> to vector<8x1xf32>
    %255 = tpu.reciprocal %254 {approx = true} : vector<8x1xf32> -> vector<8x1xf32>
    %256 = vector.broadcast %255 : vector<8x1xf32> to vector<8x8xf32>
    %257 = arith.mulf %252, %256 : vector<8x8xf32>
    %cst_105 = arith.constant dense<0.000000e+00> : vector<8x8xf32>
    %258 = tpu.matmul %257, %244, %cst_105 {dimension_numbers = #tpu.dot_dimension_numbers<[1], [0], [0], [1], [0, 0, 1, 1], [], []>} : vector<8x8xf32>, vector<8x8xf32>, vector<8x8xf32> -> vector<8x8xf32>
    %259 = vector.extract_strided_slice %219 {offsets = [8, 0], sizes = [8, 32], strides = [1, 1]} : vector<32x32xbf16> to vector<8x32xbf16>
    %260 = arith.truncf %258 : vector<8x8xf32> to vector<8x8xbf16>
    %cst_106 = arith.constant dense<0.000000e+00> : vector<8x32xf32>
    %261 = tpu.matmul %260, %259, %cst_106 {dimension_numbers = #tpu.dot_dimension_numbers<[1], [0], [0], [1], [0, 0, 1, 1], [], []>} : vector<8x8xbf16>, vector<8x32xbf16>, vector<8x32xf32> -> vector<8x32xf32>
    %262 = arith.addf %241, %261 : vector<8x32xf32>
    %263 = vector.extract_strided_slice %215 {offsets = [0, 16], sizes = [8, 8], strides = [1, 1]} : vector<8x32xf32> to vector<8x8xf32>
    %264 = vector.extract_strided_slice %216 {offsets = [0, 16], sizes = [8, 8], strides = [1, 1]} : vector<8x32xf32> to vector<8x8xf32>
    %265 = vector.extract_strided_slice %217 {offsets = [0, 16], sizes = [8, 8], strides = [1, 1]} : vector<8x32xf32> to vector<8x8xf32>
    "tpu.trace_start"() <{level = 10 : i32, message = "qd,kd->qk"}> : () -> ()
    %cst_107 = arith.constant dense<0.000000e+00> : vector<8x8xf32>
    %266 = tpu.matmul %263, %264, %cst_107 {dimension_numbers = #tpu.dot_dimension_numbers<[1], [1], [0], [0], [0, 0, 1, 0], [], []>} : vector<8x8xf32>, vector<8x8xf32>, vector<8x8xf32> -> vector<8x8xf32>
    "tpu.trace_stop"() : () -> ()
    %267 = vector.broadcast %25 : vector<1x8xf32> to vector<8x8xf32>
    %268 = arith.addf %266, %267 : vector<8x8xf32>
    %cst_108 = arith.constant dense<0xFF800000> : vector<8xf32>
    %269 = vector.multi_reduction <maximumf>, %268, %cst_108 [1] : vector<8x8xf32> to vector<8xf32>
    %270 = vector.shape_cast %269 : vector<8xf32> to vector<8x1xf32>
    %271 = vector.broadcast %270 : vector<8x1xf32> to vector<8x8xf32>
    %272 = arith.subf %268, %271 : vector<8x8xf32>
    %273 = math.exp %272 : vector<8x8xf32>
    %cst_109 = arith.constant dense<0.000000e+00> : vector<8xf32>
    %274 = vector.multi_reduction <add>, %273, %cst_109 [1] : vector<8x8xf32> to vector<8xf32>
    %275 = vector.shape_cast %274 : vector<8xf32> to vector<8x1xf32>
    %276 = tpu.reciprocal %275 {approx = true} : vector<8x1xf32> -> vector<8x1xf32>
    %277 = vector.broadcast %276 : vector<8x1xf32> to vector<8x8xf32>
    %278 = arith.mulf %273, %277 : vector<8x8xf32>
    %cst_110 = arith.constant dense<0.000000e+00> : vector<8x8xf32>
    %279 = tpu.matmul %278, %265, %cst_110 {dimension_numbers = #tpu.dot_dimension_numbers<[1], [0], [0], [1], [0, 0, 1, 1], [], []>} : vector<8x8xf32>, vector<8x8xf32>, vector<8x8xf32> -> vector<8x8xf32>
    %280 = vector.extract_strided_slice %219 {offsets = [16, 0], sizes = [8, 32], strides = [1, 1]} : vector<32x32xbf16> to vector<8x32xbf16>
    %281 = arith.truncf %279 : vector<8x8xf32> to vector<8x8xbf16>
    %cst_111 = arith.constant dense<0.000000e+00> : vector<8x32xf32>
    %282 = tpu.matmul %281, %280, %cst_111 {dimension_numbers = #tpu.dot_dimension_numbers<[1], [0], [0], [1], [0, 0, 1, 1], [], []>} : vector<8x8xbf16>, vector<8x32xbf16>, vector<8x32xf32> -> vector<8x32xf32>
    %283 = arith.addf %262, %282 : vector<8x32xf32>
    %284 = vector.extract_strided_slice %215 {offsets = [0, 24], sizes = [8, 8], strides = [1, 1]} : vector<8x32xf32> to vector<8x8xf32>
    %285 = vector.extract_strided_slice %216 {offsets = [0, 24], sizes = [8, 8], strides = [1, 1]} : vector<8x32xf32> to vector<8x8xf32>
    %286 = vector.extract_strided_slice %217 {offsets = [0, 24], sizes = [8, 8], strides = [1, 1]} : vector<8x32xf32> to vector<8x8xf32>
    "tpu.trace_start"() <{level = 10 : i32, message = "qd,kd->qk"}> : () -> ()
    %cst_112 = arith.constant dense<0.000000e+00> : vector<8x8xf32>
    %287 = tpu.matmul %284, %285, %cst_112 {dimension_numbers = #tpu.dot_dimension_numbers<[1], [1], [0], [0], [0, 0, 1, 0], [], []>} : vector<8x8xf32>, vector<8x8xf32>, vector<8x8xf32> -> vector<8x8xf32>
    "tpu.trace_stop"() : () -> ()
    %288 = vector.broadcast %25 : vector<1x8xf32> to vector<8x8xf32>
    %289 = arith.addf %287, %288 : vector<8x8xf32>
    %cst_113 = arith.constant dense<0xFF800000> : vector<8xf32>
    %290 = vector.multi_reduction <maximumf>, %289, %cst_113 [1] : vector<8x8xf32> to vector<8xf32>
    %291 = vector.shape_cast %290 : vector<8xf32> to vector<8x1xf32>
    %292 = vector.broadcast %291 : vector<8x1xf32> to vector<8x8xf32>
    %293 = arith.subf %289, %292 : vector<8x8xf32>
    %294 = math.exp %293 : vector<8x8xf32>
    %cst_114 = arith.constant dense<0.000000e+00> : vector<8xf32>
    %295 = vector.multi_reduction <add>, %294, %cst_114 [1] : vector<8x8xf32> to vector<8xf32>
    %296 = vector.shape_cast %295 : vector<8xf32> to vector<8x1xf32>
    %297 = tpu.reciprocal %296 {approx = true} : vector<8x1xf32> -> vector<8x1xf32>
    %298 = vector.broadcast %297 : vector<8x1xf32> to vector<8x8xf32>
    %299 = arith.mulf %294, %298 : vector<8x8xf32>
    %cst_115 = arith.constant dense<0.000000e+00> : vector<8x8xf32>
    %300 = tpu.matmul %299, %286, %cst_115 {dimension_numbers = #tpu.dot_dimension_numbers<[1], [0], [0], [1], [0, 0, 1, 1], [], []>} : vector<8x8xf32>, vector<8x8xf32>, vector<8x8xf32> -> vector<8x8xf32>
    %301 = vector.extract_strided_slice %219 {offsets = [24, 0], sizes = [8, 32], strides = [1, 1]} : vector<32x32xbf16> to vector<8x32xbf16>
    %302 = arith.truncf %300 : vector<8x8xf32> to vector<8x8xbf16>
    %cst_116 = arith.constant dense<0.000000e+00> : vector<8x32xf32>
    %303 = tpu.matmul %302, %301, %cst_116 {dimension_numbers = #tpu.dot_dimension_numbers<[1], [0], [0], [1], [0, 0, 1, 1], [], []>} : vector<8x8xbf16>, vector<8x32xbf16>, vector<8x32xf32> -> vector<8x32xf32>
    %304 = arith.addf %283, %303 : vector<8x32xf32>
    %c1_117 = arith.constant 1 : index
    %c0_118 = arith.constant 0 : index
    %c0_119 = arith.constant 0 : index
    %305 = vector.load %arg8[%c1_117, %c0_118, %c0_119] : memref<2x1x32xf32, #tpu.memory_space<vmem>>, vector<1x1x32xf32>
    %306 = vector.shape_cast %305 : vector<1x1x32xf32> to vector<1x32xf32>
    %307 = vector.broadcast %306 : vector<1x32xf32> to vector<8x32xf32>
    %308 = arith.addf %304, %307 : vector<8x32xf32>
    %309 = arith.addf %308, %206 : vector<8x32xf32>
    %c1_120 = arith.constant 1 : index
    %c0_121 = arith.constant 0 : index
    %c0_122 = arith.constant 0 : index
    %310 = vector.load %arg9[%c1_120, %c0_121, %c0_122] : memref<2x1x32xf32, #tpu.memory_space<vmem>>, vector<1x1x32xf32>
    %311 = vector.shape_cast %310 : vector<1x1x32xf32> to vector<1x32xf32>
    %c1_123 = arith.constant 1 : index
    %c0_124 = arith.constant 0 : index
    %c0_125 = arith.constant 0 : index
    %312 = vector.load %arg10[%c1_123, %c0_124, %c0_125] : memref<2x1x32xf32, #tpu.memory_space<vmem>>, vector<1x1x32xf32>
    %313 = vector.shape_cast %312 : vector<1x1x32xf32> to vector<1x32xf32>
    %cst_126 = arith.constant dense<0.000000e+00> : vector<8xf32>
    %314 = vector.multi_reduction <add>, %309, %cst_126 [1] : vector<8x32xf32> to vector<8xf32>
    %315 = vector.shape_cast %314 : vector<8xf32> to vector<8x1xf32>
    %cst_127 = arith.constant 3.200000e+01 : f32
    %316 = vector.broadcast %cst_127 : f32 to vector<8x1xf32>
    %317 = arith.divf %315, %316 : vector<8x1xf32>
    %318 = vector.broadcast %317 : vector<8x1xf32> to vector<8x32xf32>
    %319 = arith.subf %309, %318 : vector<8x32xf32>
    %320 = arith.mulf %319, %319 : vector<8x32xf32>
    %cst_128 = arith.constant dense<0.000000e+00> : vector<8xf32>
    %321 = vector.multi_reduction <add>, %320, %cst_128 [1] : vector<8x32xf32> to vector<8xf32>
    %322 = vector.shape_cast %321 : vector<8xf32> to vector<8x1xf32>
    %cst_129 = arith.constant 3.200000e+01 : f32
    %323 = vector.broadcast %cst_129 : f32 to vector<8x1xf32>
    %324 = arith.divf %322, %323 : vector<8x1xf32>
    %cst_130 = arith.constant 9.99999996E-13 : f32
    %325 = vector.broadcast %cst_130 : f32 to vector<8x1xf32>
    %326 = arith.addf %324, %325 : vector<8x1xf32>
    %327 = math.rsqrt %326 : vector<8x1xf32>
    %328 = vector.broadcast %327 : vector<8x1xf32> to vector<8x32xf32>
    %329 = arith.mulf %319, %328 : vector<8x32xf32>
    %330 = vector.broadcast %311 : vector<1x32xf32> to vector<8x32xf32>
    %331 = arith.mulf %329, %330 : vector<8x32xf32>
    %332 = vector.broadcast %313 : vector<1x32xf32> to vector<8x32xf32>
    %333 = arith.addf %331, %332 : vector<8x32xf32>
    %c1_131 = arith.constant 1 : index
    %c0_132 = arith.constant 0 : index
    %c0_133 = arith.constant 0 : index
    %334 = vector.load %arg11[%c1_131, %c0_132, %c0_133] : memref<2x32x64xbf16, #tpu.memory_space<vmem>>, vector<1x32x64xbf16>
    %335 = vector.shape_cast %334 : vector<1x32x64xbf16> to vector<32x64xbf16>
    %336 = arith.truncf %333 : vector<8x32xf32> to vector<8x32xbf16>
    %cst_134 = arith.constant dense<0.000000e+00> : vector<8x64xf32>
    %337 = tpu.matmul %336, %335, %cst_134 {dimension_numbers = #tpu.dot_dimension_numbers<[1], [0], [0], [1], [0, 0, 1, 1], [], []>} : vector<8x32xbf16>, vector<32x64xbf16>, vector<8x64xf32> -> vector<8x64xf32>
    %c1_135 = arith.constant 1 : index
    %c0_136 = arith.constant 0 : index
    %c0_137 = arith.constant 0 : index
    %338 = vector.load %arg12[%c1_135, %c0_136, %c0_137] : memref<2x1x64xf32, #tpu.memory_space<vmem>>, vector<1x1x64xf32>
    %339 = vector.shape_cast %338 : vector<1x1x64xf32> to vector<1x64xf32>
    %340 = vector.broadcast %339 : vector<1x64xf32> to vector<8x64xf32>
    %341 = arith.addf %337, %340 : vector<8x64xf32>
    %342 = arith.mulf %341, %341 : vector<8x64xf32>
    %343 = arith.mulf %341, %342 : vector<8x64xf32>
    %cst_138 = arith.constant 4.471500e-02 : f32
    %344 = vector.broadcast %cst_138 : f32 to vector<8x64xf32>
    %345 = arith.mulf %344, %343 : vector<8x64xf32>
    %346 = arith.addf %341, %345 : vector<8x64xf32>
    %cst_139 = arith.constant 0.797884583 : f32
    %347 = vector.broadcast %cst_139 : f32 to vector<8x64xf32>
    %348 = arith.mulf %347, %346 : vector<8x64xf32>
    %349 = math.tanh %348 : vector<8x64xf32>
    %cst_140 = arith.constant 1.000000e+00 : f32
    %350 = vector.broadcast %cst_140 : f32 to vector<8x64xf32>
    %351 = arith.addf %350, %349 : vector<8x64xf32>
    %cst_141 = arith.constant 5.000000e-01 : f32
    %352 = vector.broadcast %cst_141 : f32 to vector<8x64xf32>
    %353 = arith.mulf %352, %351 : vector<8x64xf32>
    %354 = arith.mulf %341, %353 : vector<8x64xf32>
    %c1_142 = arith.constant 1 : index
    %c0_143 = arith.constant 0 : index
    %c0_144 = arith.constant 0 : index
    %355 = vector.load %arg13[%c1_142, %c0_143, %c0_144] : memref<2x64x32xbf16, #tpu.memory_space<vmem>>, vector<1x64x32xbf16>
    %356 = vector.shape_cast %355 : vector<1x64x32xbf16> to vector<64x32xbf16>
    %357 = arith.truncf %354 : vector<8x64xf32> to vector<8x64xbf16>
    %cst_145 = arith.constant dense<0.000000e+00> : vector<8x32xf32>
    %358 = tpu.matmul %357, %356, %cst_145 {dimension_numbers = #tpu.dot_dimension_numbers<[1], [0], [0], [1], [0, 0, 1, 1], [], []>} : vector<8x64xbf16>, vector<64x32xbf16>, vector<8x32xf32> -> vector<8x32xf32>
    %c1_146 = arith.constant 1 : index
    %c0_147 = arith.constant 0 : index
    %c0_148 = arith.constant 0 : index
    %359 = vector.load %arg14[%c1_146, %c0_147, %c0_148] : memref<2x1x32xf32, #tpu.memory_space<vmem>>, vector<1x1x32xf32>
    %360 = vector.shape_cast %359 : vector<1x1x32xf32> to vector<1x32xf32>
    %361 = vector.broadcast %360 : vector<1x32xf32> to vector<8x32xf32>
    %362 = arith.addf %358, %361 : vector<8x32xf32>
    %363 = arith.addf %362, %333 : vector<8x32xf32>
    %c1_149 = arith.constant 1 : index
    %c0_150 = arith.constant 0 : index
    %c0_151 = arith.constant 0 : index
    %364 = vector.load %arg15[%c1_149, %c0_150, %c0_151] : memref<2x1x32xf32, #tpu.memory_space<vmem>>, vector<1x1x32xf32>
    %365 = vector.shape_cast %364 : vector<1x1x32xf32> to vector<1x32xf32>
    %c1_152 = arith.constant 1 : index
    %c0_153 = arith.constant 0 : index
    %c0_154 = arith.constant 0 : index
    %366 = vector.load %arg16[%c1_152, %c0_153, %c0_154] : memref<2x1x32xf32, #tpu.memory_space<vmem>>, vector<1x1x32xf32>
    %367 = vector.shape_cast %366 : vector<1x1x32xf32> to vector<1x32xf32>
    %cst_155 = arith.constant dense<0.000000e+00> : vector<8xf32>
    %368 = vector.multi_reduction <add>, %363, %cst_155 [1] : vector<8x32xf32> to vector<8xf32>
    %369 = vector.shape_cast %368 : vector<8xf32> to vector<8x1xf32>
    %cst_156 = arith.constant 3.200000e+01 : f32
    %370 = vector.broadcast %cst_156 : f32 to vector<8x1xf32>
    %371 = arith.divf %369, %370 : vector<8x1xf32>
    %372 = vector.broadcast %371 : vector<8x1xf32> to vector<8x32xf32>
    %373 = arith.subf %363, %372 : vector<8x32xf32>
    %374 = arith.mulf %373, %373 : vector<8x32xf32>
    %cst_157 = arith.constant dense<0.000000e+00> : vector<8xf32>
    %375 = vector.multi_reduction <add>, %374, %cst_157 [1] : vector<8x32xf32> to vector<8xf32>
    %376 = vector.shape_cast %375 : vector<8xf32> to vector<8x1xf32>
    %cst_158 = arith.constant 3.200000e+01 : f32
    %377 = vector.broadcast %cst_158 : f32 to vector<8x1xf32>
    %378 = arith.divf %376, %377 : vector<8x1xf32>
    %cst_159 = arith.constant 9.99999996E-13 : f32
    %379 = vector.broadcast %cst_159 : f32 to vector<8x1xf32>
    %380 = arith.addf %378, %379 : vector<8x1xf32>
    %381 = math.rsqrt %380 : vector<8x1xf32>
    %382 = vector.broadcast %381 : vector<8x1xf32> to vector<8x32xf32>
    %383 = arith.mulf %373, %382 : vector<8x32xf32>
    %384 = vector.broadcast %365 : vector<1x32xf32> to vector<8x32xf32>
    %385 = arith.mulf %383, %384 : vector<8x32xf32>
    %386 = vector.broadcast %367 : vector<1x32xf32> to vector<8x32xf32>
    %387 = arith.addf %385, %386 : vector<8x32xf32>
    %c0_160 = arith.constant 0 : index
    %c0_161 = arith.constant 0 : index
    %388 = vector.load %arg17[%c0_160, %c0_161] : memref<32x128xbf16, #tpu.memory_space<vmem>>, vector<32x128xbf16>
    %389 = arith.truncf %387 : vector<8x32xf32> to vector<8x32xbf16>
    %cst_162 = arith.constant dense<0.000000e+00> : vector<8x128xf32>
    %390 = tpu.matmul %389, %388, %cst_162 {dimension_numbers = #tpu.dot_dimension_numbers<[1], [0], [0], [1], [0, 0, 1, 1], [], []>} : vector<8x32xbf16>, vector<32x128xbf16>, vector<8x128xf32> -> vector<8x128xf32>
    %391 = vector.extract_strided_slice %390 {offsets = [0, 0], sizes = [8, 64], strides = [1, 1]} : vector<8x128xf32> to vector<8x64xf32>
    %392 = vector.extract_strided_slice %390 {offsets = [0, 64], sizes = [8, 64], strides = [1, 1]} : vector<8x128xf32> to vector<8x64xf32>
    %c0_163 = arith.constant 0 : index
    %c0_164 = arith.constant 0 : index
    %393 = vector.load %arg18[%c0_163, %c0_164] : memref<4x64xf32, #tpu.memory_space<vmem>>, vector<4x64xf32>
    %394 = vector.extract_strided_slice %393 {offsets = [3, 0], sizes = [1, 64], strides = [1, 1]} : vector<4x64xf32> to vector<1x64xf32>
    %395 = vector.broadcast %394 : vector<1x64xf32> to vector<8x64xf32>
    %396 = arith.mulf %391, %395 : vector<8x64xf32>
    %cst_165 = arith.constant 0.000000e+00 : f32
    %397 = vector.broadcast %cst_165 : f32 to vector<3x64xf32>
    %398 = vector.extract_strided_slice %391 {offsets = [0, 0], sizes = [5, 64], strides = [1, 1]} : vector<8x64xf32> to vector<5x64xf32>
    %399 = tpu.concatenate %397, %398 in 0 : vector<3x64xf32>, vector<5x64xf32> -> vector<8x64xf32>
    %400 = vector.extract_strided_slice %393 {offsets = [0, 0], sizes = [1, 64], strides = [1, 1]} : vector<4x64xf32> to vector<1x64xf32>
    %401 = vector.broadcast %400 : vector<1x64xf32> to vector<8x64xf32>
    %402 = arith.mulf %399, %401 : vector<8x64xf32>
    %403 = arith.addf %396, %402 : vector<8x64xf32>
    %cst_166 = arith.constant 0.000000e+00 : f32
    %404 = vector.broadcast %cst_166 : f32 to vector<2x64xf32>
    %405 = vector.extract_strided_slice %391 {offsets = [0, 0], sizes = [6, 64], strides = [1, 1]} : vector<8x64xf32> to vector<6x64xf32>
    %406 = tpu.concatenate %404, %405 in 0 : vector<2x64xf32>, vector<6x64xf32> -> vector<8x64xf32>
    %407 = vector.extract_strided_slice %393 {offsets = [1, 0], sizes = [1, 64], strides = [1, 1]} : vector<4x64xf32> to vector<1x64xf32>
    %408 = vector.broadcast %407 : vector<1x64xf32> to vector<8x64xf32>
    %409 = arith.mulf %406, %408 : vector<8x64xf32>
    %410 = arith.addf %403, %409 : vector<8x64xf32>
    %cst_167 = arith.constant 0.000000e+00 : f32
    %411 = vector.broadcast %cst_167 : f32 to vector<1x64xf32>
    %412 = vector.extract_strided_slice %391 {offsets = [0, 0], sizes = [7, 64], strides = [1, 1]} : vector<8x64xf32> to vector<7x64xf32>
    %413 = tpu.concatenate %411, %412 in 0 : vector<1x64xf32>, vector<7x64xf32> -> vector<8x64xf32>
    %414 = vector.extract_strided_slice %393 {offsets = [2, 0], sizes = [1, 64], strides = [1, 1]} : vector<4x64xf32> to vector<1x64xf32>
    %415 = vector.broadcast %414 : vector<1x64xf32> to vector<8x64xf32>
    %416 = arith.mulf %413, %415 : vector<8x64xf32>
    %417 = arith.addf %410, %416 : vector<8x64xf32>
    %c0_168 = arith.constant 0 : index
    %c0_169 = arith.constant 0 : index
    %418 = vector.load %arg19[%c0_168, %c0_169] : memref<1x64xf32, #tpu.memory_space<vmem>>, vector<1x64xf32>
    %419 = vector.broadcast %418 : vector<1x64xf32> to vector<8x64xf32>
    %420 = arith.addf %417, %419 : vector<8x64xf32>
    %421 = arith.negf %420 : vector<8x64xf32>
    %422 = math.exp %421 : vector<8x64xf32>
    %cst_170 = arith.constant 1.000000e+00 : f32
    %423 = vector.broadcast %cst_170 : f32 to vector<8x64xf32>
    %424 = arith.addf %423, %422 : vector<8x64xf32>
    %425 = arith.divf %423, %424 : vector<8x64xf32>
    %426 = arith.mulf %420, %425 : vector<8x64xf32>
    %c0_171 = arith.constant 0 : index
    %c0_172 = arith.constant 0 : index
    %427 = vector.load %arg20[%c0_171, %c0_172] : memref<64x2xf32, #tpu.memory_space<vmem>>, vector<64x2xf32>
    %cst_173 = arith.constant dense<0.000000e+00> : vector<8x2xf32>
    %428 = tpu.matmul %426, %427, %cst_173 {dimension_numbers = #tpu.dot_dimension_numbers<[1], [0], [0], [1], [0, 0, 1, 1], [], []>} : vector<8x64xf32>, vector<64x2xf32>, vector<8x2xf32> -> vector<8x2xf32>
    %c0_174 = arith.constant 0 : index
    %c0_175 = arith.constant 0 : index
    %429 = vector.load %arg22[%c0_174, %c0_175] : memref<2x64xf32, #tpu.memory_space<vmem>>, vector<2x64xf32>
    %cst_176 = arith.constant dense<0.000000e+00> : vector<8x64xf32>
    %430 = tpu.matmul %428, %429, %cst_176 {dimension_numbers = #tpu.dot_dimension_numbers<[1], [0], [0], [1], [0, 0, 1, 1], [], []>} : vector<8x2xf32>, vector<2x64xf32>, vector<8x64xf32> -> vector<8x64xf32>
    %c0_177 = arith.constant 0 : index
    %c0_178 = arith.constant 0 : index
    %431 = vector.load %arg23[%c0_177, %c0_178] : memref<1x64xf32, #tpu.memory_space<vmem>>, vector<1x64xf32>
    %432 = vector.broadcast %431 : vector<1x64xf32> to vector<8x64xf32>
    %433 = arith.addf %430, %432 : vector<8x64xf32>
    %cst_179 = arith.constant 0.000000e+00 : f32
    %434 = vector.broadcast %cst_179 : f32 to vector<8x64xf32>
    %435 = arith.maximumf %433, %434 : vector<8x64xf32>
    %436 = vector.broadcast %cst_179 : f32 to vector<8x64xf32>
    %437 = arith.subf %433, %436 : vector<8x64xf32>
    %438 = arith.cmpf one, %437, %437 : vector<8x64xf32>
    %439 = vector.broadcast %cst_179 : f32 to vector<8x64xf32>
    %440 = arith.addf %433, %439 : vector<8x64xf32>
    %441 = math.absf %437 : vector<8x64xf32>
    %cst_180 = arith.constant 0.000000e+00 : f32
    %442 = vector.broadcast %cst_180 : f32 to vector<8x64xf32>
    %443 = arith.subf %442, %441 : vector<8x64xf32>
    %444 = math.exp %443 : vector<8x64xf32>
    %445 = math.log1p %444 : vector<8x64xf32>
    %446 = arith.addf %435, %445 : vector<8x64xf32>
    %447 = arith.select %438, %440, %446 : vector<8x64xi1>, vector<8x64xf32>
    %c0_181 = arith.constant 0 : index
    %c0_182 = arith.constant 0 : index
    %448 = vector.load %arg21[%c0_181, %c0_182] : memref<32x64xf32, #tpu.memory_space<vmem>>, vector<32x64xf32>
    "tpu.trace_start"() <{level = 10 : i32, message = "si,li->sl"}> : () -> ()
    %cst_183 = arith.constant dense<0.000000e+00> : vector<32x8xf32>
    %449 = tpu.matmul %448, %426, %cst_183 {dimension_numbers = #tpu.dot_dimension_numbers<[1], [1], [0], [0], [0, 0, 1, 0], [], []>} : vector<32x64xf32>, vector<8x64xf32>, vector<32x8xf32> -> vector<32x8xf32>
    "tpu.trace_stop"() : () -> ()
    %450 = vector.extract_strided_slice %449 {offsets = [0, 0], sizes = [16, 8], strides = [1, 1]} : vector<32x8xf32> to vector<16x8xf32>
    %451 = vector.extract_strided_slice %449 {offsets = [16, 0], sizes = [16, 8], strides = [1, 1]} : vector<32x8xf32> to vector<16x8xf32>
    %c0_184 = arith.constant 0 : index
    %c0_185 = arith.constant 0 : index
    %452 = vector.load %arg24[%c0_184, %c0_185] : memref<16x64xf32, #tpu.memory_space<vmem>>, vector<16x64xf32>
    %453 = arith.mulf %447, %426 : vector<8x64xf32>
    %454 = arith.negf %392 : vector<8x64xf32>
    %455 = math.exp %454 : vector<8x64xf32>
    %cst_186 = arith.constant 1.000000e+00 : f32
    %456 = vector.broadcast %cst_186 : f32 to vector<8x64xf32>
    %457 = arith.addf %456, %455 : vector<8x64xf32>
    %458 = arith.divf %456, %457 : vector<8x64xf32>
    %459 = arith.mulf %392, %458 : vector<8x64xf32>
    %c0_187 = arith.constant 0 : index
    %c0_188 = arith.constant 0 : index
    %460 = vector.load %arg25[%c0_187, %c0_188] : memref<1x64xf32, #tpu.memory_space<vmem>>, vector<1x64xf32>
    %461 = vector.broadcast %460 : vector<1x64xf32> to vector<8x64xf32>
    %462 = arith.mulf %461, %426 : vector<8x64xf32>
    %463 = arith.mulf %462, %459 : vector<8x64xf32>
    %cst_189 = arith.constant dense<0.000000e+00> : vector<64xf32>
    %464 = vector.multi_reduction <add>, %463, %cst_189 [0] : vector<8x64xf32> to vector<64xf32>
    %465 = vector.shape_cast %464 : vector<64xf32> to vector<1x64xf32>
    %cst_190 = arith.constant 0.000000e+00 : f32
    %466 = vector.broadcast %cst_190 : f32 to vector<16x64xf32>
    %467 = vector.extract_strided_slice %447 {offsets = [0, 0], sizes = [1, 64], strides = [1, 1]} : vector<8x64xf32> to vector<1x64xf32>
    %468 = vector.broadcast %467 : vector<1x64xf32> to vector<16x64xf32>
    %469 = arith.mulf %468, %452 : vector<16x64xf32>
    %470 = math.exp %469 : vector<16x64xf32>
    %471 = arith.mulf %470, %466 : vector<16x64xf32>
    %472 = vector.extract_strided_slice %450 {offsets = [0, 0], sizes = [16, 1], strides = [1, 1]} : vector<16x8xf32> to vector<16x1xf32>
    %473 = vector.extract_strided_slice %453 {offsets = [0, 0], sizes = [1, 64], strides = [1, 1]} : vector<8x64xf32> to vector<1x64xf32>
    %474 = vector.broadcast %472 : vector<16x1xf32> to vector<16x64xf32>
    %475 = vector.broadcast %473 : vector<1x64xf32> to vector<16x64xf32>
    %476 = arith.mulf %474, %475 : vector<16x64xf32>
    %477 = arith.addf %471, %476 : vector<16x64xf32>
    %478 = vector.extract_strided_slice %451 {offsets = [0, 0], sizes = [16, 1], strides = [1, 1]} : vector<16x8xf32> to vector<16x1xf32>
    %479 = vector.broadcast %478 : vector<16x1xf32> to vector<16x64xf32>
    %480 = arith.mulf %479, %477 : vector<16x64xf32>
    %cst_191 = arith.constant dense<0.000000e+00> : vector<64xf32>
    %481 = vector.multi_reduction <add>, %480, %cst_191 [0] : vector<16x64xf32> to vector<64xf32>
    %482 = vector.shape_cast %481 : vector<64xf32> to vector<1x64xf32>
    %483 = vector.extract_strided_slice %459 {offsets = [0, 0], sizes = [1, 64], strides = [1, 1]} : vector<8x64xf32> to vector<1x64xf32>
    %484 = arith.mulf %482, %483 : vector<1x64xf32>
    %485 = arith.addf %465, %484 : vector<1x64xf32>
    %486 = vector.extract_strided_slice %447 {offsets = [1, 0], sizes = [1, 64], strides = [1, 1]} : vector<8x64xf32> to vector<1x64xf32>
    %487 = vector.broadcast %486 : vector<1x64xf32> to vector<16x64xf32>
    %488 = arith.mulf %487, %452 : vector<16x64xf32>
    %489 = math.exp %488 : vector<16x64xf32>
    %490 = arith.mulf %489, %477 : vector<16x64xf32>
    %491 = vector.extract_strided_slice %450 {offsets = [0, 1], sizes = [16, 1], strides = [1, 1]} : vector<16x8xf32> to vector<16x1xf32>
    %492 = vector.extract_strided_slice %453 {offsets = [1, 0], sizes = [1, 64], strides = [1, 1]} : vector<8x64xf32> to vector<1x64xf32>
    %493 = vector.broadcast %491 : vector<16x1xf32> to vector<16x64xf32>
    %494 = vector.broadcast %492 : vector<1x64xf32> to vector<16x64xf32>
    %495 = arith.mulf %493, %494 : vector<16x64xf32>
    %496 = arith.addf %490, %495 : vector<16x64xf32>
    %497 = vector.extract_strided_slice %451 {offsets = [0, 1], sizes = [16, 1], strides = [1, 1]} : vector<16x8xf32> to vector<16x1xf32>
    %498 = vector.broadcast %497 : vector<16x1xf32> to vector<16x64xf32>
    %499 = arith.mulf %498, %496 : vector<16x64xf32>
    %cst_192 = arith.constant dense<0.000000e+00> : vector<64xf32>
    %500 = vector.multi_reduction <add>, %499, %cst_192 [0] : vector<16x64xf32> to vector<64xf32>
    %501 = vector.shape_cast %500 : vector<64xf32> to vector<1x64xf32>
    %502 = vector.extract_strided_slice %459 {offsets = [1, 0], sizes = [1, 64], strides = [1, 1]} : vector<8x64xf32> to vector<1x64xf32>
    %503 = arith.mulf %501, %502 : vector<1x64xf32>
    %504 = arith.addf %485, %503 : vector<1x64xf32>
    %505 = vector.extract_strided_slice %447 {offsets = [2, 0], sizes = [1, 64], strides = [1, 1]} : vector<8x64xf32> to vector<1x64xf32>
    %506 = vector.broadcast %505 : vector<1x64xf32> to vector<16x64xf32>
    %507 = arith.mulf %506, %452 : vector<16x64xf32>
    %508 = math.exp %507 : vector<16x64xf32>
    %509 = arith.mulf %508, %496 : vector<16x64xf32>
    %510 = vector.extract_strided_slice %450 {offsets = [0, 2], sizes = [16, 1], strides = [1, 1]} : vector<16x8xf32> to vector<16x1xf32>
    %511 = vector.extract_strided_slice %453 {offsets = [2, 0], sizes = [1, 64], strides = [1, 1]} : vector<8x64xf32> to vector<1x64xf32>
    %512 = vector.broadcast %510 : vector<16x1xf32> to vector<16x64xf32>
    %513 = vector.broadcast %511 : vector<1x64xf32> to vector<16x64xf32>
    %514 = arith.mulf %512, %513 : vector<16x64xf32>
    %515 = arith.addf %509, %514 : vector<16x64xf32>
    %516 = vector.extract_strided_slice %451 {offsets = [0, 2], sizes = [16, 1], strides = [1, 1]} : vector<16x8xf32> to vector<16x1xf32>
    %517 = vector.broadcast %516 : vector<16x1xf32> to vector<16x64xf32>
    %518 = arith.mulf %517, %515 : vector<16x64xf32>
    %cst_193 = arith.constant dense<0.000000e+00> : vector<64xf32>
    %519 = vector.multi_reduction <add>, %518, %cst_193 [0] : vector<16x64xf32> to vector<64xf32>
    %520 = vector.shape_cast %519 : vector<64xf32> to vector<1x64xf32>
    %521 = vector.extract_strided_slice %459 {offsets = [2, 0], sizes = [1, 64], strides = [1, 1]} : vector<8x64xf32> to vector<1x64xf32>
    %522 = arith.mulf %520, %521 : vector<1x64xf32>
    %523 = arith.addf %504, %522 : vector<1x64xf32>
    %524 = vector.extract_strided_slice %447 {offsets = [3, 0], sizes = [1, 64], strides = [1, 1]} : vector<8x64xf32> to vector<1x64xf32>
    %525 = vector.broadcast %524 : vector<1x64xf32> to vector<16x64xf32>
    %526 = arith.mulf %525, %452 : vector<16x64xf32>
    %527 = math.exp %526 : vector<16x64xf32>
    %528 = arith.mulf %527, %515 : vector<16x64xf32>
    %529 = vector.extract_strided_slice %450 {offsets = [0, 3], sizes = [16, 1], strides = [1, 1]} : vector<16x8xf32> to vector<16x1xf32>
    %530 = vector.extract_strided_slice %453 {offsets = [3, 0], sizes = [1, 64], strides = [1, 1]} : vector<8x64xf32> to vector<1x64xf32>
    %531 = vector.broadcast %529 : vector<16x1xf32> to vector<16x64xf32>
    %532 = vector.broadcast %530 : vector<1x64xf32> to vector<16x64xf32>
    %533 = arith.mulf %531, %532 : vector<16x64xf32>
    %534 = arith.addf %528, %533 : vector<16x64xf32>
    %535 = vector.extract_strided_slice %451 {offsets = [0, 3], sizes = [16, 1], strides = [1, 1]} : vector<16x8xf32> to vector<16x1xf32>
    %536 = vector.broadcast %535 : vector<16x1xf32> to vector<16x64xf32>
    %537 = arith.mulf %536, %534 : vector<16x64xf32>
    %cst_194 = arith.constant dense<0.000000e+00> : vector<64xf32>
    %538 = vector.multi_reduction <add>, %537, %cst_194 [0] : vector<16x64xf32> to vector<64xf32>
    %539 = vector.shape_cast %538 : vector<64xf32> to vector<1x64xf32>
    %540 = vector.extract_strided_slice %459 {offsets = [3, 0], sizes = [1, 64], strides = [1, 1]} : vector<8x64xf32> to vector<1x64xf32>
    %541 = arith.mulf %539, %540 : vector<1x64xf32>
    %542 = arith.addf %523, %541 : vector<1x64xf32>
    %543 = vector.extract_strided_slice %447 {offsets = [4, 0], sizes = [1, 64], strides = [1, 1]} : vector<8x64xf32> to vector<1x64xf32>
    %544 = vector.broadcast %543 : vector<1x64xf32> to vector<16x64xf32>
    %545 = arith.mulf %544, %452 : vector<16x64xf32>
    %546 = math.exp %545 : vector<16x64xf32>
    %547 = arith.mulf %546, %534 : vector<16x64xf32>
    %548 = vector.extract_strided_slice %450 {offsets = [0, 4], sizes = [16, 1], strides = [1, 1]} : vector<16x8xf32> to vector<16x1xf32>
    %549 = vector.extract_strided_slice %453 {offsets = [4, 0], sizes = [1, 64], strides = [1, 1]} : vector<8x64xf32> to vector<1x64xf32>
    %550 = vector.broadcast %548 : vector<16x1xf32> to vector<16x64xf32>
    %551 = vector.broadcast %549 : vector<1x64xf32> to vector<16x64xf32>
    %552 = arith.mulf %550, %551 : vector<16x64xf32>
    %553 = arith.addf %547, %552 : vector<16x64xf32>
    %554 = vector.extract_strided_slice %451 {offsets = [0, 4], sizes = [16, 1], strides = [1, 1]} : vector<16x8xf32> to vector<16x1xf32>
    %555 = vector.broadcast %554 : vector<16x1xf32> to vector<16x64xf32>
    %556 = arith.mulf %555, %553 : vector<16x64xf32>
    %cst_195 = arith.constant dense<0.000000e+00> : vector<64xf32>
    %557 = vector.multi_reduction <add>, %556, %cst_195 [0] : vector<16x64xf32> to vector<64xf32>
    %558 = vector.shape_cast %557 : vector<64xf32> to vector<1x64xf32>
    %559 = vector.extract_strided_slice %459 {offsets = [4, 0], sizes = [1, 64], strides = [1, 1]} : vector<8x64xf32> to vector<1x64xf32>
    %560 = arith.mulf %558, %559 : vector<1x64xf32>
    %561 = arith.addf %542, %560 : vector<1x64xf32>
    %562 = vector.extract_strided_slice %447 {offsets = [5, 0], sizes = [1, 64], strides = [1, 1]} : vector<8x64xf32> to vector<1x64xf32>
    %563 = vector.broadcast %562 : vector<1x64xf32> to vector<16x64xf32>
    %564 = arith.mulf %563, %452 : vector<16x64xf32>
    %565 = math.exp %564 : vector<16x64xf32>
    %566 = arith.mulf %565, %553 : vector<16x64xf32>
    %567 = vector.extract_strided_slice %450 {offsets = [0, 5], sizes = [16, 1], strides = [1, 1]} : vector<16x8xf32> to vector<16x1xf32>
    %568 = vector.extract_strided_slice %453 {offsets = [5, 0], sizes = [1, 64], strides = [1, 1]} : vector<8x64xf32> to vector<1x64xf32>
    %569 = vector.broadcast %567 : vector<16x1xf32> to vector<16x64xf32>
    %570 = vector.broadcast %568 : vector<1x64xf32> to vector<16x64xf32>
    %571 = arith.mulf %569, %570 : vector<16x64xf32>
    %572 = arith.addf %566, %571 : vector<16x64xf32>
    %573 = vector.extract_strided_slice %451 {offsets = [0, 5], sizes = [16, 1], strides = [1, 1]} : vector<16x8xf32> to vector<16x1xf32>
    %574 = vector.broadcast %573 : vector<16x1xf32> to vector<16x64xf32>
    %575 = arith.mulf %574, %572 : vector<16x64xf32>
    %cst_196 = arith.constant dense<0.000000e+00> : vector<64xf32>
    %576 = vector.multi_reduction <add>, %575, %cst_196 [0] : vector<16x64xf32> to vector<64xf32>
    %577 = vector.shape_cast %576 : vector<64xf32> to vector<1x64xf32>
    %578 = vector.extract_strided_slice %459 {offsets = [5, 0], sizes = [1, 64], strides = [1, 1]} : vector<8x64xf32> to vector<1x64xf32>
    %579 = arith.mulf %577, %578 : vector<1x64xf32>
    %580 = arith.addf %561, %579 : vector<1x64xf32>
    %581 = vector.extract_strided_slice %447 {offsets = [6, 0], sizes = [1, 64], strides = [1, 1]} : vector<8x64xf32> to vector<1x64xf32>
    %582 = vector.broadcast %581 : vector<1x64xf32> to vector<16x64xf32>
    %583 = arith.mulf %582, %452 : vector<16x64xf32>
    %584 = math.exp %583 : vector<16x64xf32>
    %585 = arith.mulf %584, %572 : vector<16x64xf32>
    %586 = vector.extract_strided_slice %450 {offsets = [0, 6], sizes = [16, 1], strides = [1, 1]} : vector<16x8xf32> to vector<16x1xf32>
    %587 = vector.extract_strided_slice %453 {offsets = [6, 0], sizes = [1, 64], strides = [1, 1]} : vector<8x64xf32> to vector<1x64xf32>
    %588 = vector.broadcast %586 : vector<16x1xf32> to vector<16x64xf32>
    %589 = vector.broadcast %587 : vector<1x64xf32> to vector<16x64xf32>
    %590 = arith.mulf %588, %589 : vector<16x64xf32>
    %591 = arith.addf %585, %590 : vector<16x64xf32>
    %592 = vector.extract_strided_slice %451 {offsets = [0, 6], sizes = [16, 1], strides = [1, 1]} : vector<16x8xf32> to vector<16x1xf32>
    %593 = vector.broadcast %592 : vector<16x1xf32> to vector<16x64xf32>
    %594 = arith.mulf %593, %591 : vector<16x64xf32>
    %cst_197 = arith.constant dense<0.000000e+00> : vector<64xf32>
    %595 = vector.multi_reduction <add>, %594, %cst_197 [0] : vector<16x64xf32> to vector<64xf32>
    %596 = vector.shape_cast %595 : vector<64xf32> to vector<1x64xf32>
    %597 = vector.extract_strided_slice %459 {offsets = [6, 0], sizes = [1, 64], strides = [1, 1]} : vector<8x64xf32> to vector<1x64xf32>
    %598 = arith.mulf %596, %597 : vector<1x64xf32>
    %599 = arith.addf %580, %598 : vector<1x64xf32>
    %600 = vector.extract_strided_slice %447 {offsets = [7, 0], sizes = [1, 64], strides = [1, 1]} : vector<8x64xf32> to vector<1x64xf32>
    %601 = vector.broadcast %600 : vector<1x64xf32> to vector<16x64xf32>
    %602 = arith.mulf %601, %452 : vector<16x64xf32>
    %603 = math.exp %602 : vector<16x64xf32>
    %604 = arith.mulf %603, %591 : vector<16x64xf32>
    %605 = vector.extract_strided_slice %450 {offsets = [0, 7], sizes = [16, 1], strides = [1, 1]} : vector<16x8xf32> to vector<16x1xf32>
    %606 = vector.extract_strided_slice %453 {offsets = [7, 0], sizes = [1, 64], strides = [1, 1]} : vector<8x64xf32> to vector<1x64xf32>
    %607 = vector.broadcast %605 : vector<16x1xf32> to vector<16x64xf32>
    %608 = vector.broadcast %606 : vector<1x64xf32> to vector<16x64xf32>
    %609 = arith.mulf %607, %608 : vector<16x64xf32>
    %610 = arith.addf %604, %609 : vector<16x64xf32>
    %611 = vector.extract_strided_slice %451 {offsets = [0, 7], sizes = [16, 1], strides = [1, 1]} : vector<16x8xf32> to vector<16x1xf32>
    %612 = vector.broadcast %611 : vector<16x1xf32> to vector<16x64xf32>
    %613 = arith.mulf %612, %610 : vector<16x64xf32>
    %cst_198 = arith.constant dense<0.000000e+00> : vector<64xf32>
    %614 = vector.multi_reduction <add>, %613, %cst_198 [0] : vector<16x64xf32> to vector<64xf32>
    %615 = vector.shape_cast %614 : vector<64xf32> to vector<1x64xf32>
    %616 = vector.extract_strided_slice %459 {offsets = [7, 0], sizes = [1, 64], strides = [1, 1]} : vector<8x64xf32> to vector<1x64xf32>
    %617 = arith.mulf %615, %616 : vector<1x64xf32>
    %618 = arith.addf %599, %617 : vector<1x64xf32>
    %cst_199 = arith.constant 1.250000e-01 : f32
    %619 = vector.broadcast %cst_199 : f32 to vector<1x64xf32>
    %620 = arith.mulf %618, %619 : vector<1x64xf32>
    %c0_200 = arith.constant 0 : index
    %c0_201 = arith.constant 0 : index
    %621 = vector.load %arg26[%c0_200, %c0_201] : memref<64x32xbf16, #tpu.memory_space<vmem>>, vector<64x32xbf16>
    %622 = arith.truncf %620 : vector<1x64xf32> to vector<1x64xbf16>
    %cst_202 = arith.constant dense<0.000000e+00> : vector<1x32xf32>
    %623 = tpu.matmul %622, %621, %cst_202 {dimension_numbers = #tpu.dot_dimension_numbers<[1], [0], [0], [1], [0, 0, 1, 1], [], []>} : vector<1x64xbf16>, vector<64x32xbf16>, vector<1x32xf32> -> vector<1x32xf32>
    %c0_203 = arith.constant 0 : index
    %c0_204 = arith.constant 0 : index
    %624 = vector.load %arg27[%c0_203, %c0_204] : memref<32x3xf32, #tpu.memory_space<vmem>>, vector<32x3xf32>
    %cst_205 = arith.constant dense<0.000000e+00> : vector<1x3xf32>
    %625 = tpu.matmul %623, %624, %cst_205 {dimension_numbers = #tpu.dot_dimension_numbers<[1], [0], [0], [1], [0, 0, 1, 1], [], []>} : vector<1x32xf32>, vector<32x3xf32>, vector<1x3xf32> -> vector<1x3xf32>
    %c0_206 = arith.constant 0 : index
    %c0_207 = arith.constant 0 : index
    %626 = vector.load %arg28[%c0_206, %c0_207] : memref<1x3xf32, #tpu.memory_space<vmem>>, vector<1x3xf32>
    %627 = arith.addf %625, %626 : vector<1x3xf32>
    %c0_208 = arith.constant 0 : index
    %c0_209 = arith.constant 0 : index
    %c0_210 = arith.constant 0 : index
    %628 = vector.load %arg29[%c0_208, %c0_209, %c0_210] : memref<1x1x3xf32, #tpu.memory_space<vmem>>, vector<1x1x3xf32>
    %629 = vector.shape_cast %628 : vector<1x1x3xf32> to vector<1x3xf32>
    %630 = vector.shape_cast %627 : vector<1x3xf32> to vector<1x1x3xf32>
    tpu.vector_store %arg29[%c0_208, %c0_209, %c0_210], %630 {strides = array<i32>} : memref<1x1x3xf32, #tpu.memory_space<vmem>>, vector<1x1x3xf32>,
    return
  }
  func.func @transform_0(%arg0: i32) -> (i32, i32, i32) {
    %c0_i32 = arith.constant 0 : i32
    %c0_i32_0 = arith.constant 0 : i32
    %c0_i32_1 = arith.constant 0 : i32
    return %arg0, %c0_i32, %c0_i32_0 : i32, i32, i32
  }
  func.func @transform_1(%arg0: i32) -> (i32, i32, i32) {
    %c0_i32 = arith.constant 0 : i32
    %c0_i32_0 = arith.constant 0 : i32
    %c0_i32_1 = arith.constant 0 : i32
    return %arg0, %c0_i32, %c0_i32_0 : i32, i32, i32
  }
  func.func @transform_2(%arg0: i32) -> (i32, i32) {
    %c0_i32 = arith.constant 0 : i32
    %c0_i32_0 = arith.constant 0 : i32
    %c0_i32_1 = arith.constant 0 : i32
    return %c0_i32, %c0_i32_0 : i32, i32
  }
  func.func @transform_3(%arg0: i32) -> (i32, i32) {
    %c0_i32 = arith.constant 0 : i32
    %c0_i32_0 = arith.constant 0 : i32
    %c0_i32_1 = arith.constant 0 : i32
    return %c0_i32, %c0_i32_0 : i32, i32
  }
  func.func @transform_4(%arg0: i32) -> (i32, i32, i32) {
    %c0_i32 = arith.constant 0 : i32
    %c0_i32_0 = arith.constant 0 : i32
    %c0_i32_1 = arith.constant 0 : i32
    %c0_i32_2 = arith.constant 0 : i32
    return %c0_i32, %c0_i32_0, %c0_i32_1 : i32, i32, i32
  }
  func.func @transform_5(%arg0: i32) -> (i32, i32, i32) {
    %c0_i32 = arith.constant 0 : i32
    %c0_i32_0 = arith.constant 0 : i32
    %c0_i32_1 = arith.constant 0 : i32
    %c0_i32_2 = arith.constant 0 : i32
    return %c0_i32, %c0_i32_0, %c0_i32_1 : i32, i32, i32
  }
  func.func @transform_6(%arg0: i32) -> (i32, i32, i32) {
    %c0_i32 = arith.constant 0 : i32
    %c0_i32_0 = arith.constant 0 : i32
    %c0_i32_1 = arith.constant 0 : i32
    %c0_i32_2 = arith.constant 0 : i32
    return %c0_i32, %c0_i32_0, %c0_i32_1 : i32, i32, i32
  }
  func.func @transform_7(%arg0: i32) -> (i32, i32, i32) {
    %c0_i32 = arith.constant 0 : i32
    %c0_i32_0 = arith.constant 0 : i32
    %c0_i32_1 = arith.constant 0 : i32
    %c0_i32_2 = arith.constant 0 : i32
    return %c0_i32, %c0_i32_0, %c0_i32_1 : i32, i32, i32
  }
  func.func @transform_8(%arg0: i32) -> (i32, i32, i32) {
    %c0_i32 = arith.constant 0 : i32
    %c0_i32_0 = arith.constant 0 : i32
    %c0_i32_1 = arith.constant 0 : i32
    %c0_i32_2 = arith.constant 0 : i32
    return %c0_i32, %c0_i32_0, %c0_i32_1 : i32, i32, i32
  }
  func.func @transform_9(%arg0: i32) -> (i32, i32, i32) {
    %c0_i32 = arith.constant 0 : i32
    %c0_i32_0 = arith.constant 0 : i32
    %c0_i32_1 = arith.constant 0 : i32
    %c0_i32_2 = arith.constant 0 : i32
    return %c0_i32, %c0_i32_0, %c0_i32_1 : i32, i32, i32
  }
  func.func @transform_10(%arg0: i32) -> (i32, i32, i32) {
    %c0_i32 = arith.constant 0 : i32
    %c0_i32_0 = arith.constant 0 : i32
    %c0_i32_1 = arith.constant 0 : i32
    %c0_i32_2 = arith.constant 0 : i32
    return %c0_i32, %c0_i32_0, %c0_i32_1 : i32, i32, i32
  }
  func.func @transform_11(%arg0: i32) -> (i32, i32, i32) {
    %c0_i32 = arith.constant 0 : i32
    %c0_i32_0 = arith.constant 0 : i32
    %c0_i32_1 = arith.constant 0 : i32
    %c0_i32_2 = arith.constant 0 : i32
    return %c0_i32, %c0_i32_0, %c0_i32_1 : i32, i32, i32
  }
  func.func @transform_12(%arg0: i32) -> (i32, i32, i32) {
    %c0_i32 = arith.constant 0 : i32
    %c0_i32_0 = arith.constant 0 : i32
    %c0_i32_1 = arith.constant 0 : i32
    %c0_i32_2 = arith.constant 0 : i32
    return %c0_i32, %c0_i32_0, %c0_i32_1 : i32, i32, i32
  }
  func.func @transform_13(%arg0: i32) -> (i32, i32, i32) {
    %c0_i32 = arith.constant 0 : i32
    %c0_i32_0 = arith.constant 0 : i32
    %c0_i32_1 = arith.constant 0 : i32
    %c0_i32_2 = arith.constant 0 : i32
    return %c0_i32, %c0_i32_0, %c0_i32_1 : i32, i32, i32
  }
  func.func @transform_14(%arg0: i32) -> (i32, i32, i32) {
    %c0_i32 = arith.constant 0 : i32
    %c0_i32_0 = arith.constant 0 : i32
    %c0_i32_1 = arith.constant 0 : i32
    %c0_i32_2 = arith.constant 0 : i32
    return %c0_i32, %c0_i32_0, %c0_i32_1 : i32, i32, i32
  }
  func.func @transform_15(%arg0: i32) -> (i32, i32, i32) {
    %c0_i32 = arith.constant 0 : i32
    %c0_i32_0 = arith.constant 0 : i32
    %c0_i32_1 = arith.constant 0 : i32
    %c0_i32_2 = arith.constant 0 : i32
    return %c0_i32, %c0_i32_0, %c0_i32_1 : i32, i32, i32
  }
  func.func @transform_16(%arg0: i32) -> (i32, i32) {
    %c0_i32 = arith.constant 0 : i32
    %c0_i32_0 = arith.constant 0 : i32
    %c0_i32_1 = arith.constant 0 : i32
    return %c0_i32, %c0_i32_0 : i32, i32
  }
  func.func @transform_17(%arg0: i32) -> (i32, i32) {
    %c0_i32 = arith.constant 0 : i32
    %c0_i32_0 = arith.constant 0 : i32
    %c0_i32_1 = arith.constant 0 : i32
    return %c0_i32, %c0_i32_0 : i32, i32
  }
  func.func @transform_18(%arg0: i32) -> (i32, i32) {
    %c0_i32 = arith.constant 0 : i32
    %c0_i32_0 = arith.constant 0 : i32
    %c0_i32_1 = arith.constant 0 : i32
    return %c0_i32, %c0_i32_0 : i32, i32
  }
  func.func @transform_19(%arg0: i32) -> (i32, i32) {
    %c0_i32 = arith.constant 0 : i32
    %c0_i32_0 = arith.constant 0 : i32
    %c0_i32_1 = arith.constant 0 : i32
    return %c0_i32, %c0_i32_0 : i32, i32
  }
  func.func @transform_20(%arg0: i32) -> (i32, i32) {
    %c0_i32 = arith.constant 0 : i32
    %c0_i32_0 = arith.constant 0 : i32
    %c0_i32_1 = arith.constant 0 : i32
    return %c0_i32, %c0_i32_0 : i32, i32
  }
  func.func @transform_21(%arg0: i32) -> (i32, i32) {
    %c0_i32 = arith.constant 0 : i32
    %c0_i32_0 = arith.constant 0 : i32
    %c0_i32_1 = arith.constant 0 : i32
    return %c0_i32, %c0_i32_0 : i32, i32
  }
  func.func @transform_22(%arg0: i32) -> (i32, i32) {
    %c0_i32 = arith.constant 0 : i32
    %c0_i32_0 = arith.constant 0 : i32
    %c0_i32_1 = arith.constant 0 : i32
    return %c0_i32, %c0_i32_0 : i32, i32
  }
  func.func @transform_23(%arg0: i32) -> (i32, i32) {
    %c0_i32 = arith.constant 0 : i32
    %c0_i32_0 = arith.constant 0 : i32
    %c0_i32_1 = arith.constant 0 : i32
    return %c0_i32, %c0_i32_0 : i32, i32
  }
  func.func @transform_24(%arg0: i32) -> (i32, i32) {
    %c0_i32 = arith.constant 0 : i32
    %c0_i32_0 = arith.constant 0 : i32
    %c0_i32_1 = arith.constant 0 : i32
    return %c0_i32, %c0_i32_0 : i32, i32
  }
  func.func @transform_25(%arg0: i32) -> (i32, i32) {
    %c0_i32 = arith.constant 0 : i32
    %c0_i32_0 = arith.constant 0 : i32
    %c0_i32_1 = arith.constant 0 : i32
    return %c0_i32, %c0_i32_0 : i32, i32
  }
  func.func @transform_26(%arg0: i32) -> (i32, i32) {
    %c0_i32 = arith.constant 0 : i32
    %c0_i32_0 = arith.constant 0 : i32
    %c0_i32_1 = arith.constant 0 : i32
    return %c0_i32, %c0_i32_0 : i32, i32
  }
  func.func @transform_27(%arg0: i32) -> (i32, i32) {
    %c0_i32 = arith.constant 0 : i32
    %c0_i32_0 = arith.constant 0 : i32
    %c0_i32_1 = arith.constant 0 : i32
    return %c0_i32, %c0_i32_0 : i32, i32
  }
  func.func @transform_28(%arg0: i32) -> (i32, i32, i32) {
    %c0_i32 = arith.constant 0 : i32
    %c0_i32_0 = arith.constant 0 : i32
    %c0_i32_1 = arith.constant 0 : i32
    return %arg0, %c0_i32, %c0_i32_0 : i32, i32, i32
  }
}

</mosaic_0001>

<bundles_post_ra>
// kernel: bert_mamba_forward.1
= control target key start
LH: loop header
LB: loop body
LE: loop exit
PB: predicated region body
PF: predicated region fallthrough
CT: control target
= control target key end

     0   :  { %s4101_s0 = inlined_call_operand.vmem [shape: f32[2,8,32], index: 0, kind: input, shape index: {}]   ;;  %s4102_s1 = inlined_call_operand.vmem [shape: f32[2,1,8], index: 1, kind: input, shape index: {}]   ;;  %s4103_s2 = inlined_call_operand.vmem [shape: f32[1,32], index: 2, kind: input, shape index: {}]   ;;  %s4104_s3 = inlined_call_operand.vmem [shape: f32[1,32], index: 3, kind: input, shape index: {}]   ;;  %s4105_s4 = inlined_call_operand.vmem [shape: bf16[2,32,96], index: 4, kind: input, shape index: {}]   ;;  %s4106_s5 = inlined_call_operand.vmem [shape: f32[2,1,96], index: 5, kind: input, shape index: {}]   ;;  %s4107_s6 = inlined_call_operand.vmem [shape: bf16[2,32,32], index: 6, kind: input, shape index: {}]   ;;  %s4108_s7 = inlined_call_operand.vmem [shape: f32[2,1,32], index: 7, kind: input, shape index: {}]   ;;  %s4109_s8 = inlined_call_operand.vmem [shape: f32[2,1,32], index: 8, kind: input, shape index: {}]   ;;  %s4110_s9 = inlined_call_operand.vmem [shape: f32[2,1,32], index: 9, kind: input, shape index: {}]   ;;  %s4111_s10 = inlined_call_operand.vmem [shape: bf16[2,32,64], index: 10, kind: input, shape index: {}]   ;;  %s4112_s11 = inlined_call_operand.vmem [shape: f32[2,1,64], index: 11, kind: input, shape index: {}]   ;;  %s4113_s12 = inlined_call_operand.vmem [shape: bf16[2,64,32], index: 12, kind: input, shape index: {}]   ;;  %s4114_s13 = inlined_call_operand.vmem [shape: f32[2,1,32], index: 13, kind: input, shape index: {}]   ;;  %s4115_s14 = inlined_call_operand.vmem [shape: f32[2,1,32], index: 14, kind: input, shape index: {}]   ;;  %s4116_s15 = inlined_call_operand.vmem [shape: f32[2,1,32], index: 15, kind: input, shape index: {}]   ;;  %s4117_s16 = inlined_call_operand.vmem [shape: bf16[32,128], index: 16, kind: input, shape index: {}]   ;;  %s4118_s17 = inlined_call_operand.vmem [shape: f32[4,64], index: 17, kind: input, shape index: {}]   ;;  %s4119_s18 = inlined_call_operand.vmem [shape: f32[1,64], index: 18, kind: input, shape index: {}]   ;;  %s4120_s19 = inlined_call_operand.vmem [shape: f32[64,2], index: 19, kind: input, shape index: {}]   ;;  %s4121_s20 = inlined_call_operand.vmem [shape: f32[32,64], index: 20, kind: input, shape index: {}]   ;;  %s4122_s21 = inlined_call_operand.vmem [shape: f32[2,64], index: 21, kind: input, shape index: {}]   ;;  %s4123_s22 = inlined_call_operand.vmem [shape: f32[1,64], index: 22, kind: input, shape index: {}]   ;;  %s4124_s23 = inlined_call_operand.vmem [shape: f32[16,64], index: 23, kind: input, shape index: {}]   ;;  %s4125_s24 = inlined_call_operand.vmem [shape: f32[1,64], index: 24, kind: input, shape index: {}]   ;;  %s4126_s25 = inlined_call_operand.vmem [shape: bf16[64,32], index: 25, kind: input, shape index: {}]   ;;  %s4127_s26 = inlined_call_operand.vmem [shape: f32[32,3], index: 26, kind: input, shape index: {}]   ;;  %s4128_s27 = inlined_call_operand.vmem [shape: f32[1,3], index: 27, kind: input, shape index: {}]   ;;  %s4129_s28 = inlined_call_operand.hbm [shape: f32[2,1,3], index: 28, kind: output, shape index: {}]  }
   0x1   :  { %4172 = sst [smem:[#allocation14_spill]] %s4101_s0 }
   0x2   :  { %4173 = sst [smem:[#allocation15_spill]] %s4102_s1 }
   0x3   :  { %4174 = sst [smem:[#allocation16_spill]] %s4103_s2 }
   0x4   :  { %4175 = sst [smem:[#allocation17_spill]] %s4104_s3 }
   0x5   :  { %4176 = sst [smem:[#allocation18_spill]] %s4105_s4 }
   0x6   :  { %4177 = sst [smem:[#allocation19_spill]] %s4106_s5 }
   0x7   :  { %4178 = sst [smem:[#allocation20_spill]] %s4107_s6 }
   0x8   :  { %4179 = sst [smem:[#allocation21_spill]] %s4108_s7 }
   0x9   :  { %4180 = sst [smem:[#allocation22_spill]] %s4109_s8 }
   0xa   :  { %4181 = sst [smem:[#allocation23_spill]] %s4110_s9 }
   0xb   :  { %4182 = sst [smem:[#allocation24_spill]] %s4111_s10 }
   0xc   :  { %4183 = sst [smem:[#allocation25_spill]] %s4112_s11 }
   0xd   :  { %4184 = sst [smem:[#allocation26_spill]] %s4113_s12 }
   0xe   :  { %4185 = sst [smem:[#allocation27_spill]] %s4114_s13 }
   0xf   :  { %4186 = sst [smem:[#allocation28_spill]] %s4115_s14 }
  0x10   :  { %4187 = sst [smem:[#allocation29_spill]] %s4127_s26 }
  0x11   :  { %4188 = sst [smem:[#allocation30_spill]] %s4128_s27 }
  0x12   :  { %4189 = sst [smem:[#allocation31_spill]] %s4129_s28 }
  0x13   :  { %33 = vsyncpa [#allocation3], 0 }
  0x14   :  { %35 = vsyncpa [#allocation3 + $0x1], 0  ;;  %s3432_s8 = smov 0   ;;  %s3434_s5 = smov 0  }
  0x15   :  { %s3436_s9 = smov 0   ;;  %s3438_s30 = smov 0  }
  0x16 LB: > { %4190 = sst [smem:[#allocation5_spill]] %s3253_s8  ;;  %s3453_s3 = sadd.s32 4294967295, %s3265_s30   ;;  %s3265_s30 = sphi %s3438_s30, %s4242_s30   ;;  %s3261_s9 = sphi %s3436_s9, %s4245_s9   ;;  %s3257_s5 = sphi %s3434_s5, %s4244_s5   ;;  %s3253_s8 = sphi %s3432_s8, %s4243_s8  }
  0x17   : > { %4191 = sst [smem:[#allocation6_spill]] %s3257_s5  ;;  %s2801_s6 = sadd.s32 4294967294, %s3265_s30  }
  0x18   : > { %4192 = sst [smem:[#allocation7_spill]] %s3261_s9  ;;  %s3457_s10 = sadd.s32 1, %s3265_s30  }
  0x19   : > { %4193 = sst [smem:[#allocation8_spill]] %s3265_s30  ;;  %s646_s0 = sadd.s32 1, %s3261_s9 }
  0x1a   : > { %4194 = sst [smem:[#allocation9_spill]] %s3453_s3  ;;  %s643_s11 = ssub.s32 %s3265_s30, %s3457_s10 }
  0x1b   : > { %4195 = sst [smem:[#allocation10_spill]] %s3457_s10  ;;  %p656_p0 = scmp.ne.s32.totalorder %s3261_s9, %s3257_s5 }
  0x1c   : > { %p644_p1 = scmp.eq.s32.totalorder %s643_s11, 0  ;;  %p657_p2 = scmp.eq.s32.totalorder %s3453_s3, 1 }
  0x1d   : > { %p662_p3 = scmp.ne.s32.totalorder %s3257_s5, %s3253_s8  ;;  %p663_p4 = scmp.eq.s32.totalorder %s2801_s6, 1 }
  0x1e   : > { %s3468_s29 = scalar_select %p644_p1, %s3261_s9, %s646_s0  }
  0x1f   : > { %p3470_p5 = por %p657_p2, %p656_p0  ;;  %p3474_p6 = por %p663_p4, %p662_p3 }
  0x20   : > { %4196 = sst [smem:[#allocation11_spill]] %s3468_s29  ;;  %p2804_p7 = scmp.ge.s32.totalorder %s3265_s30, 1 }
  0x21   : > { %s4197_s2 = scalar_select %p3470_p5, 1, 0 }
  0x22   : > { %s4199_s7 = scalar_select %p3474_p6, 1, 0 }
  0x23   : > { %4198 = sst [smem:[#allocation12_spill]] %s4197_s2  ;;  %p772_p8 = scmp.lt.s32.totalorder %s3265_s30, 3 }
  0x24   : > { %4200 = sst [smem:[#allocation13_spill]] %s4199_s7 }
  0x25   : > { %p773_p9 = pnand %p2804_p7, %p772_p8 }
  0x26   : > { %p847_p10 = scmp.lt.s32.totalorder (!%p773_p9), %s3453_s3, 1  ;;  %s4201_s0 = sld [smem:[#allocation15_spill]] (!%p773_p9) }
  0x27   : > { %776 = sbr.rel (%p773_p9) target bundleno = 5800 (0x16a8), region = 132  ;;  %s4202_s10 = sld [smem:[#allocation14_spill]] (!%p773_p9) }
  0x28   : > { %s4203_s29 = sld [smem:[#allocation18_spill]] (!%p773_p9)  ;;  %s4158_s4 = smov (!%p773_p9), 120  }
  0x29   : > { %s4204_s9 = sld [smem:[#allocation16_spill]] (!%p773_p9)  ;;  %s4151_s6 = smov (!%p773_p9), 96  }
  0x2a   : > { %s4206_s30 = sld [smem:[#allocation19_spill]] (!%p773_p9)  ;;  %s4157_s8 = smov (!%p773_p9), 80  }
  0x2b   : > { %s4218_s27 = sld [smem:[#allocation25_spill]] (!%p773_p9)  ;;  %s4227_s28 = smov (!%p773_p9), 64  }
  0x2c   : > { %s3482_s12 = scalar_select %p847_p10, %s3453_s3, 1  ;;  %vm858_vm0 = vcmask 261120   ;;  %v3267_v2 = vmov 32.0   ;;  %vm944_vm5 = vcmask 64512   ;;  %vm1076_vm6 = vcmask 1043456  }
  0x2d   : > { %3111 = vrcp.f32 %v3267_v2  ;;  %s4217_s3 = sld [smem:[#allocation26_spill]]  ;;  %vm1405_vm10 = vcmask 523264   ;;  %s4228_s26 = smov 40  }
  0x2e   : > { %s2805_s1 = sshll.u32 %s3482_s12, 3  ;;  %v2976_v14 = vld [vmem:[%s4203_s29 + $0x8] sm:$0xff]  ;;  %v2975_v15 = vld [vmem:[%s4203_s29] sm:$0xff]  ;;  %s4208_s11 = scalar_lea.vmem %s4201_s0, %s3482_s12 }
  0x2f   : > { %s850_s7 = scalar_lea.vmem %s4202_s10, %s2805_s1  ;;  %927 = vmatpush.bf16.msra.mxu0 %v2976_v14  ;;  %v3090_v25 = vld [vmem:[%s4204_s9] ss:$0 sm:$0xff]  ;;  %s4205_s1 = sld [smem:[#allocation17_spill]] }
  0x30   : > { %v855_v0 = vld [vmem:[%s850_s7] sm:$0xff]  ;;  %s4207_s2 = smov %s4206_s30  ;;  %s4159_s9 = smov 88  }
  0x31   : > { %v859_v1 = vsel %vm858_vm0, %v855_v0, 0.0  ;;  %v3092_v32 = vld [vmem:[%s4206_s30] ss:$0 sm:$0xff]  ;;  %s4148_s10 = smov 56   ;;  %s4149_s7 = smov 64  }
  0x32   : > { %860 = vadd.xlane.f32.xlu0 %v859_v1  ;;  %v3536_v39 = vld [vmem:[%s4208_s11] ss:$0 sm:$0xff]  ;;  %s4156_s12 = smov 112   ;;  %s4152_s30 = smov 72  }
  0x33   : > { %v3112_v3 = vpop.eup %3111  ;;  %928 = vmatpush.bf16.msra.mxu0 %v2975_v15  ;;  %s4155_s11 = smov 104   ;;  %s4219_s13 = sld [smem:[#allocation27_spill]] }
  0x34   : > { %v863_v4 = vmul.f32 32.0, %v3112_v3  ;;  %vm867_vm1 = vweird.f32 %v3112_v3  ;;  %s4220_s14 = sld [smem:[#allocation28_spill]] }
  0x35   : > { %v3091_v28 = vld [vmem:[%s4205_s1] ss:$0 sm:$0xff]  ;;  %s4153_s1 = smov 48  }
  0x36   : > { %v864_v5 = vsub.f32 1.0, %v863_v4 }
  0x38   : > { %v865_v6 = vmul.f32 %v3112_v3, %v864_v5 }
  0x3a   : > { %v866_v7 = vadd.f32 %v3112_v3, %v865_v6 }
  0x3c   : > { %v3493_v8 = vsel %vm867_vm1, %v3112_v3, %v866_v7 }
  0xa5   : > { %v861_v9 = vpop.xlane.xlu0 %860 }
  0xa6   : > { %v869_v10 = vmul.f32 %v3493_v8, %v861_v9 }
  0xa8   : > { %v870_v11 = vsub.f32 %v855_v0, %v869_v10 }
  0xaa   : > { %v871_v12 = vmul.f32 %v870_v11, %v870_v11 }
  0xac   : > { %v872_v13 = vsel %vm858_vm0, %v871_v12, 0.0 }
  0xad   : > { %873 = vadd.xlane.f32.xlu0 %v872_v13 }
 0x120   : > { %v874_v16 = vpop.xlane.xlu0 %873 }
 0x121   : > { %v875_v17 = vmul.f32 %v874_v16, %v3493_v8 }
 0x123   : > { %v876_v18 = vadd.f32 1e-12, %v875_v17 }
 0x125   : > { %3113 = vrsqrt.f32 %v876_v18  ;;  %vm883_vm3 = vweird.f32 %v876_v18 }
 0x12b   : > { %v3114_v19 = vpop.eup %3113 }
 0x12c   : > { %v878_v20 = vmul.f32 %v3114_v19, %v876_v18  ;;  %vm884_vm2 = vweird.f32 %v3114_v19 }
 0x12d   : > { %vm885_vm4 = vmor %vm883_vm3, %vm884_vm2 }
 0x12e   : > { %v879_v21 = vmul.f32 %v3114_v19, %v878_v20 }
 0x130   : > { %v880_v22 = vmul.f32 0.5, %v879_v21 }
 0x132   : > { %v881_v23 = vsub.f32 1.5, %v880_v22 }
 0x134   : > { %v882_v24 = vmul.f32 %v3114_v19, %v881_v23 }
 0x136   : > { %v886_v26 = vsel %vm885_vm4, %v3114_v19, %v882_v24 }
 0x137   : > { %v887_v27 = vmul.f32 %v886_v26, %v870_v11 }
 0x139   : > { %v891_v29 = vmul.f32 %v3090_v25, %v887_v27 }
 0x13b   : > { %v3510_v30 = vadd.f32 %v3091_v28, %v891_v29 }
 0x13d   : > { %v901_v31 = vpack.c.bf16 %v3510_v30, %v3510_v30 }
 0x13f   : > { %2814 = vmatmul.msk.bf16.vlgmr.msra.gmra.mxu0 %vm858_vm0, %v901_v31 }
 0x1bc   : > { %v930_v33 = vpop.f32.mrf.mxu0 }
 0x1bd   : > { %v3518_v34 = vadd.f32 %v3092_v32, %v930_v33 }
 0x1bf   : > { %1007 = vrot.lane.b32.xlu2 %v3518_v34, %s4158_s4  ;;  %942 = vrot.lane.b32.xlu1 %v3518_v34, %s4151_s6  ;;  %s4209_s6 = sld [smem:[#allocation20_spill]] }
 0x1c4   : > { %v932_v35 = vpop.f32.mrf.mxu0 }
 0x1c5   : > { %v935_v58 = vld [vmem:[%s4209_s6 + $0x4] sm:$0xf]  ;;  %v934_v5 = vld [vmem:[%s4209_s6] sm:$0xf]  ;;  %v936_v31 = vld [vmem:[%s4209_s6 + $0x8] sm:$0xf] }
 0x1c6   : > { %v1078_v59 = vsel %vm1076_vm6, %v935_v58, 0  ;;  %v1097_v6 = vsel %vm1076_vm6, %v934_v5, 0  ;;  %v1182_v32 = vsel %vm1076_vm6, %v936_v31, 0 }
 0x1c7   : > { %1009 = vrot.lane.b32.xlu1 %v3518_v34, %s4159_s9  ;;  %s4215_s9 = sld [smem:[#allocation23_spill]] }
 0x1cd   : > { %s4216_s0 = smov %s4215_s9 }
 0x219   : > { %v1008_v38 = vpop.permute.xlu2 %1007 }
 0x231   : > { %v943_v36 = vpop.permute.xlu1 %942 }
 0x232   : > { %2815 = vmatpush.xpose.msk.msra.mxu1 %vm944_vm5, %v943_v36 }
 0x235   : > { %2816 = vmatmul.msk.f32.vlgmr.msra.gmra.mxu1 %vm944_vm5, %v3518_v34 }
 0x236   : > { %1087 = vmatpush.bf16.msrb.mxu1 %v1078_v59 }
 0x239   : > { %v1010_v37 = vpop.permute.xlu1 %1009 }
 0x23a   : > { %2818 = vmatpush.xpose.msk.msra.mxu3 %vm944_vm5, %v1010_v37 }
 0x23d   : > { %2819 = vmatmul.msk.f32.vlgmr.msra.gmra.mxu3 %vm944_vm5, %v1008_v38 }
 0x23e   : > { %1106 = vmatpush.bf16.msrb.mxu3 %v1097_v6 }
 0x2b2   : > { %v966_v40 = vpop.f32.mrf.mxu1 }
 0x2b3   : > { %v967_v41 = vadd.f32 %v3536_v39, %v966_v40 }
 0x2b5   : > { %v969_v42 = vsel %vm944_vm5, %v967_v41, -inf }
 0x2b6   : > { %970 = vmax.xlane.f32.xlu2 %v969_v42 }
 0x2c0   : > { %v1032_v43 = vpop.f32.mrf.mxu3 }
 0x2c1   : > { %v1033_v44 = vadd.f32 %v3536_v39, %v1032_v43 }
 0x2c3   : > { %v1035_v45 = vsel %vm944_vm5, %v1033_v44, -inf }
 0x2c4   : > { %1036 = vmax.xlane.f32.xlu0 %v1035_v45 }
 0x2ce   : > { %1046 = vrot.lane.b32.xlu2 %v3518_v34, %s4148_s10  ;;  %s4221_s10 = smov 120  }
 0x2d8   : > { %980 = vrot.lane.b32.xlu0 %v3518_v34, %s4149_s7 }
 0x329   : > { %v971_v46 = vpop.xlane.xlu2 %970 }
 0x32a   : > { %v972_v47 = vsub.f32 %v967_v41, %v971_v46 }
 0x32c   : > { %v973_v48 = vmul.f32 1.442695, %v972_v47 }
 0x32e   : > { %3115 = vpow2.f32 %v973_v48 }
 0x331   : > { %v1047_v57 = vpop.permute.xlu2 %1046 }
 0x334   : > { %v3116_v49 = vpop.eup %3115 }
 0x335   : > { %v975_v50 = vsel %vm944_vm5, %v3116_v49, 0.0 }
 0x336   : > { %976 = vadd.xlane.f32.xlu1 %v975_v50 }
 0x337   : > { %v1037_v51 = vpop.xlane.xlu0 %1036 }
 0x338   : > { %v1038_v52 = vsub.f32 %v1033_v44, %v1037_v51 }
 0x33a   : > { %v1039_v53 = vmul.f32 1.442695, %v1038_v52 }
 0x33c   : > { %3117 = vpow2.f32 %v1039_v53 }
 0x342   : > { %v3118_v54 = vpop.eup %3117 }
 0x343   : > { %v1041_v55 = vsel %vm944_vm5, %v3118_v54, 0.0 }
 0x344   : > { %1042 = vadd.xlane.f32.xlu0 %v1041_v55 }
 0x34a   : > { %v981_v56 = vpop.permute.xlu0 %980 }
 0x34b   : > { %1001 = vmatpush.msra.mxu2 %v981_v56 }
 0x34d   : > { %1067 = vmatpush.msrb.mxu2 %v1047_v57 }
 0x34f   : > { %1112 = vrot.lane.b32.xlu1 %v3518_v34, %s4156_s12  ;;  %s4225_s12 = smov 96  }
 0x357   : > { %1151 = vrot.lane.b32.xlu1 %v3518_v34, %s4153_s1  ;;  %s4222_s1 = smov 88  }
 0x358   : > { %1114 = vrot.lane.b32.xlu0 %v3518_v34, %s4157_s8  ;;  %s4226_s8 = smov 104  }
 0x35f   : > { %1200 = vrot.lane.b32.xlu1 %v3518_v34, %s4152_s30  ;;  %s4154_s30 = smov 40  }
 0x367   : > { %1198 = vrot.lane.b32.xlu1 %v3518_v34, %s4155_s11  ;;  %s4210_s11 = sld [smem:[#allocation21_spill]] }
 0x36d   : > { %v3093_v55 = vld [vmem:[%s4210_s11] ss:$0 sm:$0xff] }
 0x3a9   : > { %v977_v60 = vpop.xlane.xlu1 %976 }
 0x3aa   : > { %3119 = vrcp.f32 %v977_v60 }
 0x3b0   : > { %v3120_v61 = vpop.eup %3119 }
 0x3b1   : > { %v979_v62 = vmul.f32 %v3120_v61, %v3116_v49 }
 0x3b3   : > { %2817 = vmatmul.msk.f32.vlgmr.msra.gmra.mxu2 %vm944_vm5, %v979_v62 }
 0x3b7   : > { %v1043_v63 = vpop.xlane.xlu0 %1042 }
 0x3b8   : > { %3121 = vrcp.f32 %v1043_v63 }
 0x3be   : > { %v3122_v0 = vpop.eup %3121 }
 0x3bf   : > { %v1045_v1 = vmul.f32 %v3122_v0, %v3118_v54 }
 0x3c1   : > { %2820 = vmatmul.msk.f32.vlgmr.msrb.gmra.mxu2 %vm944_vm5, %v1045_v1  ;;  %v1113_v2 = vpop.permute.xlu1 %1112 }
 0x3c9   : > { %v1152_v3 = vpop.permute.xlu1 %1151 }
 0x3ca   : > { %v1115_v4 = vpop.permute.xlu0 %1114  ;;  %1172 = vmatpush.msra.mxu1 %v1152_v3 }
 0x3cb   : > { %2823 = vmatpush.xpose.msk.msra.mxu2 %vm944_vm5, %v1115_v4 }
 0x3ce   : > { %2824 = vmatmul.msk.f32.vlgmr.msra.gmra.mxu2 %vm944_vm5, %v1113_v2 }
 0x3cf   : > { %1191 = vmatpush.bf16.msrb.mxu2 %v1182_v32 }
 0x3d1   : > { %v1201_v12 = vpop.permute.xlu1 %1200 }
 0x3d9   : > { %v1199_v29 = vpop.permute.xlu1 %1198 }
 0x436   : > { %v1003_v7 = vpop.f32.mrf.mxu2 }
 0x437   : > { %v1006_v9 = vpack.c.bf16 %v1003_v7, %v1003_v7 }
 0x439   : > { %2822 = vmatmul.msk.bf16.vlgmr.msrb.gmra.mxu3 %vm944_vm5, %v1006_v9 }
 0x444   : > { %v1069_v10 = vpop.f32.mrf.mxu2 }
 0x445   : > { %v1072_v11 = vpack.c.bf16 %v1069_v10, %v1069_v10 }
 0x447   : > { %2821 = vmatmul.msk.bf16.vlgmr.msrb.gmra.mxu1 %vm944_vm5, %v1072_v11 }
 0x448   : > { %2827 = vmatpush.xpose.msk.msrb.mxu1 %vm944_vm5, %v1201_v12 }
 0x451   : > { %v1137_v13 = vpop.f32.mrf.mxu2 }
 0x452   : > { %v1138_v14 = vadd.f32 %v3536_v39, %v1137_v13 }
 0x454   : > { %v1140_v15 = vsel %vm944_vm5, %v1138_v14, -inf }
 0x455   : > { %1141 = vmax.xlane.f32.xlu0 %v1140_v15 }
 0x4bc   : > { %v1108_v16 = vpop.f32.mrf.mxu3 }
 0x4c4   : > { %v1089_v17 = vpop.f32.mrf.mxu1  ;;  %v1110_v18 = vpop.f32.mrf.mxu3 }
 0x4c5   : > { %v1109_v19 = vadd.f32 %v1108_v16, %v1089_v17  ;;  %v3095_v16 = vld [vmem:[%s4215_s9] ss:$0 sm:$0xff]  ;;  %s4224_s9 = smov 112  }
 0x4c8   : > { %v1142_v20 = vpop.xlane.xlu0 %1141 }
 0x4c9   : > { %v1143_v21 = vsub.f32 %v1138_v14, %v1142_v20 }
 0x4cb   : > { %v1144_v22 = vmul.f32 1.442695, %v1143_v21  ;;  %v2982_v21 = vld [vmem:[%s4217_s3 + $0x18] sm:$0xff] }
 0x4cc   : > { %v1091_v23 = vpop.f32.mrf.mxu1 }
 0x4cd   : > { %3123 = vpow2.f32 %v1144_v22  ;;  %v2981_v22 = vld [vmem:[%s4217_s3 + $0x10] sm:$0xff]  ;;  %v2980_v23 = vld [vmem:[%s4217_s3 + $0x8] sm:$0xff] }
 0x4d3   : > { %v3124_v24 = vpop.eup %3123 }
 0x4d4   : > { %v1146_v25 = vsel %vm944_vm5, %v3124_v24, 0.0 }
 0x4d5   : > { %1147 = vadd.xlane.f32.xlu2 %v1146_v25  ;;  %v3096_v25 = vld [vmem:[%s4218_s27] ss:$0 sm:$0xff] }
 0x548   : > { %v1148_v26 = vpop.xlane.xlu2 %1147 }
 0x549   : > { %3125 = vrcp.f32 %v1148_v26 }
 0x54f   : > { %v3126_v27 = vpop.eup %3125 }
 0x550   : > { %v1150_v28 = vmul.f32 %v3126_v27, %v3124_v24  ;;  %v2979_v24 = vld [vmem:[%s4217_s3] sm:$0xff] }
 0x552   : > { %2825 = vmatmul.msk.f32.vlgmr.msra.gmra.mxu1 %vm944_vm5, %v1150_v28 }
 0x55a   : > { %2828 = vmatmul.msk.f32.vlgmr.msrb.gmra.mxu1 %vm944_vm5, %v1199_v29 }
 0x5cf   : > { %v1174_v33 = vpop.f32.mrf.mxu1 }
 0x5d0   : > { %v1177_v35 = vpack.c.bf16 %v1174_v33, %v1174_v33 }
 0x5d2   : > { %2826 = vmatmul.msk.bf16.vlgmr.msrb.gmra.mxu2 %vm944_vm5, %v1177_v35 }
 0x5d7   : > { %v1223_v36 = vpop.f32.mrf.mxu1 }
 0x5d8   : > { %v1224_v37 = vadd.f32 %v3536_v39, %v1223_v36 }
 0x5da   : > { %v1226_v38 = vsel %vm944_vm5, %v1224_v37, -inf }
 0x5db   : > { %1227 = vmax.xlane.f32.xlu0 %v1226_v38 }
 0x5ef   : > { %1237 = vrot.lane.b32.xlu0 %v3518_v34, %s4154_s30  ;;  %v937_v34 = vld [vmem:[%s4209_s6 + $0xc] sm:$0xf]  ;;  %s4211_s30 = sld [smem:[#allocation24_spill]] }
 0x5f0   : > { %v1268_v52 = vsel %vm1076_vm6, %v937_v34, 0 }
 0x5f1   : > { %1277 = vmatpush.bf16.msrb.mxu0 %v1268_v52  ;;  %v2984_v52 = vld [vmem:[%s4203_s29 + $0x18] sm:$0xff] }
 0x5f5   : > { %s4212_s7 = smov %s4211_s30  ;;  %v2978_v3 = vld [vmem:[%s4211_s30 + $0x8] sm:$0xff]  ;;  %s4213_s30 = sld [smem:[#allocation22_spill]]  ;;  %1413 = vmatpush.bf16.msra.mxu0 %v2982_v21 }
 0x5f6   : > { %1352 = vmatpush.bf16.msra.mxu1 %v2978_v3 }
 0x5f9   : > { %1414 = vmatpush.bf16.msra.mxu0 %v2981_v22 }
 0x5fb   : > { %s4214_s4 = smov %s4213_s30  ;;  %v3094_v14 = vld [vmem:[%s4213_s30] ss:$0 sm:$0xff]  ;;  %s4223_s30 = smov 80  }
 0x5fd   : > { %1415 = vmatpush.bf16.msra.mxu0 %v2980_v23 }
 0x601   : > { %1416 = vmatpush.bf16.msra.mxu0 %v2979_v24 }
 0x64e   : > { %v1228_v40 = vpop.xlane.xlu0 %1227 }
 0x64f   : > { %v1229_v41 = vsub.f32 %v1224_v37, %v1228_v40 }
 0x651   : > { %v1230_v42 = vmul.f32 1.442695, %v1229_v41 }
 0x653   : > { %3127 = vpow2.f32 %v1230_v42  ;;  %v3097_v42 = vld [vmem:[%s4219_s13] ss:$0 sm:$0xff] }
 0x655   : > { %v1193_v43 = vpop.f32.mrf.mxu2 }
 0x656   : > { %v1197_v44 = vadd.f32 %v1193_v43, %v1109_v19 }
 0x659   : > { %v3128_v45 = vpop.eup %3127 }
 0x65a   : > { %v1232_v46 = vsel %vm944_vm5, %v3128_v45, 0.0 }
 0x65b   : > { %1233 = vadd.xlane.f32.xlu1 %v1232_v46 }
 0x65d   : > { %v1195_v47 = vpop.f32.mrf.mxu2 }
 0x661   : > { %v1238_v48 = vpop.permute.xlu0 %1237 }
 0x662   : > { %1258 = vmatpush.msra.mxu3 %v1238_v48 }
 0x664   : > { %1487 = vmatpush.bf16.msrb.mxu3 %v2984_v52 }
 0x6ce   : > { %v1234_v49 = vpop.xlane.xlu1 %1233 }
 0x6cf   : > { %3129 = vrcp.f32 %v1234_v49 }
 0x6d5   : > { %v3130_v50 = vpop.eup %3129 }
 0x6d6   : > { %v1236_v51 = vmul.f32 %v3130_v50, %v3128_v45 }
 0x6d8   : > { %2829 = vmatmul.msk.f32.vlgmr.msra.gmra.mxu3 %vm944_vm5, %v1236_v51 }
 0x75b   : > { %v1260_v53 = vpop.f32.mrf.mxu3 }
 0x75c   : > { %v1263_v54 = vpack.c.bf16 %v1260_v53, %v1260_v53  ;;  %v2983_v53 = vld [vmem:[%s4203_s29 + $0x10] sm:$0xff] }
 0x75d   : > { %1488 = vmatpush.bf16.msrb.mxu3 %v2983_v53 }
 0x75e   : > { %2830 = vmatmul.msk.bf16.vlgmr.msrb.gmra.mxu0 %vm944_vm5, %v1263_v54 }
 0x7db   : > { %v1279_v56 = vpop.f32.mrf.mxu0 }
 0x7dc   : > { %v1283_v57 = vadd.f32 %v1279_v56, %v1197_v44 }
 0x7de   : > { %v1288_v58 = vadd.f32 %v3093_v55, %v1283_v57 }
 0x7e0   : > { %v1289_v59 = vadd.f32 %v1288_v58, %v3510_v30  ;;  %v2977_v30 = vld [vmem:[%s4212_s7] sm:$0xff] }
 0x7e1   : > { %1353 = vmatpush.bf16.msra.mxu1 %v2977_v30 }
 0x7e2   : > { %v1292_v60 = vsel %vm858_vm0, %v1289_v59, 0.0 }
 0x7e3   : > { %1293 = vadd.xlane.f32.xlu2 %v1292_v60  ;;  %v1281_v61 = vpop.f32.mrf.mxu0 }
 0x856   : > { %v1294_v62 = vpop.xlane.xlu2 %1293 }
 0x857   : > { %v1295_v63 = vmul.f32 %v1294_v62, %v3493_v8 }
 0x859   : > { %v1296_v0 = vsub.f32 %v1289_v59, %v1295_v63  ;;  %v3098_v63 = vld [vmem:[%s4220_s14] ss:$0 sm:$0xff] }
 0x85b   : > { %v1297_v1 = vmul.f32 %v1296_v0, %v1296_v0 }
 0x85d   : > { %v1298_v2 = vsel %vm858_vm0, %v1297_v1, 0.0  ;;  %v3099_v1 = vld [vmem:[%s4116_s15] ss:$0 sm:$0xff] }
 0x85e   : > { %1299 = vadd.xlane.f32.xlu2 %v1298_v2 }
 0x8d1   : > { %v1300_v4 = vpop.xlane.xlu2 %1299 }
 0x8d2   : > { %v1301_v5 = vmul.f32 %v1300_v4, %v3493_v8 }
 0x8d4   : > { %v1302_v6 = vadd.f32 1e-12, %v1301_v5  ;;  %v3100_v5 = vld [vmem:[%s4207_s2 + $0x1] ss:$0 sm:$0xff]  ;;  %s4234_s2 = sld [smem:[#allocation9_spill]] }
 0x8d6   : > { %3131 = vrsqrt.f32 %v1302_v6  ;;  %vm1309_vm8 = vweird.f32 %v1302_v6 }
 0x8dc   : > { %v3132_v7 = vpop.eup %3131 }
 0x8dd   : > { %v1304_v9 = vmul.f32 %v3132_v7, %v1302_v6  ;;  %vm1310_vm7 = vweird.f32 %v3132_v7 }
 0x8de   : > { %vm1311_vm9 = vmor %vm1309_vm8, %vm1310_vm7  ;;  %vm2072_vm7 = vcmask 1040384  }
 0x8df   : > { %v1305_v10 = vmul.f32 %v3132_v7, %v1304_v9 }
 0x8e1   : > { %v1306_v11 = vmul.f32 0.5, %v1305_v10 }
 0x8e3   : > { %v1307_v12 = vsub.f32 1.5, %v1306_v11 }
 0x8e5   : > { %v1308_v13 = vmul.f32 %v3132_v7, %v1307_v12 }
 0x8e7   : > { %v1312_v15 = vsel %vm1311_vm9, %v3132_v7, %v1308_v13 }
 0x8e8   : > { %v1313_v17 = vmul.f32 %v1312_v15, %v1296_v0 }
 0x8ea   : > { %v1317_v18 = vmul.f32 %v3094_v14, %v1313_v17 }
 0x8ec   : > { %v1321_v19 = vadd.f32 %v3095_v16, %v1317_v18 }
 0x8ee   : > { %v1326_v20 = vpack.c.bf16 %v1321_v19, %v1321_v19 }
 0x8f0   : > { %2839 = vmatmul.msk.bf16.vlgmr.msra.gmra.mxu1 %vm858_vm0, %v1326_v20 }
 0x96d   : > { %v1355_v26 = vpop.f32.mrf.mxu1 }
 0x96e   : > { %v1356_v27 = vadd.f32 %v3096_v25, %v1355_v26  ;;  %v2872_v26 = vld [vmem:[%s4209_s6 + $0x14] sm:$0xf] }
 0x970   : > { %v1359_v28 = vmul.f32 %v1356_v27, %v1356_v27 }
 0x972   : > { %v1360_v29 = vmul.f32 %v1359_v28, %v1356_v27 }
 0x974   : > { %v1361_v31 = vmul.f32 0.044715, %v1360_v29 }
 0x975   : > { %v1357_v32 = vpop.f32.mrf.mxu1 }
 0x976   : > { %v1362_v33 = vadd.f32 %v1361_v31, %v1356_v27 }
 0x978   : > { %v1363_v35 = vmul.f32 0.7978846, %v1362_v33 }
 0x97a   : > { %3133 = vtanh.f32 %v1363_v35 }
 0x980   : > { %v3134_v36 = vpop.eup %3133 }
 0x981   : > { %v1365_v37 = vadd.f32 1.0, %v3134_v36 }
 0x983   : > { %v1366_v38 = vmul.f32 0.5, %v1365_v37 }
 0x985   : > { %v1367_v40 = vmul.f32 %v1366_v38, %v1356_v27  ;;  %v1634_v27 = vsel %vm1076_vm6, %v2872_v26, 0 }
 0x986   : > { %1643 = vmatpush.bf16.msra.mxu2 %v1634_v27  ;;  %v3101_v27 = vld [vmem:[%s4210_s11 + $0x1] ss:$0 sm:$0xff] }
 0x987   : > { %v1376_v41 = vpack.c.bf16 %v1367_v40, %v1367_v40 }
 0x989   : > { %2856 = vmatmul.msk.bf16.vlgmr.msra.gmra.mxu0 %vm1405_vm10, %v1376_v41 }
 0xa06   : > { %v1418_v43 = vpop.f32.mrf.mxu0 }
 0xa07   : > { %v1419_v44 = vadd.f32 %v3097_v42, %v1418_v43 }
 0xa09   : > { %v1422_v45 = vadd.f32 %v1419_v44, %v1321_v19 }
 0xa0b   : > { %v1425_v46 = vsel %vm858_vm0, %v1422_v45, 0.0 }
 0xa0c   : > { %1426 = vadd.xlane.f32.xlu0 %v1425_v46 }
 0xa0e   : > { %v1420_v47 = vpop.f32.mrf.mxu0 }
 0xa7f   : > { %v1427_v48 = vpop.xlane.xlu0 %1426 }
 0xa80   : > { %v1428_v49 = vmul.f32 %v1427_v48, %v3493_v8 }
 0xa82   : > { %v1429_v50 = vsub.f32 %v1422_v45, %v1428_v49 }
 0xa84   : > { %v1430_v51 = vmul.f32 %v1429_v50, %v1429_v50 }
 0xa86   : > { %v1431_v34 = vsel %vm858_vm0, %v1430_v51, 0.0  ;;  %v2873_v51 = vld [vmem:[%s4209_s6 + $0x18] sm:$0xf] }
 0xa87   : > { %1432 = vadd.xlane.f32.xlu2 %v1431_v34  ;;  %v1738_v34 = vsel %vm1076_vm6, %v2873_v51, 0 }
 0xafa   : > { %v1433_v54 = vpop.xlane.xlu2 %1432 }
 0xafb   : > { %v1434_v55 = vmul.f32 %v1433_v54, %v3493_v8 }
 0xafd   : > { %v1435_v56 = vadd.f32 1e-12, %v1434_v55 }
 0xaff   : > { %3135 = vrsqrt.f32 %v1435_v56  ;;  %vm1442_vm12 = vweird.f32 %v1435_v56 }
 0xb05   : > { %v3136_v57 = vpop.eup %3135 }
 0xb06   : > { %v1437_v58 = vmul.f32 %v3136_v57, %v1435_v56  ;;  %vm1443_vm11 = vweird.f32 %v3136_v57 }
 0xb07   : > { %vm1444_vm13 = vmor %vm1442_vm12, %vm1443_vm11 }
 0xb08   : > { %v1438_v59 = vmul.f32 %v3136_v57, %v1437_v58 }
 0xb0a   : > { %v1439_v60 = vmul.f32 0.5, %v1438_v59 }
 0xb0c   : > { %v1440_v61 = vsub.f32 1.5, %v1439_v60 }
 0xb0e   : > { %v1441_v62 = vmul.f32 %v3136_v57, %v1440_v61 }
 0xb10   : > { %v1445_v0 = vsel %vm1444_vm13, %v3136_v57, %v1441_v62 }
 0xb11   : > { %v1446_v2 = vmul.f32 %v1445_v0, %v1429_v50 }
 0xb13   : > { %v1450_v3 = vmul.f32 %v3098_v63, %v1446_v2 }
 0xb15   : > { %v3650_v30 = vadd.f32 %v3099_v1, %v1450_v3 }
 0xb17   : > { %v1460_v4 = vpack.c.bf16 %v3650_v30, %v3650_v30 }
 0xb19   : > { %2870 = vmatmul.msk.bf16.vlgmr.msrb.gmra.mxu3 %vm858_vm0, %v1460_v4 }
 0xb9c   : > { %v1490_v6 = vpop.f32.mrf.mxu3 }
 0xb9d   : > { %v1491_v7 = vadd.f32 %v3100_v5, %v1490_v6 }
 0xb9f   : > { %1564 = vrot.lane.b32.xlu1 %v1491_v7, %s4221_s10  ;;  %1566 = vrot.lane.b32.xlu2 %v1491_v7, %s4222_s1  ;;  %s4229_s1 = smov 56   ;;  %s4232_s10 = sld [smem:[#allocation29_spill]] }
 0xba4   : > { %v1492_v9 = vpop.f32.mrf.mxu3 }
 0xba7   : > { %1670 = vrot.lane.b32.xlu2 %v1491_v7, %s4223_s30  ;;  %s4230_s30 = smov 48  }
 0xbaf   : > { %1668 = vrot.lane.b32.xlu2 %v1491_v7, %s4224_s9  ;;  %s4231_s9 = smov 72  }
 0xbb7   : > { %1500 = vrot.lane.b32.xlu2 %v1491_v7, %s4225_s12 }
 0xbf9   : > { %v1567_v10 = vpop.permute.xlu2 %1566 }
 0xbfa   : > { %2878 = vmatpush.xpose.msk.msra.mxu3 %vm944_vm5, %v1567_v10 }
 0xc01   : > { %v1671_v11 = vpop.permute.xlu2 %1670 }
 0xc02   : > { %2883 = vmatpush.xpose.msk.msrb.mxu3 %vm944_vm5, %v1671_v11 }
 0xc09   : > { %v1669_v12 = vpop.permute.xlu2 %1668 }
 0xc11   : > { %v1565_v13 = vpop.permute.xlu1 %1564  ;;  %v1501_v14 = vpop.permute.xlu2 %1500 }
 0xc12   : > { %2875 = vmatpush.xpose.msk.msrb.mxu0 %vm944_vm5, %v1501_v14  ;;  %2879 = vmatmul.msk.f32.vlgmr.msra.gmra.mxu3 %vm944_vm5, %v1565_v13 }
 0xc13   : > { %1747 = vmatpush.bf16.msra.mxu3 %v1738_v34  ;;  %v3102_v34 = vld [vmem:[%s4214_s4 + $0x1] ss:$0 sm:$0xff] }
 0xc15   : > { %2876 = vmatmul.msk.f32.vlgmr.msrb.gmra.mxu0 %vm944_vm5, %v1491_v7 }
 0xc1a   : > { %2884 = vmatmul.msk.f32.vlgmr.msrb.gmra.mxu3 %vm944_vm5, %v1669_v12  ;;  %v2871_v12 = vld [vmem:[%s4209_s6 + $0x10] sm:$0xf] }
 0xc1b   : > { %v1653_v13 = vsel %vm1076_vm6, %v2871_v12, 0  ;;  %v3105_v12 = vld [vmem:[%s4219_s13 + $0x1] ss:$0 sm:$0xff] }
 0xc92   : > { %v1523_v38 = vpop.f32.mrf.mxu0 }
 0xc93   : > { %v1524_v40 = vadd.f32 %v3536_v39, %v1523_v38 }
 0xc95   : > { %v1589_v15 = vpop.f32.mrf.mxu3  ;;  %v1526_v41 = vsel %vm944_vm5, %v1524_v40, -inf }
 0xc96   : > { %v1590_v16 = vadd.f32 %v3536_v39, %v1589_v15 }
 0xc98   : > { %v1592_v17 = vsel %vm944_vm5, %v1590_v16, -inf }
 0xc99   : > { %1593 = vmax.xlane.f32.xlu0 %v1592_v17 }
 0xc9d   : > { %v1693_v18 = vpop.f32.mrf.mxu3 }
 0xc9e   : > { %v1694_v19 = vadd.f32 %v3536_v39, %v1693_v18 }
 0xca0   : > { %v1696_v20 = vsel %vm944_vm5, %v1694_v19, -inf }
 0xca1   : > { %1697 = vmax.xlane.f32.xlu1 %v1696_v20 }
 0xcba   : > { %1754 = vrot.lane.b32.xlu1 %v1491_v7, %s4226_s8  ;;  %s4233_s8 = sld [smem:[#allocation6_spill]] }
 0xcc2   : > { %1537 = vrot.lane.b32.xlu1 %v1491_v7, %s4227_s28 }
 0xcca   : > { %1793 = vrot.lane.b32.xlu1 %v1491_v7, %s4228_s26  ;;  %s845_s26 = sand.u32 1, %s4233_s8  }
 0xccb   : > { %s846_s11 = scalar_lea.vmem [#allocation2], %s845_s26 }
 0xccc   : > { %s2735_s13 = sshll.u32 %s846_s11, 4  ;;  %s2736_s13 = int_to_ptr.vmem [resolvable:$true] %s2735_s13 }
 0xd0c   : > { %v1594_v21 = vpop.xlane.xlu0 %1593 }
 0xd0d   : > { %v1595_v22 = vsub.f32 %v1590_v16, %v1594_v21 }
 0xd0f   : > { %v1596_v23 = vmul.f32 1.442695, %v1595_v22 }
 0xd11   : > { %3137 = vpow2.f32 %v1596_v23 }
 0xd14   : > { %v1698_v24 = vpop.xlane.xlu1 %1697 }
 0xd15   : > { %v1699_v25 = vsub.f32 %v1694_v19, %v1698_v24  ;;  %v2874_v19 = vld [vmem:[%s4209_s6 + $0x1c] sm:$0xf]  ;;  %s4237_s6 = sld [smem:[#allocation30_spill]] }
 0xd16   : > { %v1824_v20 = vsel %vm1076_vm6, %v2874_v19, 0  ;;  %vm2065_vm6 = vcmask 1041408  }
 0xd17   : > { %v3138_v28 = vpop.eup %3137  ;;  %v1700_v29 = vmul.f32 1.442695, %v1699_v25 }
 0xd18   : > { %v1598_v31 = vsel %vm944_vm5, %v3138_v28, 0.0 }
 0xd19   : > { %3139 = vpow2.f32 %v1700_v29  ;;  %1599 = vadd.xlane.f32.xlu0 %v1598_v31 }
 0xd1f   : > { %v3140_v32 = vpop.eup %3139 }
 0xd20   : > { %v1702_v33 = vsel %vm944_vm5, %v3140_v32, 0.0 }
 0xd21   : > { %1703 = vadd.xlane.f32.xlu2 %v1702_v33 }
 0xd2c   : > { %v1755_v35 = vpop.permute.xlu1 %1754 }
 0xd2d   : > { %1603 = vrot.lane.b32.xlu0 %v1491_v7, %s4229_s1 }
 0xd34   : > { %v1538_v36 = vpop.permute.xlu1 %1537 }
 0xd35   : > { %1707 = vrot.lane.b32.xlu0 %v1491_v7, %s4230_s30  ;;  %1558 = vmatpush.msrb.mxu1 %v1538_v36  ;;  %s4235_s30 = sld [smem:[#allocation31_spill]] }
 0xd37   : > { %1662 = vmatpush.bf16.msra.mxu1 %v1653_v13 }
 0xd3b   : > { %s4236_s12 = smov %s4235_s30 }
 0xd3c   : > { %v1794_v37 = vpop.permute.xlu1 %1793 }
 0xd3d   : > { %1756 = vrot.lane.b32.xlu0 %v1491_v7, %s4231_s9  ;;  %1814 = vmatpush.msrb.mxu2 %v1794_v37  ;;  %s2733_s9 = scalar_lea.hbm %s4235_s30, %s4234_s2 }
 0xd67   : > { %1527 = vmax.xlane.f32.xlu0 %v1526_v41 }
 0xd8c   : > { %v1600_v42 = vpop.xlane.xlu0 %1599 }
 0xd8d   : > { %3141 = vrcp.f32 %v1600_v42  ;;  %v2986_v42 = vld [vmem:[%s4212_s7 + $0x18] sm:$0xff] }
 0xd93   : > { %v3142_v44 = vpop.eup %3141 }
 0xd94   : > { %v1704_v43 = vpop.xlane.xlu2 %1703  ;;  %v1602_v45 = vmul.f32 %v3142_v44, %v3138_v28 }
 0xd95   : > { %3143 = vrcp.f32 %v1704_v43 }
 0xd9b   : > { %v3144_v47 = vpop.eup %3143 }
 0xd9c   : > { %v1706_v48 = vmul.f32 %v3144_v47, %v3140_v32 }
 0xd9f   : > { %v1604_v46 = vpop.permute.xlu0 %1603 }
 0xda0   : > { %1624 = vmatpush.msra.mxu0 %v1604_v46 }
 0xda1   : > { %2880 = vmatmul.msk.f32.vlgmr.msra.gmra.mxu0 %vm944_vm5, %v1602_v45 }
 0xda7   : > { %v1708_v49 = vpop.permute.xlu0 %1707 }
 0xda8   : > { %1728 = vmatpush.msrb.mxu0 %v1708_v49 }
 0xda9   : > { %2885 = vmatmul.msk.f32.vlgmr.msrb.gmra.mxu0 %vm944_vm5, %v1706_v48 }
 0xdaf   : > { %v1757_v50 = vpop.permute.xlu0 %1756 }
 0xdb0   : > { %2887 = vmatpush.xpose.msk.msra.mxu0 %vm944_vm5, %v1757_v50 }
 0xdb3   : > { %2888 = vmatmul.msk.f32.vlgmr.msra.gmra.mxu0 %vm944_vm5, %v1755_v35 }
 0xdb4   : > { %1913 = vmatpush.bf16.msrb.mxu0 %v2986_v42 }
 0xdda   : > { %v1528_v55 = vpop.xlane.xlu0 %1527 }
 0xddb   : > { %v1529_v57 = vsub.f32 %v1524_v40, %v1528_v55 }
 0xddd   : > { %v1530_v58 = vmul.f32 1.442695, %v1529_v57 }
 0xddf   : > { %3145 = vpow2.f32 %v1530_v58  ;;  %v2990_v58 = vld [vmem:[%s4217_s3 + $0x38] sm:$0xff] }
 0xde0   : > { %1975 = vmatpush.bf16.msrb.mxu3 %v2990_v58 }
 0xde5   : > { %v3146_v62 = vpop.eup %3145 }
 0xde6   : > { %v1532_v63 = vsel %vm944_vm5, %v3146_v62, 0.0 }
 0xe1e   : > { %v1626_v52 = vpop.f32.mrf.mxu0 }
 0xe1f   : > { %v1629_v53 = vpack.c.bf16 %v1626_v52, %v1626_v52 }
 0xe21   : > { %2881 = vmatmul.msk.bf16.vlgmr.msra.gmra.mxu2 %vm944_vm5, %v1629_v53  ;;  %v3103_v53 = vld [vmem:[%s4216_s0 + $0x1] ss:$0 sm:$0xff]  ;;  %s2725_s0 = scalar_lea.sflag [#allocation3], %s845_s26 }
 0xe26   : > { %v1730_v54 = vpop.f32.mrf.mxu0 }
 0xe27   : > { %v1733_v56 = vpack.c.bf16 %v1730_v54, %v1730_v54 }
 0xe29   : > { %2886 = vmatmul.msk.bf16.vlgmr.msra.gmra.mxu3 %vm944_vm5, %v1733_v56 }
 0xe30   : > { %v1779_v59 = vpop.f32.mrf.mxu0 }
 0xe31   : > { %v1780_v60 = vadd.f32 %v3536_v39, %v1779_v59  ;;  %v2989_v59 = vld [vmem:[%s4217_s3 + $0x30] sm:$0xff] }
 0xe32   : > { %1976 = vmatpush.bf16.msrb.mxu3 %v2989_v59 }
 0xe33   : > { %v1782_v61 = vsel %vm944_vm5, %v1780_v60, -inf }
 0xe34   : > { %1783 = vmax.xlane.f32.xlu2 %v1782_v61  ;;  %v2987_v61 = vld [vmem:[%s4217_s3 + $0x20] sm:$0xff] }
 0xe3c   : > { %1533 = vadd.xlane.f32.xlu2 %v1532_v63 }
 0xea4   : > { %v1645_v0 = vpop.f32.mrf.mxu2 }
 0xea7   : > { %v1784_v1 = vpop.xlane.xlu2 %1783 }
 0xea8   : > { %v1785_v2 = vsub.f32 %v1780_v60, %v1784_v1  ;;  %v2988_v60 = vld [vmem:[%s4217_s3 + $0x28] sm:$0xff] }
 0xea9   : > { %1977 = vmatpush.bf16.msrb.mxu3 %v2988_v60 }
 0xeaa   : > { %v1786_v3 = vmul.f32 1.442695, %v1785_v2 }
 0xeac   : > { %3147 = vpow2.f32 %v1786_v3  ;;  %v1647_v4 = vpop.f32.mrf.mxu2  ;;  %v1749_v5 = vpop.f32.mrf.mxu3 }
 0xead   : > { %1978 = vmatpush.bf16.msrb.mxu3 %v2987_v61  ;;  %v2104_v61 = vld [vmem:[%s4120_s19 + $0x10] sm:$0xff] }
 0xeaf   : > { %v1534_v6 = vpop.xlane.xlu2 %1533 }
 0xeb0   : > { %3149 = vrcp.f32 %v1534_v6 }
 0xeb2   : > { %v3148_v7 = vpop.eup %3147 }
 0xeb3   : > { %v1788_v39 = vsel %vm944_vm5, %v3148_v7, 0.0 }
 0xeb4   : > { %1789 = vadd.xlane.f32.xlu2 %v1788_v39  ;;  %v1751_v9 = vpop.f32.mrf.mxu3 }
 0xeb6   : > { %v3150_v10 = vpop.eup %3149 }
 0xeb7   : > { %v1536_v11 = vmul.f32 %v3150_v10, %v3146_v62  ;;  %v3104_v62 = vld [vmem:[%s4218_s27 + $0x1] ss:$0 sm:$0xff] }
 0xeb9   : > { %2877 = vmatmul.msk.f32.vlgmr.msrb.gmra.mxu1 %vm944_vm5, %v1536_v11 }
 0xeba   : > { %1833 = vmatpush.bf16.msrb.mxu1 %v1824_v20 }
 0xf27   : > { %v1790_v14 = vpop.xlane.xlu2 %1789 }
 0xf28   : > { %3151 = vrcp.f32 %v1790_v14 }
 0xf2e   : > { %v3152_v15 = vpop.eup %3151 }
 0xf2f   : > { %v1792_v16 = vmul.f32 %v3152_v15, %v3148_v7 }
 0xf31   : > { %2889 = vmatmul.msk.f32.vlgmr.msrb.gmra.mxu2 %vm944_vm5, %v1792_v16 }
 0xf36   : > { %v1560_v17 = vpop.f32.mrf.mxu1 }
 0xf37   : > { %v1563_v18 = vpack.c.bf16 %v1560_v17, %v1560_v17 }
 0xf39   : > { %2882 = vmatmul.msk.bf16.vlgmr.msra.gmra.mxu1 %vm944_vm5, %v1563_v18 }
 0xfb4   : > { %v1816_v21 = vpop.f32.mrf.mxu2 }
 0xfb5   : > { %v1819_v22 = vpack.c.bf16 %v1816_v21, %v1816_v21 }
 0xfb6   : > { %v1664_v23 = vpop.f32.mrf.mxu1 }
 0xfb7   : > { %2890 = vmatmul.msk.bf16.vlgmr.msrb.gmra.mxu1 %vm944_vm5, %v1819_v22  ;;  %v1665_v25 = vadd.f32 %v1664_v23, %v1645_v0  ;;  %v2992_v23 = vld [vmem:[%s4117_s16 + $0x8] sm:$0xff]  ;;  %vm2058_vm5 = vcmask 1042432  }
 0xfb8   : > { %2045 = vmatpush.bf16.msra.mxu2 %v2992_v23 }
 0xfb9   : > { %v1753_v26 = vadd.f32 %v1749_v5, %v1665_v25 }
 0xfbe   : > { %v1666_v24 = vpop.f32.mrf.mxu1 }
 0xfbf   : > { %v2991_v24 = vld [vmem:[%s4117_s16] sm:$0xff] }
 0xfc0   : > { %2046 = vmatpush.bf16.msra.mxu2 %v2991_v24 }
0x1034   : > { %v1835_v28 = vpop.f32.mrf.mxu1 }
0x1035   : > { %v1839_v29 = vadd.f32 %v1835_v28, %v1753_v26 }
0x1037   : > { %v1845_v31 = vadd.f32 %v3101_v27, %v1839_v29 }
0x1039   : > { %v1846_v32 = vadd.f32 %v1845_v31, %v3650_v30  ;;  %v2985_v30 = vld [vmem:[%s4212_s7 + $0x10] sm:$0xff] }
0x103a   : > { %1914 = vmatpush.bf16.msrb.mxu0 %v2985_v30  ;;  %v2052_v30 = vld [vmem:[%s4118_s17] sm:$0xf] }
0x103b   : > { %v1851_v33 = vsel %vm858_vm0, %v1846_v32, 0.0  ;;  %v2074_v59 = vperm.slane %v2052_v30, 2 }
0x103c   : > { %v1837_v35 = vpop.f32.mrf.mxu1  ;;  %1852 = vadd.xlane.f32.xlu2 %v1851_v33 }
0x10af   : > { %v1853_v36 = vpop.xlane.xlu2 %1852 }
0x10b0   : > { %v1854_v37 = vmul.f32 %v1853_v36, %v3493_v8  ;;  %v3106_v36 = vld [vmem:[%s4220_s14 + $0x1] ss:$0 sm:$0xff]  ;;  %s2737_s14 = sshll.u32 %s2733_s9, 4  ;;  %s2738_s14 = int_to_ptr.hbm [resolvable:$true] %s2737_s14 }
0x10b1   : > { %s3217_s8 = sshra.s32 %s2738_s14, 4  ;;  %s3218_s8 = int_to_ptr.hbm [resolvable:$true] %s3217_s8 }
0x10b2   : > { %v1855_v38 = vsub.f32 %v1846_v32, %v1854_v37  ;;  %p3224_p0 = scmp.lt.s32.totalorder %s3218_s8, %s4236_s12 }
0x10b4   : > { %v1856_v40 = vmul.f32 %v1855_v38, %v1855_v38 }
0x10b6   : > { %v1857_v41 = vsel %vm858_vm0, %v1856_v40, 0.0 }
0x10b7   : > { %1858 = vadd.xlane.f32.xlu1 %v1857_v41 }
0x112a   : > { %v1859_v43 = vpop.xlane.xlu1 %1858 }
0x112b   : > { %v1860_v44 = vmul.f32 %v1859_v43, %v3493_v8  ;;  %v2109_v43 = vld [vmem:[%s4120_s19 + $0x38] sm:$0xff] }
0x112c   : > { %2121 = vmatpush.msra.mxu1 %v2109_v43  ;;  %v3281_v43 = vmov 0  }
0x112d   : > { %v1861_v45 = vadd.f32 1e-12, %v1860_v44  ;;  %v2108_v44 = vld [vmem:[%s4120_s19 + $0x30] sm:$0xff]  ;;  %3056 = vset.pattern.permute.xlu2 %v3281_v43 }
0x112e   : > { %2122 = vmatpush.msra.mxu1 %v2108_v44 }
0x112f   : > { %3153 = vrsqrt.f32 %v1861_v45  ;;  %vm1868_vm15 = vweird.f32 %v1861_v45 }
0x1135   : > { %v3154_v46 = vpop.eup %3153 }
0x1136   : > { %v1863_v47 = vmul.f32 %v3154_v46, %v1861_v45  ;;  %vm1869_vm14 = vweird.f32 %v3154_v46 }
0x1137   : > { %vm1870_vm1 = vmor %vm1868_vm15, %vm1869_vm14 }
0x1138   : > { %v1864_v48 = vmul.f32 %v3154_v46, %v1863_v47  ;;  %v2060_v47 = vperm.slane %v2052_v30, 0 }
0x113a   : > { %v1865_v49 = vmul.f32 0.5, %v1864_v48  ;;  %v2107_v48 = vld [vmem:[%s4120_s19 + $0x28] sm:$0xff] }
0x113b   : > { %2123 = vmatpush.msra.mxu1 %v2107_v48  ;;  %v3283_v48 = vmov 1  }
0x113c   : > { %v1866_v50 = vsub.f32 1.5, %v1865_v49 }
0x113e   : > { %v1867_v51 = vmul.f32 %v3154_v46, %v1866_v50 }
0x1140   : > { %v1871_v52 = vsel %vm1870_vm1, %v3154_v46, %v1867_v51  ;;  %v2053_v46 = vperm.slane %v2052_v30, 3 }
0x1141   : > { %v1872_v54 = vmul.f32 %v1871_v52, %v1855_v38  ;;  %v2067_v52 = vperm.slane %v2052_v30, 1  ;;  %v3280_v30 = vmov 3  }
0x1142   : > { %3059 = vset.pattern.permute.xlu0 %v3280_v30 }
0x1143   : > { %v1876_v55 = vmul.f32 %v3102_v34, %v1872_v54  ;;  %v2106_v34 = vld [vmem:[%s4120_s19 + $0x20] sm:$0xff] }
0x1144   : > { %2124 = vmatpush.msra.mxu1 %v2106_v34  ;;  %v3286_v34 = vmov 6  }
0x1145   : > { %v1880_v56 = vadd.f32 %v3103_v53, %v1876_v55 }
0x1147   : > { %v1886_v57 = vpack.c.bf16 %v1880_v56, %v1880_v56 }
0x1149   : > { %2907 = vmatmul.msk.bf16.vlgmr.msrb.gmra.mxu0 %vm858_vm0, %v1886_v57 }
0x11c6   : > { %v1916_v63 = vpop.f32.mrf.mxu0 }
0x11c7   : > { %v1917_v0 = vadd.f32 %v3104_v62, %v1916_v63 }
0x11c9   : > { %v1920_v1 = vmul.f32 %v1917_v0, %v1917_v0 }
0x11cb   : > { %v1921_v2 = vmul.f32 %v1920_v1, %v1917_v0 }
0x11cd   : > { %v1922_v3 = vmul.f32 0.044715, %v1921_v2 }
0x11ce   : > { %v1918_v4 = vpop.f32.mrf.mxu0 }
0x11cf   : > { %v1923_v5 = vadd.f32 %v1922_v3, %v1917_v0  ;;  %v3108_v4 = vld [vmem:[%s4119_s18] ss:$0 sm:$0xff] }
0x11d1   : > { %v1924_v6 = vmul.f32 0.7978846, %v1923_v5  ;;  %v2102_v5 = vld [vmem:[%s4120_s19] sm:$0xff] }
0x11d3   : > { %3155 = vtanh.f32 %v1924_v6 }
0x11d9   : > { %v3156_v7 = vpop.eup %3155 }
0x11da   : > { %v1926_v39 = vadd.f32 1.0, %v3156_v7 }
0x11dc   : > { %v1927_v9 = vmul.f32 0.5, %v1926_v39 }
0x11de   : > { %v1928_v10 = vmul.f32 %v1927_v9, %v1917_v0  ;;  %v2103_v0 = vld [vmem:[%s4120_s19 + $0x8] sm:$0xff] }
0x11e0   : > { %v1938_v11 = vpack.c.bf16 %v1928_v10, %v1928_v10 }
0x11e2   : > { %2933 = vmatmul.msk.bf16.vlgmr.msrb.gmra.mxu3 %vm1405_vm10, %v1938_v11 }
0x1265   : > { %v1980_v13 = vpop.f32.mrf.mxu3 }
0x1266   : > { %v1981_v14 = vadd.f32 %v3105_v12, %v1980_v13 }
0x1268   : > { %v1984_v15 = vadd.f32 %v1981_v14, %v1880_v56  ;;  %v2105_v56 = vld [vmem:[%s4120_s19 + $0x18] sm:$0xff] }
0x1269   : > { %2125 = vmatpush.msra.mxu1 %v2105_v56 }
0x126a   : > { %v1989_v16 = vsel %vm858_vm0, %v1984_v15, 0.0 }
0x126b   : > { %1990 = vadd.xlane.f32.xlu2 %v1989_v16  ;;  %2126 = vmatpush.msra.mxu1 %v2104_v61  ;;  %v3110_v61 = vld [vmem:[%s4123_s22] ss:$0 sm:$0xff] }
0x126d   : > { %v1982_v17 = vpop.f32.mrf.mxu3  ;;  %2127 = vmatpush.msra.mxu1 %v2103_v0 }
0x126f   : > { %2128 = vmatpush.msra.mxu1 %v2102_v5 }
0x12de   : > { %v1991_v18 = vpop.xlane.xlu2 %1990 }
0x12df   : > { %v1992_v19 = vmul.f32 %v1991_v18, %v3493_v8 }
0x12e1   : > { %v1993_v20 = vsub.f32 %v1984_v15, %v1992_v19 }
0x12e3   : > { %v1994_v21 = vmul.f32 %v1993_v20, %v1993_v20 }
0x12e5   : > { %v1995_v22 = vsel %vm858_vm0, %v1994_v21, 0.0 }
0x12e6   : > { %1996 = vadd.xlane.f32.xlu0 %v1995_v22 }
0x1359   : > { %v1997_v25 = vpop.xlane.xlu0 %1996 }
0x135a   : > { %v1998_v26 = vmul.f32 %v1997_v25, %v3493_v8  ;;  %v3107_v8 = vld [vmem:[%s4116_s15 + $0x1] ss:$0 sm:$0xff] }
0x135c   : > { %v1999_v27 = vadd.f32 1e-12, %v1998_v26 }
0x135e   : > { %3157 = vrsqrt.f32 %v1999_v27  ;;  %vm2006_vm3 = vweird.f32 %v1999_v27 }
0x1364   : > { %v3158_v28 = vpop.eup %3157 }
0x1365   : > { %v2001_v29 = vmul.f32 %v3158_v28, %v1999_v27  ;;  %vm2007_vm2 = vweird.f32 %v3158_v28 }
0x1366   : > { %vm2008_vm4 = vmor %vm2006_vm3, %vm2007_vm2  ;;  %vm2138_vm2 = vcmask 15360  }
0x1367   : > { %v2002_v31 = vmul.f32 %v3158_v28, %v2001_v29 }
0x1369   : > { %v2003_v32 = vmul.f32 0.5, %v2002_v31 }
0x136b   : > { %v2004_v33 = vsub.f32 1.5, %v2003_v32 }
0x136d   : > { %v2005_v35 = vmul.f32 %v3158_v28, %v2004_v33 }
0x136f   : > { %v2009_v37 = vsel %vm2008_vm4, %v3158_v28, %v2005_v35 }
0x1370   : > { %v2010_v38 = vmul.f32 %v2009_v37, %v1993_v20  ;;  %v2183_v37 = vld [vmem:[%s4121_s20] sm:$0xff] }
0x1372   : > { %v2014_v40 = vmul.f32 %v3106_v36, %v2010_v38  ;;  %v2184_v38 = vld [vmem:[%s4121_s20 + $0x8] sm:$0xff] }
0x1374   : > { %v2018_v41 = vadd.f32 %v3107_v8, %v2014_v40  ;;  %v2185_v8 = vld [vmem:[%s4121_s20 + $0x10] sm:$0xff]  ;;  %v2186_v40 = vld [vmem:[%s4121_s20 + $0x18] sm:$0xff] }
0x1376   : > { %v2023_v42 = vpack.c.bf16 %v2018_v41, %v2018_v41  ;;  %v2133_v41 = vld [vmem:[%s4122_s21] sm:$0x3] }
0x1377   : > { %2947 = vmatpush.msk.msra.mxu0 %vm2065_vm6, %v2133_v41 }
0x1378   : > { %2944 = vmatmul.msk.bf16.vlgmr.msra.gmra.mxu2 %vm858_vm0, %v2023_v42  ;;  %v3279_v42 = vmov 5  }
0x1379   : > { %3061 = vset.pattern.permute.xlu1 %v3279_v42 }
0x13fb   : > { %v2048_v45 = vpop.f32.mrf.mxu2 }
0x13fc   : > { %v2056_v49 = vrot.slane %v2048_v45, 5  ;;  %v2063_v50 = vrot.slane %v2048_v45, 6  ;;  %v2070_v51 = vrot.slane %v2048_v45, 7  ;;  %v2954_v53 = vmul.f32 -1.442695, %v2048_v45 }
0x13fd   : > { %v2054_v57 = vmul.f32 %v2053_v46, %v2048_v45 }
0x13fe   : > { %v2059_v54 = vsel %vm2058_vm5, 0.0, %v2056_v49  ;;  %v2066_v55 = vsel %vm2065_vm6, 0.0, %v2063_v50  ;;  %3159 = vpow2.f32 %v2954_v53  ;;  %v2073_v60 = vsel %vm2072_vm7, 0.0, %v2070_v51 }
0x13ff   : > { %v2061_v58 = vmul.f32 %v2060_v47, %v2059_v54  ;;  %v2068_v63 = vmul.f32 %v2067_v52, %v2066_v55  ;;  %v2075_v2 = vmul.f32 %v2074_v59, %v2073_v60  ;;  %v3282_v47 = vmov 7  }
0x1400   : > { %v3284_v49 = vmov 2   ;;  %v3285_v51 = vmov 4  }
0x1401   : > { %v2062_v62 = vadd.f32 %v2061_v58, %v2054_v57 }
0x1403   : > { %v2069_v1 = vadd.f32 %v2068_v63, %v2062_v62  ;;  %v2050_v3 = vpop.f32.mrf.mxu2 }
0x1404   : > { %v3160_v6 = vpop.eup %3159 }
0x1405   : > { %v2076_v7 = vadd.f32 %v2075_v2, %v2069_v1  ;;  %v2234_v39 = vadd.f32 1.0, %v3160_v6 }
0x1407   : > { %v2081_v9 = vadd.f32 %v3108_v4, %v2076_v7  ;;  %3161 = vrcp.f32 %v2234_v39  ;;  %v2246_v15 = vand.u32 2147483648, %v2234_v39  ;;  %v2244_v18 = vand.u32 2147483647, %v2234_v39 }
0x1408   : > { %vm2240_vm9 = vweird.f32 %v2234_v39 }
0x1409   : > { %v2945_v10 = vmul.f32 -1.442695, %v2081_v9  ;;  %v2247_v20 = vor.u32 1.1754944e-38, %v2246_v15  ;;  %vm2245_vm12 = vcmp.eq.f32.partialorder %v2244_v18, 8.507059e+37 }
0x140b   : > { %3163 = vpow2.f32 %v2945_v10 }
0x140d   : > { %v3162_v11 = vpop.eup %3161 }
0x140e   : > { %v2236_v12 = vmul.f32 %v3162_v11, %v2234_v39  ;;  %vm2241_vm8 = vweird.f32 %v3162_v11 }
0x140f   : > { %vm2242_vm11 = vmor %vm2240_vm9, %vm2241_vm8 }
0x1410   : > { %v2237_v14 = vsub.f32 1.0, %v2236_v12 }
0x1411   : > { %v3164_v13 = vpop.eup %3163 }
0x1412   : > { %v2085_v16 = vadd.f32 1.0, %v3164_v13  ;;  %v2238_v17 = vmul.f32 %v3162_v11, %v2237_v14 }
0x1414   : > { %3165 = vrcp.f32 %v2085_v16  ;;  %v2239_v19 = vadd.f32 %v3162_v11, %v2238_v17  ;;  %v2097_v27 = vand.u32 2147483648, %v2085_v16  ;;  %v2095_v29 = vand.u32 2147483647, %v2085_v16 }
0x1415   : > { %vm2091_vm14 = vweird.f32 %v2085_v16 }
0x1416   : > { %v2243_v21 = vsel %vm2242_vm11, %v3162_v11, %v2239_v19  ;;  %v2098_v32 = vor.u32 1.1754944e-38, %v2097_v27  ;;  %vm2096_vm1 = vcmp.eq.f32.partialorder %v2095_v29, 8.507059e+37 }
0x1417   : > { %v2248_v22 = vsel %vm2245_vm12, %v2247_v20, %v2243_v21 }
0x1418   : > { %v3801_v23 = vmul.f32 %v2248_v22, %v2048_v45 }
0x141a   : > { %v3166_v24 = vpop.eup %3165  ;;  %2257 = vrot.lane.b32.xlu2 %v3801_v23, %s4227_s28  ;;  %v2450_v53 = vrot.slane %v3801_v23, 3  ;;  %v2591_v54 = vrot.slane %v3801_v23, 6  ;;  %v2403_v57 = vrot.slane %v3801_v23, 2  ;;  %v2544_v59 = vrot.slane %v3801_v23, 5 }
0x141b   : > { %v2087_v25 = vmul.f32 %v3166_v24, %v2085_v16  ;;  %vm2092_vm13 = vweird.f32 %v3166_v24  ;;  %v2356_v5 = vrot.slane %v3801_v23, 1  ;;  %v2497_v11 = vrot.slane %v3801_v23, 4 }
0x141c   : > { %vm2093_vm15 = vmor %vm2091_vm14, %vm2092_vm13  ;;  %v2638_v21 = vrot.slane %v3801_v23, 7 }
0x141d   : > { %v2088_v26 = vsub.f32 1.0, %v2087_v25 }
0x141f   : > { %v2089_v28 = vmul.f32 %v3166_v24, %v2088_v26 }
0x1421   : > { %v2090_v31 = vadd.f32 %v3166_v24, %v2089_v28  ;;  %v3893_v28 = vld [vmem:[%s4124_s23] sm:$0xff] }
0x1423   : > { %v2094_v33 = vsel %vm2093_vm15, %v3166_v24, %v2090_v31 }
0x1424   : > { %v2099_v35 = vsel %vm2096_vm1, %v2098_v32, %v2094_v33 }
0x1425   : > { %v3805_v36 = vmul.f32 %v2099_v35, %v2081_v9 }
0x1427   : > { %2946 = vmatmul.msk.f32.vlgmr.msra.gmra.mxu1 %vm1405_vm10, %v3805_v36  ;;  %2949 = vmatpush.xpose.msk.msrb.mxu2 %vm1405_vm10, %v3805_v36 }
0x142a   : > { %2950 = vmatmul.msk.f32.vlgmr.msrb.gmra.mxu2 %vm1405_vm10, %v2183_v37 }
0x1432   : > { %2951 = vmatmul.msk.f32.gmra.mxu2 %vm1405_vm10, %v2184_v38 }
0x143a   : > { %2952 = vmatmul.msk.f32.gmra.mxu2 %vm1405_vm10, %v2185_v8 }
0x1442   : > { %2953 = vmatmul.msk.f32.gmra.mxu2 %vm1405_vm10, %v2186_v40 }
0x1474   : > { %v3847_v55 = vpop.permute.xlu2 %2257 }
0x14a4   : > { %v2130_v44 = vpop.f32.mrf.mxu1 }
0x14a5   : > { %2948 = vmatmul.msk.f32.vlgmr.msra.gmra.mxu0 %vm2138_vm2, %v2130_v44 }
0x14ad   : > { %v2216_v45 = vpop.f32.mrf.mxu2 }
0x14ae   : > { %2513 = vperm.xlu1 %3061, %v2216_v45   ;;  %2419 = vperm.xlu0 %3059, %v2216_v45  }
0x14af   : > { %2279 = vperm.xlu2 %3056, %v2216_v45  }
0x14b5   : > { %v2219_v46 = vpop.f32.mrf.mxu2 }
0x14b6   : > { %3063 = vset.pattern.permute.xlu1 %v3282_v47  ;;  %3064 = vset.pattern.permute.xlu0 %v3281_v43 }
0x14b7   : > { %3057 = vset.pattern.permute.xlu2 %v3283_v48  ;;  %2607 = vperm.xlu1 %3063, %v2216_v45  }
0x14b8   : > { %2325 = vperm.xlu2 %3057, %v2216_v45   ;;  %2284 = vperm.xlu0 %3064, %v2219_v46  }
0x14bd   : > { %v2222_v50 = vpop.f32.mrf.mxu2 }
0x14bf   : > { %3065 = vset.pattern.permute.xlu1 %v3283_v48 }
0x14c0   : > { %3058 = vset.pattern.permute.xlu2 %v3284_v49  ;;  %3069 = vset.pattern.permute.xlu0 %v3279_v42 }
0x14c1   : > { %2372 = vperm.xlu2 %3058, %v2216_v45   ;;  %2329 = vperm.xlu1 %3065, %v2219_v46  }
0x14c2   : > { %2517 = vperm.xlu0 %3069, %v2219_v46  }
0x14c5   : > { %v2225_v52 = vpop.f32.mrf.mxu2 }
0x14c9   : > { %3060 = vset.pattern.permute.xlu2 %v3285_v51  ;;  %3068 = vset.pattern.permute.xlu1 %v3285_v51 }
0x14ca   : > { %3072 = vset.pattern.permute.xlu0 %v3281_v43  ;;  %2466 = vperm.xlu2 %3060, %v2216_v45  }
0x14cb   : > { %2470 = vperm.xlu1 %3068, %v2219_v46   ;;  %2294 = vperm.xlu0 %3072, %v2222_v50  }
0x14d2   : > { %3062 = vset.pattern.permute.xlu2 %v3286_v34 }
0x14d3   : > { %3070 = vset.pattern.permute.xlu1 %v3286_v34  ;;  %3077 = vset.pattern.permute.xlu0 %v3279_v42 }
0x14d4   : > { %2560 = vperm.xlu2 %3062, %v2216_v45   ;;  %2564 = vperm.xlu1 %3070, %v2219_v46  }
0x14d5   : > { %2526 = vperm.xlu0 %3077, %v2222_v50  }
0x14dc   : > { %3066 = vset.pattern.permute.xlu2 %v3284_v49  ;;  %3073 = vset.pattern.permute.xlu1 %v3283_v48 }
0x14dd   : > { %3083 = vset.pattern.permute.xlu0 %v3280_v30  ;;  %2376 = vperm.xlu2 %3066, %v2219_v46  }
0x14de   : > { %2338 = vperm.xlu1 %3073, %v2222_v50   ;;  %2436 = vperm.xlu0 %3083, %v2225_v52  }
0x14e5   : > { %3067 = vset.pattern.permute.xlu2 %v3280_v30 }
0x14e6   : > { %3074 = vset.pattern.permute.xlu1 %v3284_v49  ;;  %3086 = vset.pattern.permute.xlu0 %v3286_v34 }
0x14e7   : > { %2423 = vperm.xlu2 %3067, %v2219_v46   ;;  %2385 = vperm.xlu1 %3074, %v2222_v50  }
0x14e8   : > { %2577 = vperm.xlu0 %3086, %v2225_v52  }
0x14ef   : > { %3071 = vset.pattern.permute.xlu2 %v3282_v47  ;;  %3075 = vset.pattern.permute.xlu1 %v3280_v30 }
0x14f0   : > { %2451 = vrot.lane.b32.xlu0 %v2450_v53, %s4227_s28  ;;  %2611 = vperm.xlu2 %3071, %v2219_v46  }
0x14f1   : > { %2432 = vperm.xlu1 %3075, %v2222_v50   ;;  %3088 = vset.pattern.permute.xlu0 %v3282_v47 }
0x14f8   : > { %2592 = vrot.lane.b32.xlu0 %v2591_v54, %s4227_s28  ;;  %3076 = vset.pattern.permute.xlu2 %v3285_v51 }
0x14f9   : > { %3078 = vset.pattern.permute.xlu1 %v3286_v34  ;;  %2479 = vperm.xlu2 %3076, %v2222_v50  }
0x14fa   : > { %2573 = vperm.xlu1 %3078, %v2222_v50  }
0x1501   : > { %3079 = vset.pattern.permute.xlu2 %v3282_v47 }
0x1502   : > { %3084 = vset.pattern.permute.xlu1 %v3285_v51  ;;  %2620 = vperm.xlu2 %3079, %v2222_v50  }
0x1503   : > { %2483 = vperm.xlu1 %3084, %v2225_v52  }
0x1509   : > { %v3849_v56 = vpop.permute.xlu2 %2279 }
0x150a   : > { %3080 = vset.pattern.permute.xlu2 %v3281_v43 }
0x150b   : > { %3087 = vset.pattern.permute.xlu1 %v3282_v47  ;;  %2299 = vperm.xlu2 %3080, %v2225_v52  }
0x150c   : > { %2624 = vperm.xlu1 %3087, %v2225_v52  }
0x1512   : > { %v3853_v58 = vpop.permute.xlu2 %2325 }
0x1513   : > { %3081 = vset.pattern.permute.xlu2 %v3283_v48 }
0x1514   : > { %2404 = vrot.lane.b32.xlu1 %v2403_v57, %s4227_s28  ;;  %2342 = vperm.xlu2 %3081, %v2225_v52  }
0x151b   : > { %v3858_v60 = vpop.permute.xlu2 %2372 }
0x151c   : > { %2545 = vrot.lane.b32.xlu1 %v2544_v59, %s4227_s28  ;;  %3082 = vset.pattern.permute.xlu2 %v3284_v49 }
0x151d   : > { %2389 = vperm.xlu2 %3082, %v2225_v52  }
0x1520   : > { %v3865_v63 = vpop.permute.xlu1 %2513  ;;  %v3880_v14 = vpop.permute.xlu0 %2419 }
0x1522   : > { %v2162_v62 = vpop.f32.mrf.mxu0 }
0x1523   : > { %v2163_v0 = vadd.f32 %v3110_v61, %v2162_v62 }
0x1524   : > { %v3867_v1 = vpop.permute.xlu2 %2466 }
0x1525   : > { %v2168_v2 = vand.u32 2147483647, %v2163_v0  ;;  %3085 = vset.pattern.permute.xlu2 %v3279_v42  ;;  %v2165_v20 = vmax.f32 %v2163_v0, 0.0  ;;  %vm2166_vm4 = vcmp.ne.f32.partialorder %v2163_v0, %v2163_v0  ;;  %v3911_v42 = vld [vmem:[%s4124_s23 + $0x8] sm:$0xff] }
0x1526   : > { %2530 = vperm.xlu2 %3085, %v2225_v52  }
0x1527   : > { %v2169_v3 = vsub.f32 0.0, %v2168_v2 }
0x1529   : > { %v2170_v4 = vmul.f32 1.442695, %v2169_v3  ;;  %v3871_v6 = vpop.permute.xlu1 %2607 }
0x152a   : > { %v2285_v26 = vpop.permute.xlu0 %2284 }
0x152b   : > { %3167 = vpow2.f32 %v2170_v4 }
0x152e   : > { %2357 = vrot.lane.b32.xlu2 %v2356_v5, %s4227_s28  ;;  %v3874_v7 = vpop.permute.xlu2 %2560 }
0x1531   : > { %v3168_v39 = vpop.eup %3167 }
0x1532   : > { %v2172_v9 = vadd.f32 1.0, %v3168_v39  ;;  %v2175_v10 = vmul.f32 -0.5, %v3168_v39  ;;  %v2178_v16 = vand.u32 2147483647, %v3168_v39 }
0x1533   : > { %v3877_v12 = vpop.permute.xlu1 %2329 }
0x1534   : > { %3169 = vlog2.f32 %v2172_v9  ;;  %v2176_v13 = vadd.f32 1.0, %v2175_v10  ;;  %vm2179_vm3 = vcmp.lt.f32.partialorder %v2178_v16, 0.0004427343  ;;  %v3916_v44 = vpop.permute.xlu0 %2517 }
0x1536   : > { %2498 = vrot.lane.b32.xlu2 %v2497_v11, %s4227_s28  ;;  %v2177_v19 = vmul.f32 %v3168_v39, %v2176_v13 }
0x1537   : > { %v3882_v15 = vpop.permute.xlu2 %2376 }
0x153a   : > { %v3170_v17 = vpop.eup %3169 }
0x153b   : > { %v2174_v18 = vmul.f32 0.6931472, %v3170_v17 }
0x153d   : > { %v2180_v22 = vsel %vm2179_vm3, %v2177_v19, %v2174_v18  ;;  %v3886_v25 = vpop.permute.xlu1 %2470  ;;  %v3938_v16 = vpop.permute.xlu0 %2294 }
0x153e   : > { %v2181_v24 = vadd.f32 %v2180_v22, %v2165_v20  ;;  %2639 = vrot.lane.b32.xlu2 %v2638_v21, %s4227_s28  ;;  %s3219_s28 = scalar_lea.hbm %s3218_s8, 1 }
0x153f   : > { %p3220_p11 = scmp.ne.s32.totalorder %s3218_s8, %s3219_s28 }
0x1540   : > { %v3888_v27 = vsel %vm2166_vm4, %v2163_v0, %v2181_v24 }
0x1541   : > { %v2268_v29 = vperm.slane %v3888_v27, 0  ;;  %v2315_v31 = vperm.slane %v3888_v27, 1  ;;  %v3897_v23 = vpop.permute.xlu2 %2423  ;;  %v2362_v32 = vperm.slane %v3888_v27, 2  ;;  %v3904_v38 = vmul.f32 %v3888_v27, %v3805_v36  ;;  %p3221_p12 = pnand %p3220_p11, %p3470_p5 }
0x1542   : > { %v2409_v40 = vperm.slane %v3888_v27, 3  ;;  %v2456_v43 = vperm.slane %v3888_v27, 4  ;;  %v2503_v54 = vperm.slane %v3888_v27, 5  ;;  %v2550_v9 = vperm.slane %v3888_v27, 6 }
0x1543   : > { %v2269_v33 = vmul.f32 %v2268_v29, %v3893_v28  ;;  %v2316_v35 = vmul.f32 %v2315_v31, %v3893_v28  ;;  %v2363_v8 = vmul.f32 %v2362_v32, %v3893_v28  ;;  %v2287_v45 = vperm.slane %v3904_v38, 0  ;;  %p3222_p13 = pneg %p3221_p12 }
0x1544   : > { %v2410_v47 = vmul.f32 %v2409_v40, %v3893_v28  ;;  %v2270_v48 = vmul.f32 %v2268_v29, %v3911_v42  ;;  %v2317_v51 = vmul.f32 %v2315_v31, %v3911_v42  ;;  %v2332_v52 = vperm.slane %v3904_v38, 1 }
0x1545   : > { %v2271_v37 = vmul.f32 1.442695, %v2269_v33  ;;  %v2318_v41 = vmul.f32 1.442695, %v2316_v35  ;;  %v2365_v46 = vmul.f32 1.442695, %v2363_v8  ;;  %v2457_v53 = vmul.f32 %v2456_v43, %v3893_v28 }
0x1546   : > { %v3913_v30 = vpop.permute.xlu1 %2564  ;;  %v2273_v50 = vmul.f32 1.442695, %v2270_v48  ;;  %v2412_v59 = vmul.f32 1.442695, %v2410_v47  ;;  %v2288_v61 = vmul.f32 %v2287_v45, %v3849_v56  ;;  %v2320_v62 = vmul.f32 1.442695, %v2317_v51 }
0x1547   : > { %3171 = vpow2.f32 %v2271_v37  ;;  %v2364_v0 = vmul.f32 %v2362_v32, %v3911_v42  ;;  %v2379_v5 = vperm.slane %v3904_v38, 2  ;;  %v2333_v39 = vmul.f32 %v2332_v52, %v3853_v58 }
0x1548   : > { %3173 = vpow2.f32 %v2318_v41  ;;  %v2459_v10 = vmul.f32 1.442695, %v2457_v53  ;;  %v2504_v56 = vmul.f32 %v2503_v54, %v3893_v28  ;;  %v2411_v17 = vmul.f32 %v2409_v40, %v3911_v42 }
0x1549   : > { %3175 = vpow2.f32 %v2365_v46  ;;  %v2367_v13 = vmul.f32 1.442695, %v2364_v0  ;;  %v2426_v21 = vperm.slane %v3904_v38, 3  ;;  %v2380_v22 = vmul.f32 %v2379_v5, %v3858_v60 }
0x154a   : > { %v3921_v49 = vpop.permute.xlu2 %2611  ;;  %3177 = vpow2.f32 %v2273_v50  ;;  %v2551_v24 = vmul.f32 %v2550_v9, %v3893_v28  ;;  %v2289_v29 = vmul.f32 %v2287_v45, %v2285_v26  ;;  %v2506_v32 = vmul.f32 1.442695, %v2504_v56 }
0x154b   : > { %3179 = vpow2.f32 %v2412_v59  ;;  %v2414_v35 = vmul.f32 1.442695, %v2411_v17  ;;  %v2458_v37 = vmul.f32 %v2456_v43, %v3911_v42  ;;  %v2597_v8 = vperm.slane %v3888_v27, 7 }
0x154c   : > { %3181 = vpow2.f32 %v2320_v62  ;;  %v2473_v60 = vperm.slane %v3904_v38, 4  ;;  %v2427_v26 = vmul.f32 %v2426_v21, %v3880_v14  ;;  %v2553_v45 = vmul.f32 1.442695, %v2551_v24 }
0x154d   : > { %v3172_v34 = vpop.eup %3171  ;;  %3183 = vpow2.f32 %v2459_v10  ;;  %v2334_v48 = vmul.f32 %v2332_v52, %v3877_v12  ;;  %v2461_v53 = vmul.f32 1.442695, %v2458_v37  ;;  %v2520_v0 = vperm.slane %v3904_v38, 5 }
0x154e   : > { %v2275_v57 = vmul.f32 0.0, %v3172_v34  ;;  %v3174_v4 = vpop.eup %3173  ;;  %3185 = vpow2.f32 %v2367_v13  ;;  %v2505_v34 = vmul.f32 %v2503_v54, %v3911_v42  ;;  %v2474_v52 = vmul.f32 %v2473_v60, %v3867_v1  ;;  %v3970_v54 = vpop.permute.xlu0 %2526 }
0x154f   : > { %v3176_v19 = vpop.eup %3175  ;;  %3187 = vpow2.f32 %v2506_v32  ;;  %v2428_v24 = vmul.f32 %v2426_v21, %v3897_v23 }
0x1550   : > { %v3929_v2 = vadd.f32 %v2288_v61, %v2275_v57  ;;  %v3931_v3 = vpop.permute.xlu1 %2338  ;;  %v3178_v58 = vpop.eup %3177  ;;  %3189 = vpow2.f32 %v2414_v35  ;;  %v2598_v57 = vmul.f32 %v2597_v8, %v3893_v28  ;;  %v2508_v28 = vmul.f32 1.442695, %v2505_v34 }
0x1551   : > { %v2276_v33 = vmul.f32 0.0, %v3178_v58  ;;  %v3180_v40 = vpop.eup %3179  ;;  %3191 = vpow2.f32 %v2553_v45  ;;  %v2567_v58 = vperm.slane %v3904_v38, 6  ;;  %v2475_v45 = vmul.f32 %v2473_v60, %v3886_v25 }
0x1552   : > { %v2322_v11 = vmul.f32 %v3174_v4, %v3929_v2  ;;  %v3182_v47 = vpop.eup %3181  ;;  %v2381_v4 = vmul.f32 %v2379_v5, %v3882_v15  ;;  %3193 = vpow2.f32 %v2461_v53  ;;  %v2600_v56 = vmul.f32 1.442695, %v2598_v57  ;;  %v3109_v15 = vld [vmem:[%s4125_s24] ss:$0 sm:$0xff] }
0x1553   : > { %v3941_v18 = vpop.permute.xlu2 %2479  ;;  %v2291_v46 = vadd.f32 %v2289_v29, %v2276_v33  ;;  %v3184_v59 = vpop.eup %3183  ;;  %v2521_v5 = vmul.f32 %v2520_v0, %v3865_v63  ;;  %3195 = vpow2.f32 %v2508_v28  ;;  %v2614_v33 = vperm.slane %v3904_v38, 7 }
0x1554   : > { %v3943_v20 = vadd.f32 %v2333_v39, %v2322_v11  ;;  %v3186_v12 = vpop.eup %3185  ;;  %v2552_v11 = vmul.f32 %v2550_v9, %v3911_v42  ;;  %3197 = vpow2.f32 %v2600_v56  ;;  %v2255_v63 = vmul.f32 %v3109_v15, %v3805_v36 }
0x1555   : > { %v2323_v43 = vmul.f32 %v3182_v47, %v2291_v46  ;;  %v3188_v13 = vpop.eup %3187  ;;  %v2302_v47 = vmul.f32 %v3938_v16, %v3929_v2  ;;  %v2568_v21 = vmul.f32 %v2567_v58, %v3874_v7  ;;  %v2615_v36 = vmul.f32 %v2614_v33, %v3871_v6 }
0x1556   : > { %v2369_v31 = vmul.f32 %v3176_v19, %v3943_v20  ;;  %v3190_v1 = vpop.eup %3189  ;;  %v2555_v29 = vmul.f32 1.442695, %v2552_v11  ;;  %v2260_v53 = vmul.f32 %v3847_v55, %v2255_v63 }
0x1557   : > { %v3963_v14 = vadd.f32 %v2334_v48, %v2323_v43  ;;  %v3192_v32 = vpop.eup %3191  ;;  %v2304_v7 = vsel %vm1405_vm10, %v2302_v47, 0.0 }
0x1558   : > { %v3951_v41 = vadd.f32 %v2380_v22, %v2369_v31  ;;  %3199 = vpow2.f32 %v2555_v29 }
0x1559   : > { %v3956_v50 = vpop.permute.xlu1 %2385  ;;  %v2370_v10 = vmul.f32 %v3186_v12, %v3963_v14 }
0x155a   : > { %v2416_v51 = vmul.f32 %v3180_v40, %v3951_v41  ;;  %v3194_v40 = vpop.eup %3193 }
0x155b   : > { %v3976_v19 = vadd.f32 %v2381_v4, %v2370_v10  ;;  %v3196_v34 = vpop.eup %3195  ;;  %v2599_v4 = vmul.f32 %v2597_v8, %v3911_v42 }
0x155c   : > { %v2429_v61 = vadd.f32 %v2427_v26, %v2416_v51  ;;  %v3965_v62 = vpop.permute.xlu2 %2620  ;;  %v2437_v51 = vpop.permute.xlu0 %2436 }
0x155d   : > { %v2417_v9 = vmul.f32 %v3190_v1, %v3976_v19  ;;  %v3198_v16 = vpop.eup %3197  ;;  %v2602_v42 = vmul.f32 1.442695, %v2599_v4 }
0x155e   : > { %v2463_v39 = vmul.f32 %v3184_v59, %v2429_v61  ;;  %v2522_v59 = vmul.f32 %v2520_v0, %v3916_v44  ;;  %v3200_v56 = vpop.eup %3199  ;;  %v2345_v44 = vmul.f32 %v3931_v3, %v3943_v20  ;;  %v2261_v0 = vsel %vm1405_vm10, %v2260_v53, 0.0 }
0x155f   : > { %v2430_v37 = vadd.f32 %v2428_v24, %v2417_v9  ;;  %v2262_v9 = vrot.slane %v2261_v0, 4  ;;  %3201 = vpow2.f32 %v2602_v42 }
0x1560   : > { %v3974_v17 = vadd.f32 %v2474_v52, %v2463_v39  ;;  %v2347_v3 = vsel %vm1405_vm10, %v2345_v44, 0.0 }
0x1561   : > { %v2464_v48 = vmul.f32 %v3194_v40, %v2430_v37  ;;  %v2440_v39 = vmul.f32 %v2437_v51, %v2430_v37 }
0x1562   : > { %v2510_v22 = vmul.f32 %v3188_v13, %v3974_v17  ;;  %v2569_v13 = vmul.f32 %v2567_v58, %v3913_v30  ;;  %v2486_v58 = vmul.f32 %v3941_v18, %v3974_v17 }
0x1563   : > { %v2433_v31 = vpop.permute.xlu1 %2432  ;;  %v2477_v2 = vadd.f32 %v2475_v45, %v2464_v48  ;;  %v2442_v8 = vsel %vm1405_vm10, %v2440_v39, 0.0 }
0x1564   : > { %v3987_v35 = vadd.f32 %v2521_v5, %v2510_v22  ;;  %v2439_v12 = vmul.f32 %v2433_v31, %v2429_v61  ;;  %v2578_v20 = vpop.permute.xlu0 %2577  ;;  %v2488_v51 = vsel %vm1405_vm10, %v2486_v58, 0.0 }
0x1565   : > { %v2300_v26 = vpop.permute.xlu2 %2299  ;;  %v2511_v60 = vmul.f32 %v3196_v34, %v2477_v2  ;;  %v3202_v34 = vpop.eup %3201 }
0x1566   : > { %v2557_v23 = vmul.f32 %v3192_v32, %v3987_v35  ;;  %v2303_v43 = vmul.f32 %v2300_v26, %v2291_v46  ;;  %v2441_v61 = vsel %vm1405_vm10, %v2439_v12, 0.0  ;;  %v2996_v26 = vld [vmem:[%s4126_s25 + $0x18] sm:$0xff] }
0x1567   : > { %v4005_v10 = vadd.f32 %v2522_v59, %v2511_v60  ;;  %v2443_v22 = vadd.f32 %v2442_v8, %v2441_v61  ;;  %2685 = vmatpush.bf16.msra.mxu3 %v2996_v26  ;;  %v2533_v61 = vmul.f32 %v3970_v54, %v3987_v35  ;;  %v2993_v35 = vld [vmem:[%s4126_s25] sm:$0xff] }
0x1568   : > { %v2570_v57 = vadd.f32 %v2568_v21, %v2557_v23  ;;  %v2305_v25 = vsel %vm1405_vm10, %v2303_v43, 0.0  ;;  %v2392_v21 = vmul.f32 %v3956_v50, %v3951_v41  ;;  %v2995_v43 = vld [vmem:[%s4126_s25 + $0x10] sm:$0xff] }
0x1569   : > { %v2306_v46 = vadd.f32 %v2305_v25, %v2304_v7  ;;  %v2558_v1 = vmul.f32 %v3200_v56, %v4005_v10  ;;  %v2444_v37 = vrot.slane %v2443_v22, 4  ;;  %v2616_v25 = vmul.f32 %v2614_v33, %v3921_v49  ;;  %v2994_v33 = vld [vmem:[%s4126_s25 + $0x8] sm:$0xff] }
0x156a   : > { %v2604_v52 = vmul.f32 %v3198_v16, %v2570_v57  ;;  %v2394_v7 = vsel %vm1405_vm10, %v2392_v21, 0.0 }
0x156b   : > { %v2307_v28 = vrot.slane %v2306_v46, 4  ;;  %v2571_v5 = vadd.f32 %v2569_v13, %v2558_v1  ;;  %v2445_v53 = vadd.f32 %v2444_v37, %v2443_v22  ;;  %2686 = vmatpush.bf16.msra.mxu3 %v2995_v43  ;;  %v2697_v22 = vld [vmem:[%s4232_s10 + $0x18] sm:$0xff] }
0x156c   : > { %v2617_v6 = vadd.f32 %v2615_v36, %v2604_v52  ;;  %v2574_v11 = vpop.permute.xlu1 %2573  ;;  %2714 = vmatpush.msrb.mxu1 %v2697_v22  ;;  %v2698_v22 = vld [vmem:[%s4237_s6] sm:$0x1]  ;;  %s3223_s6 = scalar_lea.hbm %s4236_s12, 2 }
0x156d   : > { %v2308_v24 = vadd.f32 %v2307_v28, %v2306_v46  ;;  %v2581_v31 = vmul.f32 %v2578_v20, %v2571_v5  ;;  %v2580_v32 = vmul.f32 %v2574_v11, %v2570_v57  ;;  %v2605_v59 = vmul.f32 %v3202_v34, %v2571_v5  ;;  %p3225_p1 = scmp.lt.s32.totalorder %s3223_s6, %s3219_s28 }
0x156e   : > { %v2343_v27 = vpop.permute.xlu2 %2342  ;;  %v2627_v4 = vmul.f32 %v3965_v62, %v2617_v6  ;;  %v2446_v39 = vrot.slane %v2445_v53, 2 }
0x156f   : > { %v2346_v15 = vmul.f32 %v2343_v27, %v3963_v14  ;;  %v2309_v40 = vrot.slane %v2308_v24, 2  ;;  %v2263_v14 = vadd.f32 %v2262_v9, %v2261_v0  ;;  %v2583_v23 = vsel %vm1405_vm10, %v2581_v31, 0.0  ;;  %2687 = vmatpush.bf16.msra.mxu3 %v2994_v33  ;;  %p3226_p2 = por %p3225_p1, %p3224_p0 }
0x1570   : > { %v2582_v45 = vsel %vm1405_vm10, %v2580_v32, 0.0  ;;  %v2618_v56 = vadd.f32 %v2616_v25, %v2605_v59  ;;  %v2629_v62 = vsel %vm1405_vm10, %v2627_v4, 0.0  ;;  %v2447_v6 = vadd.f32 %v2446_v39, %v2445_v53 }
0x1571   : > { %v2348_v29 = vsel %vm1405_vm10, %v2346_v15, 0.0  ;;  %v2310_v36 = vadd.f32 %v2309_v40, %v2308_v24  ;;  %v2584_v41 = vadd.f32 %v2583_v23, %v2582_v45  ;;  %v2696_v24 = vld [vmem:[%s4232_s10 + $0x10] sm:$0xff]  ;;  %v2535_v9 = vsel %vm1405_vm10, %v2533_v61, 0.0  ;;  %p3227_p3 = pnand %p3226_p2, %p3222_p13 }
0x1572   : > { %v2349_v30 = vadd.f32 %v2348_v29, %v2347_v3  ;;  %2715 = vmatpush.msrb.mxu1 %v2696_v24  ;;  %v2448_v40 = vrot.slane %v2447_v6, 1 }
0x1573   : > { %v2585_v28 = vrot.slane %v2584_v41, 4  ;;  %2688 = vmatpush.bf16.msra.mxu3 %v2993_v35 }
0x1574   : > { %v2350_v63 = vrot.slane %v2349_v30, 4 }
0x1575   : > { %v2484_v47 = vpop.permute.xlu1 %2483  ;;  %v2586_v8 = vadd.f32 %v2585_v28, %v2584_v41 }
0x1576   : > { %v2487_v48 = vmul.f32 %v2484_v47, %v2477_v2  ;;  %v2351_v18 = vadd.f32 %v2350_v63, %v2349_v30  ;;  %v2264_v2 = vrot.slane %v2263_v14, 2  ;;  %v2695_v30 = vld [vmem:[%s4232_s10 + $0x8] sm:$0xff] }
0x1577   : > { %v2390_v17 = vpop.permute.xlu2 %2389  ;;  %v2587_v63 = vrot.slane %v2586_v8, 2  ;;  %2716 = vmatpush.msrb.mxu1 %v2695_v30 }
0x1578   : > { %v2489_v57 = vsel %vm1405_vm10, %v2487_v48, 0.0  ;;  %v2393_v16 = vmul.f32 %v2390_v17, %v3976_v19  ;;  %v2352_v46 = vrot.slane %v2351_v18, 2  ;;  %v2311_v19 = vrot.slane %v2310_v36, 1 }
0x1579   : > { %v2490_v50 = vadd.f32 %v2489_v57, %v2488_v51  ;;  %v2265_v44 = vadd.f32 %v2264_v2, %v2263_v14  ;;  %v2588_v34 = vadd.f32 %v2587_v63, %v2586_v8  ;;  %v2449_v57 = vadd.f32 %v2448_v40, %v2447_v6 }
0x157a   : > { %v2395_v12 = vsel %vm1405_vm10, %v2393_v16, 0.0  ;;  %v2353_v49 = vadd.f32 %v2352_v46, %v2351_v18  ;;  %v2312_v42 = vadd.f32 %v2311_v19, %v2310_v36  ;;  %v2452_v16 = vpop.permute.xlu0 %2451 }
0x157b   : > { %v2491_v60 = vrot.slane %v2490_v50, 4  ;;  %v2396_v52 = vadd.f32 %v2395_v12, %v2394_v7  ;;  %v2266_v20 = vrot.slane %v2265_v44, 1  ;;  %v2589_v12 = vrot.slane %v2588_v34, 1 }
0x157c   : > { %v2354_v31 = vrot.slane %v2353_v49, 1  ;;  %v2313_v47 = vmul.f32 %v2312_v42, %v3847_v55 }
0x157d   : > { %v2397_v11 = vrot.slane %v2396_v52, 4  ;;  %v2492_v13 = vadd.f32 %v2491_v60, %v2490_v50  ;;  %v2267_v23 = vadd.f32 %v2266_v20, %v2265_v44  ;;  %v2454_v60 = vmul.f32 %v2452_v16, %v2449_v57 }
0x157e   : > { %v2625_v0 = vpop.permute.xlu1 %2624  ;;  %v2355_v51 = vadd.f32 %v2354_v31, %v2353_v49  ;;  %v2590_v44 = vadd.f32 %v2589_v12, %v2588_v34 }
0x157f   : > { %v2398_v1 = vadd.f32 %v2397_v11, %v2396_v52  ;;  %v2628_v38 = vmul.f32 %v2625_v0, %v2618_v56  ;;  %v2493_v32 = vrot.slane %v2492_v13, 2  ;;  %v2314_v53 = vadd.f32 %v2313_v47, %v2267_v23 }
0x1580   : > { %v2531_v27 = vpop.permute.xlu2 %2530 }
0x1581   : > { %v2630_v15 = vsel %vm1405_vm10, %v2628_v38, 0.0  ;;  %v2534_v5 = vmul.f32 %v2531_v27, %v4005_v10  ;;  %v2399_v54 = vrot.slane %v2398_v1, 2  ;;  %v2494_v18 = vadd.f32 %v2493_v32, %v2492_v13 }
0x1582   : > { %v2631_v3 = vadd.f32 %v2630_v15, %v2629_v62 }
0x1583   : > { %v2536_v10 = vsel %vm1405_vm10, %v2534_v5, 0.0  ;;  %v2400_v29 = vadd.f32 %v2399_v54, %v2398_v1  ;;  %v2495_v55 = vrot.slane %v2494_v18, 1  ;;  %v2593_v1 = vpop.permute.xlu0 %2592  ;;  %v2694_v5 = vld [vmem:[%s4232_s10] sm:$0xff] }
0x1584   : > { %v2632_v58 = vrot.slane %v2631_v3, 4  ;;  %v2537_v37 = vadd.f32 %v2536_v10, %v2535_v9  ;;  %v2595_v49 = vmul.f32 %v2593_v1, %v2590_v44  ;;  %2717 = vmatpush.msrb.mxu1 %v2694_v5 }
0x1585   : > { %v2401_v14 = vrot.slane %v2400_v29, 1  ;;  %v2496_v4 = vadd.f32 %v2495_v55, %v2494_v18 }
0x1586   : > { %v2538_v26 = vrot.slane %v2537_v37, 4  ;;  %v2633_v21 = vadd.f32 %v2632_v58, %v2631_v3  ;;  %v2405_v45 = vpop.permute.xlu1 %2404 }
0x1587   : > { %v2402_v48 = vadd.f32 %v2401_v14, %v2400_v29 }
0x1588   : > { %v2539_v17 = vadd.f32 %v2538_v26, %v2537_v37  ;;  %v2358_v43 = vpop.permute.xlu2 %2357  ;;  %v2634_v2 = vrot.slane %v2633_v21, 2 }
0x1589   : > { %v2360_v36 = vmul.f32 %v2358_v43, %v2355_v51  ;;  %v2407_v50 = vmul.f32 %v2405_v45, %v2402_v48 }
0x158a   : > { %v2540_v41 = vrot.slane %v2539_v17, 2  ;;  %v2635_v39 = vadd.f32 %v2634_v2, %v2633_v21 }
0x158b   : > { %v2361_v59 = vadd.f32 %v2360_v36, %v2314_v53 }
0x158c   : > { %v2541_v7 = vadd.f32 %v2540_v41, %v2539_v17  ;;  %v2636_v13 = vrot.slane %v2635_v39, 1 }
0x158d   : > { %v2408_v25 = vadd.f32 %v2407_v50, %v2361_v59 }
0x158e   : > { %v2542_v52 = vrot.slane %v2541_v7, 1  ;;  %v2546_v11 = vpop.permute.xlu1 %2545  ;;  %v2637_v62 = vadd.f32 %v2636_v13, %v2635_v39 }
0x158f   : > { %v2455_v46 = vadd.f32 %v2454_v60, %v2408_v25 }
0x1590   : > { %v2543_v19 = vadd.f32 %v2542_v52, %v2541_v7  ;;  %v2499_v28 = vpop.permute.xlu2 %2498 }
0x1591   : > { %v2501_v56 = vmul.f32 %v2499_v28, %v2496_v4 }
0x1592   : > { %v2548_v61 = vmul.f32 %v2546_v11, %v2543_v19 }
0x1593   : > { %v2502_v0 = vadd.f32 %v2501_v56, %v2455_v46 }
0x1595   : > { %v2549_v38 = vadd.f32 %v2548_v61, %v2502_v0 }
0x1597   : > { %v2596_v33 = vadd.f32 %v2595_v49, %v2549_v38 }
0x1598   : > { %v2640_v6 = vpop.permute.xlu2 %2639 }
0x1599   : > { %v2642_v27 = vmul.f32 %v2640_v6, %v2637_v62 }
0x159b   : > { %v2643_v42 = vadd.f32 %v2642_v27, %v2596_v33 }
0x159d   : > { %v2644_v8 = vmul.f32 0.125, %v2643_v42 }
0x159f   : > { %v2653_v15 = vpack.c.bf16 %v2644_v8, %v2644_v8 }
0x15a1   : > { %2971 = vmatmul.msk.bf16.vlgmr.msra.gmra.mxu3 %vm1405_vm10, %v2653_v15  ;;  %vm2722_vm10 = vcmask 16384  }
0x1624   : > { %v2690_v54 = vpop.f32.mrf.mxu3 }
0x1625   : > { %2972 = vmatmul.msk.f32.vlgmr.msrb.gmra.mxu1 %vm858_vm0, %v2690_v54 }
0x162c   : > { %v2692_v35 = vpop.f32.mrf.mxu3 }
0x16a2   : > { %v2719_v24 = vpop.f32.mrf.mxu1 }
0x16a3   : > { %v2720_v9 = vadd.f32 %v2719_v24, %v2698_v22 }
0x16a5   : > { %2723 = vst.msk [vmem:[%s846_s11] sm:$0x1] %vm2722_vm10, %v2720_v9 }
0x16a6   : > { %3230 = shalt.err (!%p3227_p3)
}
0x16a7   : > { %2997 = dma.vmem_to_hbm [thread:$0]  (%p3470_p5), %s2736_s13, 16, %s2738_s14, %s2725_s0  }
0x16a8 PF: > { %s4239_s11 = sld [smem:[#allocation8_spill]] }
0x16a9   : > { %s4240_s26 = sld [smem:[#allocation5_spill]] }
0x16ae   : > { %p3003_p4 = scmp.ge.s32.totalorder %s4239_s11, 2 }
0x16af   : > { %s2749_s30 = sand.u32 1, %s4240_s26  }
0x16b0   : > { %p3000_p7 = pnand %p3003_p4, %p3474_p6  ;;  %s2750_s9 = scalar_lea.sflag [#allocation3], %s2749_s30 }
0x16b2   : > { %p3001_p8 = pneg %p3000_p7 }
0x16b4   : > { %3248 = dma.done.wait (%p3001_p8), %s2750_s9, 16  }
0x16b5   : > { %3250 = vsyncadd (%p3001_p8), %s2750_s9, 4294967280  ;;  %s4242_s30 = sld [smem:[#allocation10_spill]] }
0x16b6   : > { %s4243_s8 = sld [smem:[#allocation6_spill]] }
0x16b7   : > { %s4244_s5 = sld [smem:[#allocation7_spill]] }
0x16b8   : > { %s4245_s9 = sld [smem:[#allocation11_spill]] }
0x16bb   : > { %p38_p9 = scmp.ge.s32.totalorder %s4242_s30, 4  }
0x16bd   :  { %40 = sbr.rel (!%p38_p9) target bundleno = 22 (0x16), region = 182 }
0x16c2   :  { %2755 = vsyncpa [#allocation3], 1 }
0x16c3   :  { %2757 = vsyncpa [#allocation3 + $0x1], 1 }

</bundles_post_ra>
